<compile_context>
chip_gen: v7x
topology: tpu7x:2x2x1
jax: 0.10.0
libtpu: 0.0.40
codegen_flags: <defaults>
</compile_context>

<pallas_src>
import math

import jax
import jax.numpy as jnp
from jax.experimental import pallas as pl
from jax.experimental.pallas import tpu as pltpu


def _layernorm(x, gamma, beta, eps=1e-5):
    mu = jnp.mean(x, axis=-1, keepdims=True)
    var = jnp.mean(jnp.square(x - mu), axis=-1, keepdims=True)
    return (x - mu) * jax.lax.rsqrt(var + eps) * gamma + beta


def encoder_layer_kernel(x1q_ref, x1f_ref, x2q_ref,
                         w3_ref, b3_ref, g1_ref, be1_ref,
                         w1a_ref, w1b_ref, b1_ref,
                         w2a_ref, w2b_ref, b2a_ref, b2b_ref,
                         g2a_ref, g2b_ref, be2a_ref, be2b_ref,
                         out_ref, attn_ref):
    f32 = jnp.float32
    bf16 = jnp.bfloat16

    x1q = x1q_ref[0]          # [tq, dh] f32  second channel half, query rows
    x1f = x1f_ref[0]          # [L,  dh] f32  second channel half, full seq (K/V)
    x2q = x2q_ref[0]          # [tq, dh] f32  first channel half
    dh = x1q.shape[-1]

    # conv3 branch: pointwise conv == channel matmul (bf16 MXU, f32 accumulate)
    x2c = jnp.dot(x2q.astype(bf16), w3_ref[...],
                  preferred_element_type=f32) + b3_ref[0]

    # self-attention: softmax(Q K^T / sqrt(E)) V with Q = tq rows, K = V = full x1
    scale = 1.0 / math.sqrt(dh)
    scores = jnp.dot(x1q.astype(bf16), x1f.astype(bf16).T,
                     preferred_element_type=f32) * scale          # [tq, L] f32
    scores = scores - jnp.max(scores, axis=-1, keepdims=True)
    p = jnp.exp(scores)
    inv_den = pl.reciprocal(jnp.sum(p, axis=-1, keepdims=True), approx=True)
    attn = p * inv_den                                            # [tq, L] f32
    new_x = jnp.dot(attn.astype(bf16), x1f.astype(bf16),
                    preferred_element_type=f32)

    # residual + LayerNorm(d_model // 2)   (dropout == identity in eval mode)
    x1n = _layernorm(x1q + new_x, g1_ref[0], be1_ref[0])

    # FFN: conv1 on cat(x2c, x1n) == x2c @ w1[:dh] + x1n @ w1[dh:]  (no concat)
    h = (jnp.dot(x2c.astype(bf16), w1a_ref[...], preferred_element_type=f32)
         + jnp.dot(x1n.astype(bf16), w1b_ref[...], preferred_element_type=f32)
         + b1_ref[0])
    h = jnp.maximum(h, 0.0).astype(bf16)                          # ReLU
    y_lo = jnp.dot(h, w2a_ref[...], preferred_element_type=f32) + b2a_ref[0]
    y_hi = jnp.dot(h, w2b_ref[...], preferred_element_type=f32) + b2b_ref[0]

    # residual + LayerNorm(d_model) over the concatenated channels, computed
    # from the two halves (no concat materialized), f32 elementwise.
    r_lo = x2c + y_lo
    r_hi = x1n + y_hi
    inv_d = 1.0 / float(2 * dh)
    mu = (jnp.sum(r_lo, axis=-1, keepdims=True)
          + jnp.sum(r_hi, axis=-1, keepdims=True)) * inv_d
    c_lo = r_lo - mu
    c_hi = r_hi - mu
    var = (jnp.sum(c_lo * c_lo, axis=-1, keepdims=True)
           + jnp.sum(c_hi * c_hi, axis=-1, keepdims=True)) * inv_d
    rstd = jax.lax.rsqrt(var + 1e-5)
    out_ref[0, :, :dh] = c_lo * rstd * g2a_ref[0] + be2a_ref[0]
    out_ref[0, :, dh:] = c_hi * rstd * g2b_ref[0] + be2b_ref[0]
    attn_ref[0] = attn.astype(attn_ref.dtype)


def _pick_tq(L):
    for t in (512, 256, 128, 64, 32, 16, 8):
        if L % t == 0:
            return t
    return L


def _vmem_limit_bytes(L, D, d_ff, tq, attn_itemsize):
    dh = D // 2
    f32, bf16 = 4, 2
    # double-buffered streamed blocks (inputs + outputs)
    stream = 2 * (tq * dh * f32 + L * dh * f32 + tq * dh * f32
                  + tq * D * f32 + tq * L * attn_itemsize)
    # weights / small vectors (also double-buffered by the pipeline)
    weights = 2 * ((dh * dh + 2 * dh * d_ff + 2 * d_ff * dh) * bf16
                   + (d_ff + 9 * dh) * f32)
    # in-kernel temporaries: scores/p/attn tiles, bf16 copies, FFN hidden, halves
    scratch = tq * L * f32 * 3 + tq * d_ff * (f32 + bf16) + tq * D * f32 * 6
    est = stream + weights + scratch
    return int(min(max(2 * est, 32 * 1024 * 1024), 64 * 1024 * 1024))


def encoder_layer(x, params, *, attn_dtype=jnp.float32):
    B, L, D = x.shape
    assert D % 2 == 0, "d_model must be even (torch.split uses D // 2)"
    dh = D // 2
    d_ff = params["w1"].shape[1]
    tq = _pick_tq(L)
    nq = L // tq

    bf16 = jnp.bfloat16
    # torch.split(x, D//2, dim=2): split_x[0] -> conv3 branch, split_x[1] -> attention
    x2 = x[:, :, :dh]
    x1 = x[:, :, dh:]

    # weights in bf16 (MXU operands); biases / norm params stay f32
    w3 = params["w3"].astype(bf16)
    w1a = params["w1"][:dh, :].astype(bf16)   # multiplies conv3 half
    w1b = params["w1"][dh:, :].astype(bf16)   # multiplies attention half
    w2a = params["w2"][:, :dh].astype(bf16)   # produces first output half
    w2b = params["w2"][:, dh:].astype(bf16)   # produces second output half
    b2a, b2b = params["b2"][:, :dh], params["b2"][:, dh:]
    g2a, g2b = params["g2"][:, :dh], params["g2"][:, dh:]
    be2a, be2b = params["be2"][:, :dh], params["be2"][:, dh:]

    def rep(shape):
        return pl.BlockSpec(shape, lambda b, q: tuple(0 for _ in shape))

    grid_spec = pltpu.PrefetchScalarGridSpec(
        num_scalar_prefetch=0,
        grid=(B, nq),
        in_specs=[
            pl.BlockSpec((1, tq, dh), lambda b, q: (b, q, 0)),   # x1 query tile
            pl.BlockSpec((1, L, dh), lambda b, q: (b, 0, 0)),    # x1 full (K/V)
            pl.BlockSpec((1, tq, dh), lambda b, q: (b, q, 0)),   # x2 tile
            rep((dh, dh)), rep((1, dh)),                         # w3, b3
            rep((1, dh)), rep((1, dh)),                          # norm1 gamma, beta
            rep((dh, d_ff)), rep((dh, d_ff)), rep((1, d_ff)),    # w1a, w1b, b1
            rep((d_ff, dh)), rep((d_ff, dh)),                    # w2a, w2b
            rep((1, dh)), rep((1, dh)),                          # b2a, b2b
            rep((1, dh)), rep((1, dh)),                          # norm2 gamma halves
            rep((1, dh)), rep((1, dh)),                          # norm2 beta halves
        ],
        out_specs=[
            pl.BlockSpec((1, tq, D), lambda b, q: (b, q, 0)),    # output
            pl.BlockSpec((1, tq, L), lambda b, q: (b, q, 0)),    # attention weights
        ],
    )

    out, attn = pl.pallas_call(
        encoder_layer_kernel,
        out_shape=(
            jax.ShapeDtypeStruct((B, L, D), jnp.float32),
            jax.ShapeDtypeStruct((B, L, L), attn_dtype),
        ),
        grid_spec=grid_spec,
        compiler_params=pltpu.CompilerParams(
            dimension_semantics=("parallel", "parallel"),
            vmem_limit_bytes=_vmem_limit_bytes(
                L, D, d_ff, tq, jnp.dtype(attn_dtype).itemsize),
        ),
    )(
        x1, x1, x2,
        w3, params["b3"], params["g1"], params["be1"],
        w1a, w1b, params["b1"],
        w2a, w2b, b2a, b2b, g2a, g2b, be2a, be2b,
    )
    return out, attn


def init_params(key, d_model, d_ff):
    d_half = d_model // 2
    ks = jax.random.split(key, 6)
    s = 0.05
    # conv weights stored pre-transposed as [C_in, C_out] (PyTorch keeps [C_out, C_in, 1])
    return {
        "w3": s * jax.random.normal(ks[0], (d_half, d_half), jnp.float32),
        "b3": s * jax.random.normal(ks[1], (1, d_half), jnp.float32),
        "w1": s * jax.random.normal(ks[2], (d_model, d_ff), jnp.float32),
        "b1": s * jax.random.normal(ks[3], (1, d_ff), jnp.float32),
        "w2": s * jax.random.normal(ks[4], (d_ff, d_model), jnp.float32),
        "b2": s * jax.random.normal(ks[5], (1, d_model), jnp.float32),
        "g1": jnp.ones((1, d_half), jnp.float32),
        "be1": jnp.zeros((1, d_half), jnp.float32),
        "g2": jnp.ones((1, d_model), jnp.float32),
        "be2": jnp.zeros((1, d_model), jnp.float32),
    }


def encoder_layer_reference(x, params):
    """Pure-JAX f32 reference of the same forward pass (for a sanity check)."""
    D = x.shape[-1]
    dh = D // 2
    x2 = x[..., :dh]
    x1 = x[..., dh:]
    x2 = jnp.einsum("bld,de->ble", x2, params["w3"]) + params["b3"][0]
    scale = 1.0 / math.sqrt(dh)
    scores = jnp.einsum("bqd,bkd->bqk", x1, x1) * scale
    attn = jax.nn.softmax(scores, axis=-1)
    new_x = jnp.einsum("bqk,bkd->bqd", attn, x1)
    x1 = _layernorm(x1 + new_x, params["g1"][0], params["be1"][0])
    xc = jnp.concatenate([x2, x1], axis=-1)
    y = jnp.einsum("bld,df->blf", xc, params["w1"]) + params["b1"][0]
    y = jnp.maximum(y, 0.0)
    y = jnp.einsum("blf,fd->bld", y, params["w2"]) + params["b2"][0]
    out = _layernorm(xc + y, params["g2"][0], params["be2"][0])
    return out, attn


if __name__ == "__main__":
    # Small but lane-dense shapes: d_half = 128 (full lane width), L = 128.
    B, L, d_model = 2, 128, 256
    d_ff = 4 * d_model

    key = jax.random.PRNGKey(0)
    kx, kp = jax.random.split(key)
    x = jax.random.normal(kx, (B, L, d_model), jnp.float32)
    params = init_params(kp, d_model, d_ff)

    out, attn = encoder_layer(x, params)
    jax.block_until_ready((out, attn))

    assert out.shape == (B, L, d_model)
    assert attn.shape == (B, L, L)
    assert bool(jnp.all(jnp.isfinite(out)))
    assert bool(jnp.all(jnp.isfinite(attn)))

    # Loose sanity check vs. the f32 reference (kernel uses bf16 MXU operands
    # and an approximate reciprocal for the softmax denominator).
    ref_out, ref_attn = encoder_layer_reference(x, params)
    out_err = float(jnp.max(jnp.abs(out - ref_out)))
    attn_err = float(jnp.max(jnp.abs(attn.astype(jnp.float32) - ref_attn)))
    assert out_err < 0.15, f"output mismatch: {out_err}"
    assert attn_err < 0.05, f"attention mismatch: {attn_err}"

    print("KERNEL_OK")
</pallas_src>

<mosaic_0001>
module attributes {stable_mosaic.version = 11 : i64} {
  func.func @encoder_layer_kernel(%arg0: i32, %arg1: i32, %arg2: memref<1x128x128xf32, #tpu.memory_space<vmem>>, %arg3: memref<1x128x128xf32, #tpu.memory_space<vmem>>, %arg4: memref<1x128x128xf32, #tpu.memory_space<vmem>>, %arg5: memref<128x128xbf16, #tpu.memory_space<vmem>>, %arg6: memref<1x128xf32, #tpu.memory_space<vmem>>, %arg7: memref<1x128xf32, #tpu.memory_space<vmem>>, %arg8: memref<1x128xf32, #tpu.memory_space<vmem>>, %arg9: memref<128x1024xbf16, #tpu.memory_space<vmem>>, %arg10: memref<128x1024xbf16, #tpu.memory_space<vmem>>, %arg11: memref<1x1024xf32, #tpu.memory_space<vmem>>, %arg12: memref<1024x128xbf16, #tpu.memory_space<vmem>>, %arg13: memref<1024x128xbf16, #tpu.memory_space<vmem>>, %arg14: memref<1x128xf32, #tpu.memory_space<vmem>>, %arg15: memref<1x128xf32, #tpu.memory_space<vmem>>, %arg16: memref<1x128xf32, #tpu.memory_space<vmem>>, %arg17: memref<1x128xf32, #tpu.memory_space<vmem>>, %arg18: memref<1x128xf32, #tpu.memory_space<vmem>>, %arg19: memref<1x128xf32, #tpu.memory_space<vmem>>, %arg20: memref<1x128x256xf32, #tpu.memory_space<vmem>>, %arg21: memref<1x128x128xf32, #tpu.memory_space<vmem>>) attributes {dimension_semantics = [#tpu.dimension_semantics<parallel>, #tpu.dimension_semantics<parallel>], iteration_bounds = array<i64: 2, 1>, scalar_prefetch = 0 : i64, scratch_operands = 0 : i64, tpu.core_type = #tpu.core_type<tc>, window_params = [{transform_indices = @transform_0, window_bounds = array<i64: 1, 128, 128>}, {transform_indices = @transform_1, window_bounds = array<i64: 1, 128, 128>}, {transform_indices = @transform_2, window_bounds = array<i64: 1, 128, 128>}, {pipeline_mode = #tpu.pipeline_mode<synchronous>, transform_indices = @transform_3, window_bounds = array<i64: 128, 128>}, {pipeline_mode = #tpu.pipeline_mode<synchronous>, transform_indices = @transform_4, window_bounds = array<i64: 1, 128>}, {pipeline_mode = #tpu.pipeline_mode<synchronous>, transform_indices = @transform_5, window_bounds = array<i64: 1, 128>}, {pipeline_mode = #tpu.pipeline_mode<synchronous>, transform_indices = @transform_6, window_bounds = array<i64: 1, 128>}, {pipeline_mode = #tpu.pipeline_mode<synchronous>, transform_indices = @transform_7, window_bounds = array<i64: 128, 1024>}, {pipeline_mode = #tpu.pipeline_mode<synchronous>, transform_indices = @transform_8, window_bounds = array<i64: 128, 1024>}, {pipeline_mode = #tpu.pipeline_mode<synchronous>, transform_indices = @transform_9, window_bounds = array<i64: 1, 1024>}, {pipeline_mode = #tpu.pipeline_mode<synchronous>, transform_indices = @transform_10, window_bounds = array<i64: 1024, 128>}, {pipeline_mode = #tpu.pipeline_mode<synchronous>, transform_indices = @transform_11, window_bounds = array<i64: 1024, 128>}, {pipeline_mode = #tpu.pipeline_mode<synchronous>, transform_indices = @transform_12, window_bounds = array<i64: 1, 128>}, {pipeline_mode = #tpu.pipeline_mode<synchronous>, transform_indices = @transform_13, window_bounds = array<i64: 1, 128>}, {pipeline_mode = #tpu.pipeline_mode<synchronous>, transform_indices = @transform_14, window_bounds = array<i64: 1, 128>}, {pipeline_mode = #tpu.pipeline_mode<synchronous>, transform_indices = @transform_15, window_bounds = array<i64: 1, 128>}, {pipeline_mode = #tpu.pipeline_mode<synchronous>, transform_indices = @transform_16, window_bounds = array<i64: 1, 128>}, {pipeline_mode = #tpu.pipeline_mode<synchronous>, transform_indices = @transform_17, window_bounds = array<i64: 1, 128>}, {transform_indices = @transform_18, window_bounds = array<i64: 1, 128, 256>}, {transform_indices = @transform_19, window_bounds = array<i64: 1, 128, 128>}]} {
    %c0 = arith.constant 0 : index
    %c0_0 = arith.constant 0 : index
    %c0_1 = arith.constant 0 : index
    %0 = vector.load %arg2[%c0, %c0_0, %c0_1] : memref<1x128x128xf32, #tpu.memory_space<vmem>>, vector<1x128x128xf32>
    %1 = vector.shape_cast %0 : vector<1x128x128xf32> to vector<128x128xf32>
    %c0_2 = arith.constant 0 : index
    %c0_3 = arith.constant 0 : index
    %c0_4 = arith.constant 0 : index
    %2 = vector.load %arg3[%c0_2, %c0_3, %c0_4] : memref<1x128x128xf32, #tpu.memory_space<vmem>>, vector<1x128x128xf32>
    %3 = vector.shape_cast %2 : vector<1x128x128xf32> to vector<128x128xf32>
    %c0_5 = arith.constant 0 : index
    %c0_6 = arith.constant 0 : index
    %c0_7 = arith.constant 0 : index
    %4 = vector.load %arg4[%c0_5, %c0_6, %c0_7] : memref<1x128x128xf32, #tpu.memory_space<vmem>>, vector<1x128x128xf32>
    %5 = vector.shape_cast %4 : vector<1x128x128xf32> to vector<128x128xf32>
    %6 = arith.truncf %5 : vector<128x128xf32> to vector<128x128xbf16>
    %c0_8 = arith.constant 0 : index
    %c0_9 = arith.constant 0 : index
    %7 = vector.load %arg5[%c0_8, %c0_9] : memref<128x128xbf16, #tpu.memory_space<vmem>>, vector<128x128xbf16>
    %cst = arith.constant dense<0.000000e+00> : vector<128x128xf32>
    %8 = tpu.matmul %6, %7, %cst {dimension_numbers = #tpu.dot_dimension_numbers<[1], [0], [0], [1], [0, 0, 1, 1], [], []>} : vector<128x128xbf16>, vector<128x128xbf16>, vector<128x128xf32> -> vector<128x128xf32>
    %c0_10 = arith.constant 0 : index
    %c0_11 = arith.constant 0 : index
    %9 = vector.load %arg6[%c0_10, %c0_11] : memref<1x128xf32, #tpu.memory_space<vmem>>, vector<1x128xf32>
    %10 = vector.shape_cast %9 : vector<1x128xf32> to vector<128xf32>
    %11 = vector.shape_cast %10 : vector<128xf32> to vector<1x128xf32>
    %12 = vector.broadcast %11 : vector<1x128xf32> to vector<128x128xf32>
    %13 = arith.addf %8, %12 : vector<128x128xf32>
    %14 = arith.truncf %1 : vector<128x128xf32> to vector<128x128xbf16>
    %15 = arith.truncf %3 : vector<128x128xf32> to vector<128x128xbf16>
    %16 = tpu.transpose %15, [1, 0] : vector<128x128xbf16> -> vector<128x128xbf16>
    %cst_12 = arith.constant dense<0.000000e+00> : vector<128x128xf32>
    %17 = tpu.matmul %14, %16, %cst_12 {dimension_numbers = #tpu.dot_dimension_numbers<[1], [0], [0], [1], [0, 0, 1, 1], [], []>} : vector<128x128xbf16>, vector<128x128xbf16>, vector<128x128xf32> -> vector<128x128xf32>
    %cst_13 = arith.constant 0.0883883461 : f32
    %18 = vector.broadcast %cst_13 : f32 to vector<128x128xf32>
    %19 = arith.mulf %17, %18 : vector<128x128xf32>
    %cst_14 = arith.constant dense<0xFF800000> : vector<128xf32>
    %20 = vector.multi_reduction <maximumf>, %19, %cst_14 [1] : vector<128x128xf32> to vector<128xf32>
    %21 = vector.shape_cast %20 : vector<128xf32> to vector<128x1xf32>
    %22 = vector.broadcast %21 : vector<128x1xf32> to vector<128x128xf32>
    %23 = arith.subf %19, %22 : vector<128x128xf32>
    %24 = math.exp %23 : vector<128x128xf32>
    %cst_15 = arith.constant dense<0.000000e+00> : vector<128xf32>
    %25 = vector.multi_reduction <add>, %24, %cst_15 [1] : vector<128x128xf32> to vector<128xf32>
    %26 = vector.shape_cast %25 : vector<128xf32> to vector<128x1xf32>
    %27 = tpu.reciprocal %26 {approx = true} : vector<128x1xf32> -> vector<128x1xf32>
    %28 = vector.broadcast %27 : vector<128x1xf32> to vector<128x128xf32>
    %29 = arith.mulf %24, %28 : vector<128x128xf32>
    %30 = arith.truncf %29 : vector<128x128xf32> to vector<128x128xbf16>
    %31 = arith.truncf %3 : vector<128x128xf32> to vector<128x128xbf16>
    %cst_16 = arith.constant dense<0.000000e+00> : vector<128x128xf32>
    %32 = tpu.matmul %30, %31, %cst_16 {dimension_numbers = #tpu.dot_dimension_numbers<[1], [0], [0], [1], [0, 0, 1, 1], [], []>} : vector<128x128xbf16>, vector<128x128xbf16>, vector<128x128xf32> -> vector<128x128xf32>
    %33 = arith.addf %1, %32 : vector<128x128xf32>
    %c0_17 = arith.constant 0 : index
    %c0_18 = arith.constant 0 : index
    %34 = vector.load %arg7[%c0_17, %c0_18] : memref<1x128xf32, #tpu.memory_space<vmem>>, vector<1x128xf32>
    %35 = vector.shape_cast %34 : vector<1x128xf32> to vector<128xf32>
    %c0_19 = arith.constant 0 : index
    %c0_20 = arith.constant 0 : index
    %36 = vector.load %arg8[%c0_19, %c0_20] : memref<1x128xf32, #tpu.memory_space<vmem>>, vector<1x128xf32>
    %37 = vector.shape_cast %36 : vector<1x128xf32> to vector<128xf32>
    %cst_21 = arith.constant dense<0.000000e+00> : vector<128xf32>
    %38 = vector.multi_reduction <add>, %33, %cst_21 [1] : vector<128x128xf32> to vector<128xf32>
    %39 = vector.shape_cast %38 : vector<128xf32> to vector<128x1xf32>
    %cst_22 = arith.constant 1.280000e+02 : f32
    %40 = vector.broadcast %cst_22 : f32 to vector<128x1xf32>
    %41 = arith.divf %39, %40 : vector<128x1xf32>
    %42 = vector.broadcast %41 : vector<128x1xf32> to vector<128x128xf32>
    %43 = arith.subf %33, %42 : vector<128x128xf32>
    %44 = arith.mulf %43, %43 : vector<128x128xf32>
    %cst_23 = arith.constant dense<0.000000e+00> : vector<128xf32>
    %45 = vector.multi_reduction <add>, %44, %cst_23 [1] : vector<128x128xf32> to vector<128xf32>
    %46 = vector.shape_cast %45 : vector<128xf32> to vector<128x1xf32>
    %cst_24 = arith.constant 1.280000e+02 : f32
    %47 = vector.broadcast %cst_24 : f32 to vector<128x1xf32>
    %48 = arith.divf %46, %47 : vector<128x1xf32>
    %49 = vector.broadcast %41 : vector<128x1xf32> to vector<128x128xf32>
    %50 = arith.subf %33, %49 : vector<128x128xf32>
    %cst_25 = arith.constant 9.99999974E-6 : f32
    %51 = vector.broadcast %cst_25 : f32 to vector<128x1xf32>
    %52 = arith.addf %48, %51 : vector<128x1xf32>
    %53 = math.rsqrt %52 : vector<128x1xf32>
    %54 = vector.broadcast %53 : vector<128x1xf32> to vector<128x128xf32>
    %55 = arith.mulf %50, %54 : vector<128x128xf32>
    %56 = vector.shape_cast %35 : vector<128xf32> to vector<1x128xf32>
    %57 = vector.broadcast %56 : vector<1x128xf32> to vector<128x128xf32>
    %58 = arith.mulf %55, %57 : vector<128x128xf32>
    %59 = vector.shape_cast %37 : vector<128xf32> to vector<1x128xf32>
    %60 = vector.broadcast %59 : vector<1x128xf32> to vector<128x128xf32>
    %61 = arith.addf %58, %60 : vector<128x128xf32>
    %62 = arith.truncf %13 : vector<128x128xf32> to vector<128x128xbf16>
    %c0_26 = arith.constant 0 : index
    %c0_27 = arith.constant 0 : index
    %63 = vector.load %arg9[%c0_26, %c0_27] : memref<128x1024xbf16, #tpu.memory_space<vmem>>, vector<128x1024xbf16>
    %cst_28 = arith.constant dense<0.000000e+00> : vector<128x1024xf32>
    %64 = tpu.matmul %62, %63, %cst_28 {dimension_numbers = #tpu.dot_dimension_numbers<[1], [0], [0], [1], [0, 0, 1, 1], [], []>} : vector<128x128xbf16>, vector<128x1024xbf16>, vector<128x1024xf32> -> vector<128x1024xf32>
    %65 = arith.truncf %61 : vector<128x128xf32> to vector<128x128xbf16>
    %c0_29 = arith.constant 0 : index
    %c0_30 = arith.constant 0 : index
    %66 = vector.load %arg10[%c0_29, %c0_30] : memref<128x1024xbf16, #tpu.memory_space<vmem>>, vector<128x1024xbf16>
    %cst_31 = arith.constant dense<0.000000e+00> : vector<128x1024xf32>
    %67 = tpu.matmul %65, %66, %cst_31 {dimension_numbers = #tpu.dot_dimension_numbers<[1], [0], [0], [1], [0, 0, 1, 1], [], []>} : vector<128x128xbf16>, vector<128x1024xbf16>, vector<128x1024xf32> -> vector<128x1024xf32>
    %68 = arith.addf %64, %67 : vector<128x1024xf32>
    %c0_32 = arith.constant 0 : index
    %c0_33 = arith.constant 0 : index
    %69 = vector.load %arg11[%c0_32, %c0_33] : memref<1x1024xf32, #tpu.memory_space<vmem>>, vector<1x1024xf32>
    %70 = vector.shape_cast %69 : vector<1x1024xf32> to vector<1024xf32>
    %71 = vector.shape_cast %70 : vector<1024xf32> to vector<1x1024xf32>
    %72 = vector.broadcast %71 : vector<1x1024xf32> to vector<128x1024xf32>
    %73 = arith.addf %68, %72 : vector<128x1024xf32>
    %cst_34 = arith.constant 0.000000e+00 : f32
    %74 = vector.broadcast %cst_34 : f32 to vector<128x1024xf32>
    %75 = arith.maximumf %73, %74 : vector<128x1024xf32>
    %76 = arith.truncf %75 : vector<128x1024xf32> to vector<128x1024xbf16>
    %c0_35 = arith.constant 0 : index
    %c0_36 = arith.constant 0 : index
    %77 = vector.load %arg12[%c0_35, %c0_36] : memref<1024x128xbf16, #tpu.memory_space<vmem>>, vector<1024x128xbf16>
    %cst_37 = arith.constant dense<0.000000e+00> : vector<128x128xf32>
    %78 = tpu.matmul %76, %77, %cst_37 {dimension_numbers = #tpu.dot_dimension_numbers<[1], [0], [0], [1], [0, 0, 1, 1], [], []>} : vector<128x1024xbf16>, vector<1024x128xbf16>, vector<128x128xf32> -> vector<128x128xf32>
    %c0_38 = arith.constant 0 : index
    %c0_39 = arith.constant 0 : index
    %79 = vector.load %arg14[%c0_38, %c0_39] : memref<1x128xf32, #tpu.memory_space<vmem>>, vector<1x128xf32>
    %80 = vector.shape_cast %79 : vector<1x128xf32> to vector<128xf32>
    %81 = vector.shape_cast %80 : vector<128xf32> to vector<1x128xf32>
    %82 = vector.broadcast %81 : vector<1x128xf32> to vector<128x128xf32>
    %83 = arith.addf %78, %82 : vector<128x128xf32>
    %c0_40 = arith.constant 0 : index
    %c0_41 = arith.constant 0 : index
    %84 = vector.load %arg13[%c0_40, %c0_41] : memref<1024x128xbf16, #tpu.memory_space<vmem>>, vector<1024x128xbf16>
    %cst_42 = arith.constant dense<0.000000e+00> : vector<128x128xf32>
    %85 = tpu.matmul %76, %84, %cst_42 {dimension_numbers = #tpu.dot_dimension_numbers<[1], [0], [0], [1], [0, 0, 1, 1], [], []>} : vector<128x1024xbf16>, vector<1024x128xbf16>, vector<128x128xf32> -> vector<128x128xf32>
    %c0_43 = arith.constant 0 : index
    %c0_44 = arith.constant 0 : index
    %86 = vector.load %arg15[%c0_43, %c0_44] : memref<1x128xf32, #tpu.memory_space<vmem>>, vector<1x128xf32>
    %87 = vector.shape_cast %86 : vector<1x128xf32> to vector<128xf32>
    %88 = vector.shape_cast %87 : vector<128xf32> to vector<1x128xf32>
    %89 = vector.broadcast %88 : vector<1x128xf32> to vector<128x128xf32>
    %90 = arith.addf %85, %89 : vector<128x128xf32>
    %91 = arith.addf %13, %83 : vector<128x128xf32>
    %92 = arith.addf %61, %90 : vector<128x128xf32>
    %cst_45 = arith.constant dense<0.000000e+00> : vector<128xf32>
    %93 = vector.multi_reduction <add>, %91, %cst_45 [1] : vector<128x128xf32> to vector<128xf32>
    %94 = vector.shape_cast %93 : vector<128xf32> to vector<128x1xf32>
    %cst_46 = arith.constant dense<0.000000e+00> : vector<128xf32>
    %95 = vector.multi_reduction <add>, %92, %cst_46 [1] : vector<128x128xf32> to vector<128xf32>
    %96 = vector.shape_cast %95 : vector<128xf32> to vector<128x1xf32>
    %97 = arith.addf %94, %96 : vector<128x1xf32>
    %cst_47 = arith.constant 3.906250e-03 : f32
    %98 = vector.broadcast %cst_47 : f32 to vector<128x1xf32>
    %99 = arith.mulf %97, %98 : vector<128x1xf32>
    %100 = vector.broadcast %99 : vector<128x1xf32> to vector<128x128xf32>
    %101 = arith.subf %91, %100 : vector<128x128xf32>
    %102 = vector.broadcast %99 : vector<128x1xf32> to vector<128x128xf32>
    %103 = arith.subf %92, %102 : vector<128x128xf32>
    %104 = arith.mulf %101, %101 : vector<128x128xf32>
    %cst_48 = arith.constant dense<0.000000e+00> : vector<128xf32>
    %105 = vector.multi_reduction <add>, %104, %cst_48 [1] : vector<128x128xf32> to vector<128xf32>
    %106 = vector.shape_cast %105 : vector<128xf32> to vector<128x1xf32>
    %107 = arith.mulf %103, %103 : vector<128x128xf32>
    %cst_49 = arith.constant dense<0.000000e+00> : vector<128xf32>
    %108 = vector.multi_reduction <add>, %107, %cst_49 [1] : vector<128x128xf32> to vector<128xf32>
    %109 = vector.shape_cast %108 : vector<128xf32> to vector<128x1xf32>
    %110 = arith.addf %106, %109 : vector<128x1xf32>
    %cst_50 = arith.constant 3.906250e-03 : f32
    %111 = vector.broadcast %cst_50 : f32 to vector<128x1xf32>
    %112 = arith.mulf %110, %111 : vector<128x1xf32>
    %cst_51 = arith.constant 9.99999974E-6 : f32
    %113 = vector.broadcast %cst_51 : f32 to vector<128x1xf32>
    %114 = arith.addf %112, %113 : vector<128x1xf32>
    %115 = math.rsqrt %114 : vector<128x1xf32>
    %116 = vector.broadcast %115 : vector<128x1xf32> to vector<128x128xf32>
    %117 = arith.mulf %101, %116 : vector<128x128xf32>
    %c0_52 = arith.constant 0 : index
    %c0_53 = arith.constant 0 : index
    %118 = vector.load %arg16[%c0_52, %c0_53] : memref<1x128xf32, #tpu.memory_space<vmem>>, vector<1x128xf32>
    %119 = vector.shape_cast %118 : vector<1x128xf32> to vector<128xf32>
    %120 = vector.shape_cast %119 : vector<128xf32> to vector<1x128xf32>
    %121 = vector.broadcast %120 : vector<1x128xf32> to vector<128x128xf32>
    %122 = arith.mulf %117, %121 : vector<128x128xf32>
    %c0_54 = arith.constant 0 : index
    %c0_55 = arith.constant 0 : index
    %123 = vector.load %arg18[%c0_54, %c0_55] : memref<1x128xf32, #tpu.memory_space<vmem>>, vector<1x128xf32>
    %124 = vector.shape_cast %123 : vector<1x128xf32> to vector<128xf32>
    %125 = vector.shape_cast %124 : vector<128xf32> to vector<1x128xf32>
    %126 = vector.broadcast %125 : vector<1x128xf32> to vector<128x128xf32>
    %127 = arith.addf %122, %126 : vector<128x128xf32>
    %c0_56 = arith.constant 0 : index
    %c0_57 = arith.constant 0 : index
    %c0_58 = arith.constant 0 : index
    %128 = vector.load %arg20[%c0_56, %c0_57, %c0_58] : memref<1x128x256xf32, #tpu.memory_space<vmem>>, vector<1x128x128xf32>
    %129 = vector.shape_cast %128 : vector<1x128x128xf32> to vector<128x128xf32>
    %130 = vector.shape_cast %127 : vector<128x128xf32> to vector<1x128x128xf32>
    tpu.vector_store %arg20[%c0_56, %c0_57, %c0_58], %130 {strides = array<i32>} : memref<1x128x256xf32, #tpu.memory_space<vmem>>, vector<1x128x128xf32>,
    %131 = vector.broadcast %115 : vector<128x1xf32> to vector<128x128xf32>
    %132 = arith.mulf %103, %131 : vector<128x128xf32>
    %c0_59 = arith.constant 0 : index
    %c0_60 = arith.constant 0 : index
    %133 = vector.load %arg17[%c0_59, %c0_60] : memref<1x128xf32, #tpu.memory_space<vmem>>, vector<1x128xf32>
    %134 = vector.shape_cast %133 : vector<1x128xf32> to vector<128xf32>
    %135 = vector.shape_cast %134 : vector<128xf32> to vector<1x128xf32>
    %136 = vector.broadcast %135 : vector<1x128xf32> to vector<128x128xf32>
    %137 = arith.mulf %132, %136 : vector<128x128xf32>
    %c0_61 = arith.constant 0 : index
    %c0_62 = arith.constant 0 : index
    %138 = vector.load %arg19[%c0_61, %c0_62] : memref<1x128xf32, #tpu.memory_space<vmem>>, vector<1x128xf32>
    %139 = vector.shape_cast %138 : vector<1x128xf32> to vector<128xf32>
    %140 = vector.shape_cast %139 : vector<128xf32> to vector<1x128xf32>
    %141 = vector.broadcast %140 : vector<1x128xf32> to vector<128x128xf32>
    %142 = arith.addf %137, %141 : vector<128x128xf32>
    %c0_63 = arith.constant 0 : index
    %c0_64 = arith.constant 0 : index
    %c128 = arith.constant 128 : index
    %143 = vector.load %arg20[%c0_63, %c0_64, %c128] : memref<1x128x256xf32, #tpu.memory_space<vmem>>, vector<1x128x128xf32>
    %144 = vector.shape_cast %143 : vector<1x128x128xf32> to vector<128x128xf32>
    %145 = vector.shape_cast %142 : vector<128x128xf32> to vector<1x128x128xf32>
    tpu.vector_store %arg20[%c0_63, %c0_64, %c128], %145 {strides = array<i32>} : memref<1x128x256xf32, #tpu.memory_space<vmem>>, vector<1x128x128xf32>,
    %c0_65 = arith.constant 0 : index
    %c0_66 = arith.constant 0 : index
    %c0_67 = arith.constant 0 : index
    %146 = vector.load %arg21[%c0_65, %c0_66, %c0_67] : memref<1x128x128xf32, #tpu.memory_space<vmem>>, vector<1x128x128xf32>
    %147 = vector.shape_cast %146 : vector<1x128x128xf32> to vector<128x128xf32>
    %148 = vector.shape_cast %29 : vector<128x128xf32> to vector<1x128x128xf32>
    tpu.vector_store %arg21[%c0_65, %c0_66, %c0_67], %148 {strides = array<i32>} : memref<1x128x128xf32, #tpu.memory_space<vmem>>, vector<1x128x128xf32>,
    return
  }
  func.func @transform_0(%arg0: i32, %arg1: i32) -> (i32, i32, i32) {
    %c0_i32 = arith.constant 0 : i32
    %c0_i32_0 = arith.constant 0 : i32
    return %arg0, %arg1, %c0_i32 : i32, i32, i32
  }
  func.func @transform_1(%arg0: i32, %arg1: i32) -> (i32, i32, i32) {
    %c0_i32 = arith.constant 0 : i32
    %c0_i32_0 = arith.constant 0 : i32
    %c0_i32_1 = arith.constant 0 : i32
    return %arg0, %c0_i32, %c0_i32_0 : i32, i32, i32
  }
  func.func @transform_2(%arg0: i32, %arg1: i32) -> (i32, i32, i32) {
    %c0_i32 = arith.constant 0 : i32
    %c0_i32_0 = arith.constant 0 : i32
    return %arg0, %arg1, %c0_i32 : i32, i32, i32
  }
  func.func @transform_3(%arg0: i32, %arg1: i32) -> (i32, i32) {
    %c0_i32 = arith.constant 0 : i32
    %c0_i32_0 = arith.constant 0 : i32
    %c0_i32_1 = arith.constant 0 : i32
    return %c0_i32, %c0_i32_0 : i32, i32
  }
  func.func @transform_4(%arg0: i32, %arg1: i32) -> (i32, i32) {
    %c0_i32 = arith.constant 0 : i32
    %c0_i32_0 = arith.constant 0 : i32
    %c0_i32_1 = arith.constant 0 : i32
    return %c0_i32, %c0_i32_0 : i32, i32
  }
  func.func @transform_5(%arg0: i32, %arg1: i32) -> (i32, i32) {
    %c0_i32 = arith.constant 0 : i32
    %c0_i32_0 = arith.constant 0 : i32
    %c0_i32_1 = arith.constant 0 : i32
    return %c0_i32, %c0_i32_0 : i32, i32
  }
  func.func @transform_6(%arg0: i32, %arg1: i32) -> (i32, i32) {
    %c0_i32 = arith.constant 0 : i32
    %c0_i32_0 = arith.constant 0 : i32
    %c0_i32_1 = arith.constant 0 : i32
    return %c0_i32, %c0_i32_0 : i32, i32
  }
  func.func @transform_7(%arg0: i32, %arg1: i32) -> (i32, i32) {
    %c0_i32 = arith.constant 0 : i32
    %c0_i32_0 = arith.constant 0 : i32
    %c0_i32_1 = arith.constant 0 : i32
    return %c0_i32, %c0_i32_0 : i32, i32
  }
  func.func @transform_8(%arg0: i32, %arg1: i32) -> (i32, i32) {
    %c0_i32 = arith.constant 0 : i32
    %c0_i32_0 = arith.constant 0 : i32
    %c0_i32_1 = arith.constant 0 : i32
    return %c0_i32, %c0_i32_0 : i32, i32
  }
  func.func @transform_9(%arg0: i32, %arg1: i32) -> (i32, i32) {
    %c0_i32 = arith.constant 0 : i32
    %c0_i32_0 = arith.constant 0 : i32
    %c0_i32_1 = arith.constant 0 : i32
    return %c0_i32, %c0_i32_0 : i32, i32
  }
  func.func @transform_10(%arg0: i32, %arg1: i32) -> (i32, i32) {
    %c0_i32 = arith.constant 0 : i32
    %c0_i32_0 = arith.constant 0 : i32
    %c0_i32_1 = arith.constant 0 : i32
    return %c0_i32, %c0_i32_0 : i32, i32
  }
  func.func @transform_11(%arg0: i32, %arg1: i32) -> (i32, i32) {
    %c0_i32 = arith.constant 0 : i32
    %c0_i32_0 = arith.constant 0 : i32
    %c0_i32_1 = arith.constant 0 : i32
    return %c0_i32, %c0_i32_0 : i32, i32
  }
  func.func @transform_12(%arg0: i32, %arg1: i32) -> (i32, i32) {
    %c0_i32 = arith.constant 0 : i32
    %c0_i32_0 = arith.constant 0 : i32
    %c0_i32_1 = arith.constant 0 : i32
    return %c0_i32, %c0_i32_0 : i32, i32
  }
  func.func @transform_13(%arg0: i32, %arg1: i32) -> (i32, i32) {
    %c0_i32 = arith.constant 0 : i32
    %c0_i32_0 = arith.constant 0 : i32
    %c0_i32_1 = arith.constant 0 : i32
    return %c0_i32, %c0_i32_0 : i32, i32
  }
  func.func @transform_14(%arg0: i32, %arg1: i32) -> (i32, i32) {
    %c0_i32 = arith.constant 0 : i32
    %c0_i32_0 = arith.constant 0 : i32
    %c0_i32_1 = arith.constant 0 : i32
    return %c0_i32, %c0_i32_0 : i32, i32
  }
  func.func @transform_15(%arg0: i32, %arg1: i32) -> (i32, i32) {
    %c0_i32 = arith.constant 0 : i32
    %c0_i32_0 = arith.constant 0 : i32
    %c0_i32_1 = arith.constant 0 : i32
    return %c0_i32, %c0_i32_0 : i32, i32
  }
  func.func @transform_16(%arg0: i32, %arg1: i32) -> (i32, i32) {
    %c0_i32 = arith.constant 0 : i32
    %c0_i32_0 = arith.constant 0 : i32
    %c0_i32_1 = arith.constant 0 : i32
    return %c0_i32, %c0_i32_0 : i32, i32
  }
  func.func @transform_17(%arg0: i32, %arg1: i32) -> (i32, i32) {
    %c0_i32 = arith.constant 0 : i32
    %c0_i32_0 = arith.constant 0 : i32
    %c0_i32_1 = arith.constant 0 : i32
    return %c0_i32, %c0_i32_0 : i32, i32
  }
  func.func @transform_18(%arg0: i32, %arg1: i32) -> (i32, i32, i32) {
    %c0_i32 = arith.constant 0 : i32
    %c0_i32_0 = arith.constant 0 : i32
    return %arg0, %arg1, %c0_i32 : i32, i32, i32
  }
  func.func @transform_19(%arg0: i32, %arg1: i32) -> (i32, i32, i32) {
    %c0_i32 = arith.constant 0 : i32
    %c0_i32_0 = arith.constant 0 : i32
    return %arg0, %arg1, %c0_i32 : i32, i32, i32
  }
}

</mosaic_0001>

<bundles_post_ra>
// kernel: tpu_custom_call.1
= control target key start
LH: loop header
LB: loop body
LE: loop exit
PB: predicated region body
PF: predicated region fallthrough
CT: control target
= control target key end

     0   :  { %s10598_s0 = inlined_call_operand.hbm [shape: f32[2,128,128], index: 0, kind: input, shape index: {}]   ;;  %s10599_s1 = inlined_call_operand.hbm [shape: f32[2,128,128], index: 1, kind: input, shape index: {}]   ;;  %s10600_s2 = inlined_call_operand.hbm [shape: f32[2,128,128], index: 2, kind: input, shape index: {}]   ;;  %s10601_s3 = inlined_call_operand.hbm [shape: bf16[128,128], index: 3, kind: input, shape index: {}]   ;;  %s10602_s4 = inlined_call_operand.vmem [shape: f32[1,128], index: 4, kind: input, shape index: {}]   ;;  %s10603_s5 = inlined_call_operand.vmem [shape: f32[1,128], index: 5, kind: input, shape index: {}]   ;;  %s10604_s6 = inlined_call_operand.vmem [shape: f32[1,128], index: 6, kind: input, shape index: {}]   ;;  %s10605_s7 = inlined_call_operand.hbm [shape: bf16[128,1024], index: 7, kind: input, shape index: {}]   ;;  %s10606_s8 = inlined_call_operand.hbm [shape: bf16[128,1024], index: 8, kind: input, shape index: {}]   ;;  %s10607_s9 = inlined_call_operand.vmem [shape: f32[1,1024], index: 9, kind: input, shape index: {}]   ;;  %s10608_s10 = inlined_call_operand.hbm [shape: bf16[1024,128], index: 10, kind: input, shape index: {}]   ;;  %s10609_s11 = inlined_call_operand.hbm [shape: bf16[1024,128], index: 11, kind: input, shape index: {}]   ;;  %s10610_s12 = inlined_call_operand.vmem [shape: f32[1,128], index: 12, kind: input, shape index: {}]   ;;  %s10611_s13 = inlined_call_operand.vmem [shape: f32[1,128], index: 13, kind: input, shape index: {}]   ;;  %s10612_s14 = inlined_call_operand.vmem [shape: f32[1,128], index: 14, kind: input, shape index: {}]   ;;  %s10613_s15 = inlined_call_operand.vmem [shape: f32[1,128], index: 15, kind: input, shape index: {}]   ;;  %s10614_s16 = inlined_call_operand.vmem [shape: f32[1,128], index: 16, kind: input, shape index: {}]   ;;  %s10615_s17 = inlined_call_operand.vmem [shape: f32[1,128], index: 17, kind: input, shape index: {}]   ;;  %s10616_s18 = inlined_call_operand.hbm [shape: f32[2,128,256], index: 18, kind: output, shape index: {0}]   ;;  %s10617_s19 = inlined_call_operand.hbm [shape: f32[2,128,128], index: 19, kind: output, shape index: {1}]  }
   0x1   :  { %10708 = sst [smem:[#allocation86_spill]] %s10598_s0 }
   0x2   :  { %10709 = sst [smem:[#allocation87_spill]] %s10599_s1 }
   0x3   :  { %10710 = sst [smem:[#allocation88_spill]] %s10600_s2 }
   0x4   :  { %10711 = sst [smem:[#allocation89_spill]] %s10601_s3 }
   0x5   :  { %10712 = sst [smem:[#allocation90_spill]] %s10602_s4 }
   0x6   :  { %10713 = sst [smem:[#allocation91_spill]] %s10604_s6 }
   0x7   :  { %10714 = sst [smem:[#allocation92_spill]] %s10606_s8 }
   0x8   :  { %10715 = sst [smem:[#allocation93_spill]] %s10607_s9 }
   0x9   :  { %10716 = sst [smem:[#allocation94_spill]] %s10610_s12 }
   0xa   :  { %10717 = sst [smem:[#allocation95_spill]] %s10611_s13 }
   0xb   :  { %10718 = sst [smem:[#allocation96_spill]] %s10612_s14 }
   0xc   :  { %10719 = sst [smem:[#allocation97_spill]] %s10613_s15 }
   0xd   :  { %10720 = sst [smem:[#allocation98_spill]] %s10614_s16 }
   0xe   :  { %10721 = sst [smem:[#allocation99_spill]] %s10615_s17 }
   0xf   :  { %10722 = sst [smem:[#allocation100_spill]] %s10616_s18 }
  0x10   :  { %10723 = sst [smem:[#allocation101_spill]] %s10617_s19 }
  0x11   :  { %25 = vsyncpa [#allocation3], 0 }
  0x12   :  { %27 = vsyncpa [#allocation3 + $0x1], 0 }
  0x13   :  { %28 = vsyncpa [#allocation6], 0 }
  0x14   :  { %30 = vsyncpa [#allocation6 + $0x1], 0 }
  0x15   :  { %31 = vsyncpa [#allocation9], 0 }
  0x16   :  { %32 = vsyncpa [#allocation12], 0 }
  0x17   :  { %33 = vsyncpa [#allocation15], 0 }
  0x18   :  { %34 = vsyncpa [#allocation4], 0 }
  0x19   :  { %36 = vsyncpa [#allocation4 + $0x1], 0 }
  0x1a   :  { %37 = vsyncpa [#allocation18], 0 }
  0x1b   :  { %39 = vsyncpa [#allocation18 + $0x1], 0  ;;  %s8251_s0 = smov 0   ;;  %s8253_s30 = smov 0  }
  0x1c   :  { %s8255_s20 = smov 0   ;;  %s8257_s21 = smov 0  }
  0x1d   :  { %s8259_s1 = smov 0   ;;  %s8261_s22 = smov 0  }
  0x1e LB: > { %10724 = sst [smem:[#allocation26_spill]] %s8108_s0  ;;  %s8282_s2 = sadd.s32 4294967295, %s8128_s22   ;;  %s8128_s22 = sphi %s8261_s22, %s45_s22   ;;  %s8124_s1 = sphi %s8259_s1, %s10890_s1   ;;  %s8120_s21 = sphi %s8257_s21, %s10889_s21   ;;  %s8116_s20 = sphi %s8255_s20, %s10893_s20   ;;  %s8112_s30 = sphi %s8253_s30, %s10892_s30   ;;  %s8108_s0 = sphi %s8251_s0, %s10891_s0  }
  0x1f   : > { %10725 = sst [smem:[#allocation27_spill]] %s8120_s21  ;;  %p6266_p0 = scmp.ge.s32.totalorder %s8128_s22, 1 }
  0x20   : > { %10726 = sst [smem:[#allocation28_spill]] %s8124_s1  ;;  %p10639_p1 = scmp.eq.s32.totalorder %s8282_s2, 0 }
  0x21   : > { %10727 = sst [smem:[#allocation29_spill]] %s8128_s22  ;;  %p515_p3 = scmp.lt.s32.totalorder %s8128_s22, 3 }
  0x22   : > { %s8130_s24 = smov [#allocation8]   ;;  %s8131_s26 = smov [#allocation11]  }
  0x23   : > { %p8288_p4 = pnand %p6266_p0, %p515_p3  ;;  %s527_s25 = sshll.u32 %s8130_s24, 4  ;;  %s8292_s25 = int_to_ptr.vmem [resolvable:$true] %s527_s25 }
  0x24   : > { %s562_s27 = sshll.u32 %s8131_s26, 4  ;;  %s10730_s18 = sld [smem:[#allocation89_spill]]  ;;  %s8303_s27 = int_to_ptr.vmem [resolvable:$true] %s562_s27 }
  0x25   : > { %s10728_s23 = scalar_select %p8288_p4, 1, 0 }
  0x26   : > { %p7393_p5 = pneg %p8288_p4 }
  0x28   : > { %p8299_p7 = pnand %p7393_p5, %p10639_p1 }
  0x2a   : > { %s10729_s3 = scalar_select %p8299_p7, 1, 0 }
  0x2b   : > { %s7768_s17 = scalar_lea.hbm %s10730_s18, 1024  ;;  %p8313_p9 = pneg %p8299_p7 }
  0x2c   : > { %p7769_p8 = scmp.ne.s32.totalorder %s10730_s18, %s7768_s17  ;;  %p7775_p12 = scmp.lt.u32.totalorder %s7768_s17, %s10730_s18 }
  0x2d   : > { %s10731_s15 = scalar_select %p8313_p9, 1, 0 }
  0x2e   : > { %p7771_p10 = pnand %p8313_p9, %p7769_p8 }
  0x30   : > { %p7772_p11 = pneg %p7771_p10 }
  0x32   : > { %p7777_p13 = pnand %p7775_p12, %p7772_p11 }
  0x34   : > { %7780 = shalt.err (!%p7777_p13)
}
  0x35   : > { %s7781_s16 = scalar_lea.vmem %s8292_s25, 1024  ;;  %p7789_p6 = scmp.lt.s32.totalorder %s8292_s25, %s8292_s25 }
  0x36   : > { %p7782_p0 = scmp.ne.s32.totalorder %s8292_s25, %s7781_s16  ;;  %p7790_p2 = scmp.lt.s32.totalorder %s7781_s16, %s7781_s16 }
  0x38   : > { %p7784_p3 = pnand %p7782_p0, %p8313_p9  ;;  %p7791_p8 = por %p7790_p2, %p7789_p6 }
  0x3a   : > { %p7785_p5 = pneg %p7784_p3 }
  0x3c   : > { %p7792_p10 = pnand %p7791_p8, %p7785_p5 }
  0x3e   : > { %7795 = shalt.err (!%p7792_p10)
}
  0x3f   : > { %s10626_s28 = smov 64   ;;  %s10628_s14 = smov 4  }
  0x40   : > { %7396 = dma.hbm_to_vmem [thread:$0]  (!%p8299_p7), %s10730_s18, 1024, %s8292_s25, [#allocation9], %s10626_s28, %s10626_s28, %s10628_s14  }
  0x41   : > { %s10732_s8 = sld [smem:[#allocation92_spill]] }
  0x47   : > { %s7796_s16 = scalar_lea.hbm %s10732_s8, 8192 }
  0x48   : > { %p7797_p2 = scmp.ne.s32.totalorder %s10732_s8, %s7796_s16  ;;  %p7803_p12 = scmp.lt.u32.totalorder %s7796_s16, %s10732_s8 }
  0x4a   : > { %p7799_p6 = pnand %p7797_p2, %p8313_p9 }
  0x4c   : > { %p7800_p11 = pneg %p7799_p6 }
  0x4e   : > { %p7805_p13 = pnand %p7803_p12, %p7800_p11 }
  0x50   : > { %7808 = shalt.err (!%p7805_p13)
}
  0x51   : > { %s7809_s25 = scalar_lea.vmem %s8303_s27, 8192  ;;  %p7817_p8 = scmp.lt.s32.totalorder %s8303_s27, %s8303_s27 }
  0x52   : > { %p7810_p0 = scmp.ne.s32.totalorder %s8303_s27, %s7809_s25  ;;  %p7818_p10 = scmp.lt.s32.totalorder %s7809_s25, %s7809_s25 }
  0x54   : > { %p7812_p3 = pnand %p7810_p0, %p8313_p9  ;;  %p7819_p2 = por %p7818_p10, %p7817_p8 }
  0x56   : > { %p7813_p5 = pneg %p7812_p3 }
  0x58   : > { %p7820_p6 = pnand %p7819_p2, %p7813_p5 }
  0x5a   : > { %7823 = shalt.err (!%p7820_p6)
}
  0x5b   : > { %s10630_s19 = smov 512   ;;  %s10631_s12 = smov 32  }
  0x5c   : > { %7402 = dma.hbm_to_vmem [thread:$0]  (!%p8299_p7), %s10732_s8, 8192, %s8303_s27, [#allocation12], %s10630_s19, %s10630_s19, %s10631_s12  }
  0x5d   : > { %s6265_s17 = sadd.s32 4294967294, %s8128_s22   ;;  %s57_s29 = sadd.s32 1, %s8124_s1 }
  0x5e   : > { %s66_s24 = sadd.s32 1, %s8116_s20  ;;  %p59_p11 = scmp.ge.s32.totalorder %s57_s29, 2 }
  0x5f   : > { %p73_p12 = scmp.ne.s32.totalorder %s8116_s20, %s8112_s30  ;;  %p74_p13 = scmp.eq.s32.totalorder %s8128_s22, 0 }
  0x60   : > { %p79_p0 = scmp.ne.s32.totalorder %s8112_s30, %s8108_s0  ;;  %s10895_s29 = smov (%p59_p11, %s57_s29), 0 }
  0x61   : > { %10733 = sst [smem:[#allocation30_spill]] %s10895_s29  ;;  %p75_p3 = por %p74_p13, %p73_p12 }
  0x62   : > { %p8375_p5 = por %p10639_p1, %p79_p0  ;;  %s61_s27 = ssub.s32 %s8124_s1, %s10895_s29 }
  0x63   : > { %p10735_p8 = scmp.eq.s32.totalorder %s8282_s2, 1  ;;  %p64_p2 = scmp.eq.s32.totalorder %s61_s27, 0 }
  0x64   : > { %s10734_s26 = scalar_select %p8375_p5, 1, 0 }
  0x65   : > { %p8383_p10 = por %p10735_p8, %p73_p12  ;;  %p480_p6 = scmp.eq.s32.totalorder %s6265_s17, 1 }
  0x66   : > { %p7431_p4 = scmp.lt.s32.totalorder %s8128_s22, 2  ;;  %s10632_s25 = sand.u32 1, %s8116_s20  }
  0x67   : > { %s10736_s16 = scalar_select %p8383_p10, 1, 0 }
  0x68   : > { %s8390_s13 = scalar_select %p64_p2, %s8116_s20, %s66_s24  }
  0x69   : > { %10737 = sst [smem:[#allocation31_spill]] %s10736_s16  ;;  %p8392_p11 = por %p480_p6, %p79_p0 }
  0x6a   : > { %10738 = sst [smem:[#allocation32_spill]] %s8390_s13  ;;  %s8398_s28 = sshll.u32 %s10632_s25, 7 }
  0x6b   : > { %s10739_s21 = scalar_select %p8392_p11, 1, 0 }
  0x6c   : > { %s8401_s14 = sshll.u32 %s8124_s1, 11  ;;  %p8403_p12 = pnand %p7431_p4, %p75_p3 }
  0x6d   : > { %10740 = sst [smem:[#allocation33_spill]] %s10739_s21  ;;  %s646_s17 = sand.u32 1, %s8128_s22  }
  0x6e   : > { %s10741_s19 = scalar_select %p8403_p12, 1, 0 }
  0x6f   : > { %s10742_s12 = sld [smem:[#allocation87_spill]]  ;;  %s650_s25 = scalar_lea.vmem [#allocation5], %s8398_s28 }
  0x70   : > { %s657_s18 = sshll.u32 %s650_s25, 4  ;;  %s8417_s29 = scalar_lea.sflag [#allocation6], %s646_s17  ;;  %s8415_s18 = int_to_ptr.vmem [resolvable:$true] %s657_s18 }
  0x71   : > { %p8423_p13 = pneg %p8403_p12 }
  0x73   : > { %s10743_s13 = scalar_select %p8423_p13, 1, 0 }
  0x75   : > { %s8412_s8 = scalar_lea.hbm %s10742_s12, %s8401_s14  ;;  %s7829_s22 = scalar_lea.hbm %s10742_s12, 4096 }
  0x76   : > { %s7824_s1 = scalar_lea.hbm %s8412_s8, 2048  ;;  %p7830_p8 = scmp.lt.u32.totalorder %s8412_s8, %s10742_s12 }
  0x77   : > { %p7825_p4 = scmp.ne.s32.totalorder %s8412_s8, %s7824_s1  ;;  %p7831_p2 = scmp.lt.u32.totalorder %s7829_s22, %s7824_s1 }
  0x78   : > { %p7833_p1 = scmp.lt.u32.totalorder %s7824_s1, %s8412_s8 }
  0x79   : > { %p7827_p0 = pnand %p8423_p13, %p7825_p4  ;;  %p7832_p6 = por %p7831_p2, %p7830_p8 }
  0x7b   : > { %p7828_p3 = pneg %p7827_p0  ;;  %p7834_p11 = por %p7833_p1, %p7832_p6 }
  0x7d   : > { %p7835_p10 = pnand %p7834_p11, %p7828_p3 }
  0x7f   : > { %7838 = shalt.err (!%p7835_p10)
}
  0x80   : > { %s7839_s17 = scalar_lea.vmem %s8415_s18, 2048  ;;  %s8136_s27 = smov [#allocation5]  }
  0x81   : > { %p7840_p4 = scmp.ne.s32.totalorder %s8415_s18, %s7839_s17  ;;  %s7844_s24 = sshll.u32 %s8136_s27, 4  ;;  %s7845_s24 = int_to_ptr.vmem [resolvable:$false] %s7844_s24 }
  0x82   : > { %s7846_s21 = scalar_lea.vmem %s7845_s24, 4096  ;;  %p7847_p7 = scmp.lt.s32.totalorder %s8415_s18, %s7845_s24 }
  0x83   : > { %p7842_p0 = pnand %p7840_p4, %p8423_p13  ;;  %p7848_p9 = scmp.lt.s32.totalorder %s7846_s21, %s7839_s17 }
  0x85   : > { %p7843_p5 = pneg %p7842_p0  ;;  %p7849_p8 = por %p7848_p9, %p7847_p7 }
  0x87   : > { %p7850_p2 = pnand %p7849_p8, %p7843_p5 }
  0x89   : > { %7853 = shalt.err (!%p7850_p2)
}
  0x8a   : > { %s10654_s1 = smov 128   ;;  %s8138_s22 = smov 8  }
  0x8b   : > { %7415 = dma.hbm_to_vmem [thread:$0]  (!%p8403_p12), %s8412_s8, 2048, %s8415_s18, %s8417_s29, %s10654_s1, %s10654_s1, %s8138_s22  }
  0x8c   : > { %s8139_s25 = smov [#allocation10]   ;;  %s8140_s24 = smov [#allocation13]  }
  0x8d   : > { %s549_s27 = sshll.u32 %s8139_s25, 4  ;;  %s578_s17 = sshll.u32 %s8140_s24, 4  ;;  %s550_s27 = int_to_ptr.vmem [resolvable:$true] %s549_s27  ;;  %s579_s17 = int_to_ptr.vmem [resolvable:$true] %s578_s17 }
  0x8e   : > { %s7854_s0 = scalar_lea.hbm %s10605_s7, 8192  ;;  %p10744_p7 = scmp.ne.s32.totalorder %s10731_s15, 0 }
  0x8f   : > { %p7855_p1 = scmp.ne.s32.totalorder %s10605_s7, %s7854_s0  ;;  %p7861_p10 = scmp.lt.u32.totalorder %s7854_s0, %s10605_s7 }
  0x91   : > { %p7857_p9 = pnand %p7855_p1, %p10744_p7 }
  0x93   : > { %p7858_p5 = pneg %p7857_p9 }
  0x95   : > { %p7863_p11 = pnand %p7861_p10, %p7858_p5 }
  0x97   : > { %7866 = shalt.err (!%p7863_p11)
}
  0x98   : > { %s7867_s8 = scalar_lea.vmem %s550_s27, 8192  ;;  %p7875_p0 = scmp.lt.s32.totalorder %s550_s27, %s550_s27 }
  0x99   : > { %p7868_p3 = scmp.ne.s32.totalorder %s550_s27, %s7867_s8  ;;  %p7876_p8 = scmp.lt.s32.totalorder %s7867_s8, %s7867_s8 }
  0x9b   : > { %p7870_p6 = pnand %p7868_p3, %p10744_p7  ;;  %p7877_p2 = por %p7876_p8, %p7875_p0 }
  0x9d   : > { %p7871_p4 = pneg %p7870_p6 }
  0x9f   : > { %p7878_p12 = pnand %p7877_p2, %p7871_p4 }
  0xa1   : > { %7881 = shalt.err (!%p7878_p12)
}
  0xa2   : > { %p10745_p1 = scmp.ne.s32.totalorder %s10729_s3, 0  ;;  %s10746_s9 = smov 32  }
  0xa3   : > { %s10747_s18 = smov 512   ;;  %s7882_s16 = scalar_lea.hbm %s10608_s10, 8192 }
  0xa4   : > { %7399 = dma.hbm_to_vmem [thread:$0]  (!%p10745_p1), %s10605_s7, 8192, %s550_s27, [#allocation9], %s10747_s18, %s10747_s18, %s10746_s9  }
  0xa5   : > { %p7883_p9 = scmp.ne.s32.totalorder %s10608_s10, %s7882_s16  ;;  %p7889_p10 = scmp.lt.u32.totalorder %s7882_s16, %s10608_s10 }
  0xa7   : > { %p7885_p12 = pnand %p7883_p9, %p10744_p7 }
  0xa9   : > { %p7886_p5 = pneg %p7885_p12 }
  0xab   : > { %p7891_p11 = pnand %p7889_p10, %p7886_p5 }
  0xad   : > { %7894 = shalt.err (!%p7891_p11)
}
  0xae   : > { %s7895_s4 = scalar_lea.vmem %s579_s17, 8192  ;;  %p7903_p0 = scmp.lt.s32.totalorder %s579_s17, %s579_s17 }
  0xaf   : > { %p7896_p3 = scmp.ne.s32.totalorder %s579_s17, %s7895_s4  ;;  %p7904_p8 = scmp.lt.s32.totalorder %s7895_s4, %s7895_s4 }
  0xb1   : > { %p7898_p6 = pnand %p7896_p3, %p10744_p7  ;;  %p7905_p2 = por %p7904_p8, %p7903_p0 }
  0xb3   : > { %p7899_p4 = pneg %p7898_p6 }
  0xb5   : > { %p7906_p13 = pnand %p7905_p2, %p7899_p4 }
  0xb7   : > { %7909 = shalt.err (!%p7906_p13)
}
  0xb8   : > { %s10748_s27 = smov 4   ;;  %s10749_s9 = smov 64  }
  0xb9   : > { %7405 = dma.hbm_to_vmem [thread:$0]  (!%p10745_p1), %s10608_s10, 8192, %s579_s17, [#allocation12], %s10749_s9, %s10749_s9, %s10748_s27  }
  0xba   : > { %s8141_s0 = smov [#allocation14]   ;;  %s7910_s24 = scalar_lea.hbm %s10609_s11, 8192 }
  0xbb   : > { %s591_s12 = sshll.u32 %s8141_s0, 4  ;;  %p7911_p13 = scmp.ne.s32.totalorder %s10609_s11, %s7910_s24  ;;  %s592_s12 = int_to_ptr.vmem [resolvable:$true] %s591_s12 }
  0xbc   : > { %p7917_p5 = scmp.lt.u32.totalorder %s7910_s24, %s10609_s11 }
  0xbd   : > { %p7913_p9 = pnand %p7911_p13, %p10744_p7 }
  0xbf   : > { %p7914_p12 = pneg %p7913_p9 }
  0xc1   : > { %p7919_p10 = pnand %p7917_p5, %p7914_p12 }
  0xc3   : > { %7922 = shalt.err (!%p7919_p10)
}
  0xc4   : > { %s7923_s17 = scalar_lea.vmem %s592_s12, 8192  ;;  %p7931_p4 = scmp.lt.s32.totalorder %s592_s12, %s592_s12 }
  0xc5   : > { %p7924_p11 = scmp.ne.s32.totalorder %s592_s12, %s7923_s17  ;;  %p7932_p0 = scmp.lt.s32.totalorder %s7923_s17, %s7923_s17 }
  0xc7   : > { %p7926_p3 = pnand %p7924_p11, %p10744_p7  ;;  %p7933_p8 = por %p7932_p0, %p7931_p4 }
  0xc9   : > { %p7927_p6 = pneg %p7926_p3 }
  0xcb   : > { %p7934_p2 = pnand %p7933_p8, %p7927_p6 }
  0xcd   : > { %7937 = shalt.err (!%p7934_p2)
}
  0xce   : > { %7408 = dma.hbm_to_vmem [thread:$0]  (!%p10745_p1), %s10609_s11, 8192, %s592_s12, [#allocation15], %s10749_s9, %s10749_s9, %s10748_s27  }
  0xcf   : > { %s10750_s0 = sld [smem:[#allocation86_spill]]  ;;  %s627_s3 = scalar_lea.vmem [#allocation2], %s8398_s28 }
  0xd0   : > { %s636_s24 = sshll.u32 %s627_s3, 4  ;;  %s10752_s21 = sand.u32 1, %s8116_s20   ;;  %s8520_s24 = int_to_ptr.vmem [resolvable:$true] %s636_s24 }
  0xd1   : > { %s8524_s8 = scalar_lea.sflag [#allocation3], %s10752_s21  ;;  %p10753_p13 = scmp.ne.s32.totalorder %s10743_s13, 0 }
  0xd5   : > { %s10751_s16 = smov %s10750_s0  ;;  %s8517_s25 = scalar_lea.hbm %s10750_s0, %s8401_s14 }
  0xd6   : > { %s7938_s4 = scalar_lea.hbm %s8517_s25, 2048  ;;  %s7943_s12 = scalar_lea.hbm %s10751_s16, 4096 }
  0xd7   : > { %p7939_p7 = scmp.ne.s32.totalorder %s8517_s25, %s7938_s4  ;;  %p7944_p12 = scmp.lt.u32.totalorder %s8517_s25, %s10751_s16 }
  0xd8   : > { %p7945_p5 = scmp.lt.u32.totalorder %s7943_s12, %s7938_s4  ;;  %p7947_p11 = scmp.lt.u32.totalorder %s7938_s4, %s8517_s25 }
  0xd9   : > { %p7941_p1 = pnand %p7939_p7, %p10753_p13 }
  0xda   : > { %p7946_p10 = por %p7945_p5, %p7944_p12 }
  0xdb   : > { %p7942_p9 = pneg %p7941_p1 }
  0xdc   : > { %p7948_p3 = por %p7947_p11, %p7946_p10 }
  0xde   : > { %p7949_p6 = pnand %p7948_p3, %p7942_p9 }
  0xe0   : > { %7952 = shalt.err (!%p7949_p6)
}
  0xe1   : > { %s7953_s18 = scalar_lea.vmem %s8520_s24, 2048  ;;  %s8142_s15 = smov [#allocation2]  }
  0xe2   : > { %p7954_p4 = scmp.ne.s32.totalorder %s8520_s24, %s7953_s18  ;;  %s7958_s6 = sshll.u32 %s8142_s15, 4  ;;  %s7959_s6 = int_to_ptr.vmem [resolvable:$false] %s7958_s6 }
  0xe3   : > { %s7960_s0 = scalar_lea.vmem %s7959_s6, 4096  ;;  %p7961_p2 = scmp.lt.s32.totalorder %s8520_s24, %s7959_s6 }
  0xe4   : > { %p7956_p0 = pnand %p7954_p4, %p10753_p13  ;;  %p7962_p7 = scmp.lt.s32.totalorder %s7960_s0, %s7953_s18 }
  0xe6   : > { %p7957_p8 = pneg %p7956_p0  ;;  %p7963_p1 = por %p7962_p7, %p7961_p2 }
  0xe8   : > { %p7964_p12 = pnand %p7963_p1, %p7957_p8 }
  0xea   : > { %7967 = shalt.err (!%p7964_p12)
}
  0xeb   : > { %p10754_p9 = scmp.ne.s32.totalorder %s10741_s19, 0  ;;  %s10755_s3 = smov 128  }
  0xec   : > { %s10756_s27 = sld [smem:[#allocation88_spill]]  ;;  %s671_s12 = scalar_lea.vmem [#allocation7], %s8398_s28 }
  0xed   : > { %7412 = dma.hbm_to_vmem [thread:$0]  (!%p10754_p9), %s8517_s25, 2048, %s8520_s24, %s8524_s8, %s10755_s3, %s10755_s3, %s8138_s22  }
  0xee   : > { %s680_s17 = sshll.u32 %s671_s12, 4  ;;  %s8558_s17 = int_to_ptr.vmem [resolvable:$true] %s680_s17 }
  0xf2   : > { %s8555_s9 = scalar_lea.hbm %s10756_s27, %s8401_s14  ;;  %s7973_s24 = scalar_lea.hbm %s10756_s27, 4096 }
  0xf3   : > { %s7968_s1 = scalar_lea.hbm %s8555_s9, 2048  ;;  %p7974_p3 = scmp.lt.u32.totalorder %s8555_s9, %s10756_s27 }
  0xf4   : > { %p7969_p5 = scmp.ne.s32.totalorder %s8555_s9, %s7968_s1  ;;  %p7975_p6 = scmp.lt.u32.totalorder %s7973_s24, %s7968_s1 }
  0xf5   : > { %p7977_p0 = scmp.lt.u32.totalorder %s7968_s1, %s8555_s9 }
  0xf6   : > { %p7971_p10 = pnand %p7969_p5, %p10753_p13  ;;  %p7976_p4 = por %p7975_p6, %p7974_p3 }
  0xf8   : > { %p7972_p11 = pneg %p7971_p10  ;;  %p7978_p8 = por %p7977_p0, %p7976_p4 }
  0xfa   : > { %p7979_p2 = pnand %p7978_p8, %p7972_p11 }
  0xfc   : > { %7982 = shalt.err (!%p7979_p2)
}
  0xfd   : > { %s7983_s28 = scalar_lea.vmem %s8558_s17, 2048  ;;  %s8143_s15 = smov [#allocation7]  }
  0xfe   : > { %p7984_p7 = scmp.ne.s32.totalorder %s8558_s17, %s7983_s28  ;;  %s7988_s6 = sshll.u32 %s8143_s15, 4  ;;  %s7989_s6 = int_to_ptr.vmem [resolvable:$false] %s7988_s6 }
  0xff   : > { %s7990_s0 = scalar_lea.vmem %s7989_s6, 4096  ;;  %p7991_p5 = scmp.lt.s32.totalorder %s8558_s17, %s7989_s6 }
 0x100   : > { %p7986_p1 = pnand %p7984_p7, %p10753_p13  ;;  %p7992_p10 = scmp.lt.s32.totalorder %s7990_s0, %s7983_s28 }
 0x102   : > { %p7987_p12 = pneg %p7986_p1  ;;  %p7993_p3 = por %p7992_p10, %p7991_p5 }
 0x104   : > { %p7994_p6 = pnand %p7993_p3, %p7987_p12 }
 0x106   : > { %7997 = shalt.err (!%p7994_p6)
}
 0x107   : > { %7418 = dma.hbm_to_vmem [thread:$0]  (!%p10754_p9), %s8555_s9, 2048, %s8558_s17, %s8417_s29, %s10755_s3, %s10755_s3, %s8138_s22  }
 0x108   : > { %p10757_p13 = scmp.ne.s32.totalorder %s10728_s23, 0 }
 0x10a   : > { %692 = sbr.rel (%p10757_p13) target bundleno = 2580 (0xa14), region = 92 }
 0x111   : > { %s8588_s13 = sand.u32 1, %s8112_s30   ;;  %p10758_p11 = scmp.ne.s32.totalorder %s10734_s26, 0 }
 0x112   : > { %s8591_s21 = sshll.u32 %s8588_s13, 7  ;;  %s695_s19 = scalar_lea.sflag [#allocation3], %s8588_s13 }
 0x113   : > { %s8595_s4 = scalar_lea.vmem [#allocation2], %s8591_s21 }
 0x114   : > { %8079 = dma.done.wait (%p10758_p11), %s695_s19, 2048  }
 0x115   : > { %8081 = vsyncadd (%p10758_p11), %s695_s19, 4294965248  ;;  %s703_s23 = sand.u32 1, %s8282_s2   ;;  %s8603_s22 = scalar_lea.vmem [#allocation5], %s8591_s21 }
 0x116   : > { %s704_s29 = scalar_lea.sflag [#allocation6], %s703_s23 }
 0x117   : > { %8083 = dma.done.wait (%p10758_p11), %s704_s29, 4096  }
 0x118   : > { %8085 = vsyncadd (%p10758_p11), %s704_s29, 4294963200  ;;  %s8610_s3 = scalar_lea.vmem [#allocation7], %s8591_s21  ;;  %p10759_p9 = scmp.eq.s32.totalorder %s8282_s2, 0 }
 0x11a   : > { %8087 = dma.done.wait (%p10759_p9), [#allocation9], 9216   ;;  %p10760_p4 = pmov %p10759_p9 }
 0x11c   : > { %8089 = vsyncadd (%p10760_p4), [#allocation9], 4294958080  ;;  %p10761_p0 = pmov %p10760_p4 }
 0x11e   : > { %8091 = dma.done.wait (%p10761_p0), [#allocation12], 16384   ;;  %p10762_p8 = pmov %p10761_p0 }
 0x11f   : > { %p10763_p2 = pmov %p10761_p0 }
 0x120   : > { %8093 = vsyncadd (%p10762_p8), [#allocation12], 4294950912 }
 0x121   : > { %8095 = dma.done.wait (%p10763_p2), [#allocation15], 8192   ;;  %p10764_p7 = pmov %p10761_p0 }
 0x122   : > { %v827_v0 = vld [vmem:[%s8603_s22] sm:$0xff]  ;;  %v828_v1 = vld [vmem:[%s8603_s22 + $0x8] sm:$0xff]  ;;  %v829_v2 = vld [vmem:[%s8603_s22 + $0x10] sm:$0xff]  ;;  %s8884_s2 = scalar_lea.vmem [#allocation17], %s8591_s21  ;;  %s10765_s1 = sld [smem:[#allocation91_spill]] }
 0x123   : > { %8097 = vsyncadd (%p10764_p7), [#allocation15], 4294959104  ;;  %v8627_v3 = vpack.c.bf16 %v828_v1, %v827_v0  ;;  %v830_v4 = vld [vmem:[%s8603_s22 + $0x18] sm:$0xff]  ;;  %v811_v6 = vld [vmem:[%s8595_s4] sm:$0xff]  ;;  %s10782_s24 = sld [smem:[#allocation90_spill]]  ;;  %s10799_s28 = sld [smem:[#allocation93_spill]] }
 0x124   : > { %v8630_v5 = vpack.c.bf16 %v830_v4, %v829_v2  ;;  %v812_v7 = vld [vmem:[%s8595_s4 + $0x8] sm:$0xff]  ;;  %v831_v8 = vld [vmem:[%s8603_s22 + $0x20] sm:$0xff]  ;;  %v833_v12 = vld [vmem:[%s8603_s22 + $0x30] sm:$0xff]  ;;  %s10833_s0 = sld [smem:[#allocation94_spill]]  ;;  %s10874_s23 = sld [smem:[#allocation27_spill]] }
 0x125   : > { %7171 = vmatprep.subr.bf16.mxu1 %v8627_v3  ;;  %v832_v9 = vld [vmem:[%s8603_s22 + $0x28] sm:$0xff]  ;;  %v1035_v10 = vpack.c.bf16 %v812_v7, %v811_v6  ;;  %v834_v13 = vld [vmem:[%s8603_s22 + $0x38] sm:$0xff]  ;;  %v835_v15 = vld [vmem:[%s8603_s22 + $0x40] sm:$0xff]  ;;  %s10875_s29 = sld [smem:[#allocation31_spill]]  ;;  %s10876_s12 = sld [smem:[#allocation101_spill]] }
 0x126   : > { %7172 = vmatpush3.bf16.xpose.msra.mxu1 %v8627_v3  ;;  %v8639_v11 = vpack.c.bf16 %v832_v9, %v831_v8  ;;  %v8645_v14 = vpack.c.bf16 %v834_v13, %v833_v12  ;;  %v836_v16 = vld [vmem:[%s8603_s22 + $0x48] sm:$0xff]  ;;  %v837_v18 = vld [vmem:[%s8603_s22 + $0x50] sm:$0xff]  ;;  %v838_v19 = vld [vmem:[%s8603_s22 + $0x58] sm:$0xff]  ;;  %s8145_s25 = smov [#allocation17]  }
 0x127   : > { %7173 = vmatprep.subr.bf16.mxu1 %v8630_v5  ;;  %7187 = vmatprep.mubr.bf16.mxu1 %v1035_v10  ;;  %v8651_v17 = vpack.c.bf16 %v836_v16, %v835_v15  ;;  %v8657_v20 = vpack.c.bf16 %v838_v19, %v837_v18  ;;  %v839_v21 = vld [vmem:[%s8603_s22 + $0x60] sm:$0xff]  ;;  %v840_v22 = vld [vmem:[%s8603_s22 + $0x68] sm:$0xff]  ;;  %v841_v24 = vld [vmem:[%s8603_s22 + $0x70] sm:$0xff] }
 0x128   : > { %v8663_v23 = vpack.c.bf16 %v840_v22, %v839_v21  ;;  %v842_v25 = vld [vmem:[%s8603_s22 + $0x78] sm:$0xff]  ;;  %v8674_v27 = vld [vmem:[%s8595_s4 + $0x10] sm:$0xff]  ;;  %v8680_v29 = vld [vmem:[%s8595_s4 + $0x20] sm:$0xff] }
 0x129   : > { %v8669_v26 = vpack.c.bf16 %v842_v25, %v841_v24  ;;  %v8677_v28 = vld [vmem:[%s8595_s4 + $0x18] sm:$0xff]  ;;  %v8683_v30 = vld [vmem:[%s8595_s4 + $0x28] sm:$0xff]  ;;  %v8691_v33 = vld [vmem:[%s8595_s4 + $0x30] sm:$0xff] }
 0x12a   : > { %v1036_v31 = vpack.c.bf16 %v8677_v28, %v8674_v27  ;;  %v1037_v32 = vpack.c.bf16 %v8683_v30, %v8680_v29  ;;  %v8694_v34 = vld [vmem:[%s8595_s4 + $0x38] sm:$0xff]  ;;  %v8697_v35 = vld [vmem:[%s8595_s4 + $0x40] sm:$0xff]  ;;  %v8700_v36 = vld [vmem:[%s8595_s4 + $0x48] sm:$0xff]  ;;  %s6578_s22 = sshll.u32 %s10874_s23, 11 }
 0x12b   : > { %v1038_v37 = vpack.c.bf16 %v8694_v34, %v8691_v33  ;;  %v1039_v38 = vpack.c.bf16 %v8700_v36, %v8697_v35  ;;  %v8707_v39 = vld [vmem:[%s8595_s4 + $0x50] sm:$0xff]  ;;  %v8710_v40 = vld [vmem:[%s8595_s4 + $0x58] sm:$0xff]  ;;  %v8713_v41 = vld [vmem:[%s8595_s4 + $0x60] sm:$0xff]  ;;  %s10363_s17 = scalar_lea.hbm %s10876_s12, %s6578_s22  ;;  %p10877_p12 = scmp.ne.s32.totalorder %s10875_s29, 0 }
 0x12c   : > { %v8716_v42 = vld [vmem:[%s8595_s4 + $0x68] sm:$0xff]  ;;  %v1040_v43 = vpack.c.bf16 %v8710_v40, %v8707_v39  ;;  %v8723_v45 = vld [vmem:[%s8595_s4 + $0x70] sm:$0xff]  ;;  %v8726_v46 = vld [vmem:[%s8595_s4 + $0x78] sm:$0xff] }
 0x12d   : > { %v1041_v44 = vpack.c.bf16 %v8716_v42, %v8713_v41  ;;  %v1042_v47 = vpack.c.bf16 %v8726_v46, %v8723_v45  ;;  %v7502_v22 = vld [vmem:[#allocation8] sm:$0xff]   ;;  %v7503_v24 = vld [vmem:[#allocation8 + $0x8] sm:$0xff]  }
 0x12e   : > { %7174 = vmatpush3.bf16.xpose.msra.mxu1 %v8630_v5  ;;  %7139 = vmatprep.subr.bf16.mxu0 %v7502_v22  ;;  %v843_v25 = vld [vmem:[%s8610_s3] sm:$0xff] }
 0x12f   : > { %7175 = vmatprep.subr.bf16.mxu1 %v8639_v11  ;;  %7140 = vmatpush3.bf16.msra.mxu0 %v7502_v22 }
 0x130   : > { %7141 = vmatprep.subr.bf16.mxu0 %v7503_v24 }
 0x133   : > { %7142 = vmatpush3.bf16.msra.mxu0 %v7503_v24 }
 0x136   : > { %7176 = vmatpush3.bf16.xpose.msra.mxu1 %v8639_v11 }
 0x137   : > { %7177 = vmatprep.subr.bf16.mxu1 %v8645_v14 }
 0x13e   : > { %7178 = vmatpush3.bf16.xpose.msra.mxu1 %v8645_v14 }
 0x13f   : > { %7179 = vmatprep.subr.bf16.mxu1 %v8651_v17 }
 0x146   : > { %7180 = vmatpush3.bf16.xpose.msra.mxu1 %v8651_v17 }
 0x147   : > { %7181 = vmatprep.subr.bf16.mxu1 %v8657_v20 }
 0x14e   : > { %7182 = vmatpush3.bf16.xpose.msra.mxu1 %v8657_v20 }
 0x14f   : > { %7183 = vmatprep.subr.bf16.mxu1 %v8663_v23 }
 0x156   : > { %7184 = vmatpush3.bf16.xpose.msra.mxu1 %v8663_v23 }
 0x157   : > { %7185 = vmatprep.subr.bf16.mxu1 %v8669_v26 }
 0x15e   : > { %7186 = vmatpush3.bf16.xpose.msra.mxu1 %v8669_v26 }
 0x165   : > { %7188 = vmatmul.mubr.bf16.vlgmr.msra.gmra.mrb[0].mxu1 %v1036_v31  ;;  %v844_v31 = vld [vmem:[%s8610_s3 + $0x8] sm:$0xff] }
 0x166   : > { %7191 = vmatprep.mubr.bf16.mxu1 %v1037_v32  ;;  %v7504_v32 = vld [vmem:[#allocation8 + $0x10] sm:$0xff]  }
 0x167   : > { %7143 = vmatprep.subr.bf16.mxu0 %v7504_v32 }
 0x168   : > { %7144 = vmatpush3.bf16.msra.mxu0 %v7504_v32 }
 0x16d   : > { %7192 = vmatmul.mubr.bf16.gmra.mrb[4].mxu1 %v1038_v37  ;;  %v859_v37 = vpack.c.bf16 %v844_v31, %v843_v25 }
 0x16e   : > { %7195 = vmatprep.mubr.bf16.mxu1 %v1039_v38  ;;  %v7505_v38 = vld [vmem:[#allocation8 + $0x18] sm:$0xff]  }
 0x16f   : > { %7155 = vmatprep.mubr.bf16.mxu0 %v859_v37  ;;  %7145 = vmatprep.subr.bf16.mxu0 %v7505_v38 }
 0x170   : > { %7146 = vmatpush3.bf16.msra.mxu0 %v7505_v38 }
 0x175   : > { %7196 = vmatmul.mubr.bf16.gmra.mrb[8].mxu1 %v1040_v43  ;;  %v7506_v43 = vld [vmem:[#allocation8 + $0x20] sm:$0xff]  }
 0x176   : > { %7199 = vmatprep.mubr.bf16.mxu1 %v1041_v44  ;;  %7147 = vmatprep.subr.bf16.mxu0 %v7506_v43  ;;  %v7507_v44 = vld [vmem:[#allocation8 + $0x28] sm:$0xff]  }
 0x177   : > { %7148 = vmatpush3.bf16.msra.mxu0 %v7506_v43 }
 0x178   : > { %7149 = vmatprep.subr.bf16.mxu0 %v7507_v44 }
 0x17b   : > { %7150 = vmatpush3.bf16.msra.mxu0 %v7507_v44 }
 0x17d   : > { %7200 = vmatmul.mubr.bf16.gmra.mrb[12].mxu1 %v1042_v47  ;;  %v7508_v47 = vld [vmem:[#allocation8 + $0x30] sm:$0xff]  }
 0x17e   : > { %7151 = vmatprep.subr.bf16.mxu0 %v7508_v47 }
 0x17f   : > { %7152 = vmatpush3.bf16.msra.mxu0 %v7508_v47 }
 0x238   : > { %v7189_v48 = vpop.f32.mrb[0].mxu1 }
 0x239   : > { %v8730_v49 = vmul.f32 0.088388346, %v7189_v48  ;;  %v1085_v50 = vpop.f32.mrb[1].mxu1  ;;  %v7509_v48 = vld [vmem:[#allocation8 + $0x38] sm:$0xff]  }
 0x23a   : > { %v8732_v51 = vmul.f32 0.088388346, %v1085_v50  ;;  %v7190_v52 = vpop.f32.mrb[2].mxu1  ;;  %v845_v50 = vld [vmem:[%s8610_s3 + $0x10] sm:$0xff]  ;;  %7153 = vmatprep.subr.bf16.mxu0 %v7509_v48 }
 0x23b   : > { %1168 = vmax.xlane.f32.xlu1 %v8730_v49  ;;  %v1088_v53 = vpop.f32.mrb[3].mxu1  ;;  %v8736_v54 = vmul.f32 0.088388346, %v7190_v52  ;;  %v846_v52 = vld [vmem:[%s8610_s3 + $0x18] sm:$0xff]  ;;  %7154 = vmatpush3.bf16.msra.mxu0 %v7509_v48 }
 0x23c   : > { %1164 = vmax.xlane.f32.xlu0 %v8732_v51  ;;  %v8738_v55 = vmul.f32 0.088388346, %v1088_v53  ;;  %v847_v53 = vld [vmem:[%s8610_s3 + $0x20] sm:$0xff]  ;;  %7203 = vmatprep.subr.bf16.mxu0 %v8627_v3 }
 0x23f   : > { %1170 = vmax.xlane.f32.xlu1 %v8736_v54 }
 0x240   : > { %1166 = vmax.xlane.f32.xlu0 %v8738_v55  ;;  %v7193_v56 = vpop.f32.mrb[4].mxu1 }
 0x241   : > { %v1101_v57 = vpop.f32.mrb[5].mxu1  ;;  %v8744_v61 = vmul.f32 0.088388346, %v7193_v56  ;;  %v848_v56 = vld [vmem:[%s8610_s3 + $0x28] sm:$0xff] }
 0x242   : > { %v8742_v58 = vmul.f32 0.088388346, %v1101_v57  ;;  %v7194_v59 = vpop.f32.mrb[6].mxu1  ;;  %v860_v57 = vpack.c.bf16 %v846_v52, %v845_v50 }
 0x243   : > { %v1104_v60 = vpop.f32.mrb[7].mxu1  ;;  %v8749_v63 = vmul.f32 0.088388346, %v7194_v59  ;;  %v861_v59 = vpack.c.bf16 %v848_v56, %v847_v53 }
 0x244   : > { %v8746_v62 = vmul.f32 0.088388346, %v1104_v60  ;;  %1172 = vmax.xlane.f32.xlu0 %v8742_v58  ;;  %7156 = vmatmul.mubr.bf16.vlgmr.msra.gmra.mrb[0].mxu0 %v860_v57  ;;  %v849_v60 = vld [vmem:[%s8610_s3 + $0x30] sm:$0xff] }
 0x245   : > { %7204 = vmatpush3.bf16.msra.mxu0 %v8627_v3  ;;  %7159 = vmatprep.mubr.bf16.mxu0 %v861_v59 }
 0x246   : > { %1174 = vmax.xlane.f32.xlu1 %v8746_v62  ;;  %7205 = vmatprep.subr.bf16.mxu0 %v8630_v5 }
 0x248   : > { %1176 = vmax.xlane.f32.xlu0 %v8744_v61  ;;  %v7197_v0 = vpop.f32.mrb[8].mxu1 }
 0x249   : > { %v1117_v1 = vpop.f32.mrb[9].mxu1  ;;  %v8756_v7 = vmul.f32 0.088388346, %v7197_v0  ;;  %v850_v0 = vld [vmem:[%s8610_s3 + $0x38] sm:$0xff]  ;;  %7206 = vmatpush3.bf16.msra.mxu0 %v8630_v5 }
 0x24a   : > { %v8753_v2 = vmul.f32 0.088388346, %v1117_v1  ;;  %1178 = vmax.xlane.f32.xlu1 %v8749_v63  ;;  %v7198_v4 = vpop.f32.mrb[10].mxu1  ;;  %v862_v1 = vpack.c.bf16 %v850_v0, %v849_v60  ;;  %7207 = vmatprep.subr.bf16.mxu0 %v8639_v11 }
 0x24b   : > { %v1120_v6 = vpop.f32.mrb[11].mxu1  ;;  %v8761_v9 = vmul.f32 0.088388346, %v7198_v4 }
 0x24c   : > { %v8758_v8 = vmul.f32 0.088388346, %v1120_v6  ;;  %1180 = vmax.xlane.f32.xlu0 %v8753_v2  ;;  %7160 = vmatmul.mubr.bf16.gmra.mrb[4].mxu0 %v862_v1 }
 0x24d   : > { %7208 = vmatpush3.bf16.msra.mxu0 %v8639_v11 }
 0x24e   : > { %1182 = vmax.xlane.f32.xlu1 %v8758_v8  ;;  %7209 = vmatprep.subr.bf16.mxu0 %v8645_v14 }
 0x250   : > { %1184 = vmax.xlane.f32.xlu0 %v8756_v7  ;;  %v7201_v10 = vpop.f32.mrb[12].mxu1 }
 0x251   : > { %v1133_v12 = vpop.f32.mrb[13].mxu1  ;;  %v8768_v18 = vmul.f32 0.088388346, %v7201_v10  ;;  %7210 = vmatpush3.bf16.msra.mxu0 %v8645_v14 }
 0x252   : > { %v8765_v13 = vmul.f32 0.088388346, %v1133_v12  ;;  %1186 = vmax.xlane.f32.xlu1 %v8761_v9  ;;  %v7202_v15 = vpop.f32.mrb[14].mxu1  ;;  %7211 = vmatprep.subr.bf16.mxu0 %v8651_v17 }
 0x253   : > { %v1136_v16 = vpop.f32.mrb[15].mxu1  ;;  %v8773_v21 = vmul.f32 0.088388346, %v7202_v15 }
 0x254   : > { %v8770_v19 = vmul.f32 0.088388346, %v1136_v16  ;;  %1188 = vmax.xlane.f32.xlu0 %v8765_v13 }
 0x255   : > { %7212 = vmatpush3.bf16.msra.mxu0 %v8651_v17 }
 0x256   : > { %1190 = vmax.xlane.f32.xlu1 %v8770_v19  ;;  %7213 = vmatprep.subr.bf16.mxu0 %v8657_v20 }
 0x258   : > { %1192 = vmax.xlane.f32.xlu0 %v8768_v18 }
 0x259   : > { %7214 = vmatpush3.bf16.msra.mxu0 %v8657_v20 }
 0x25a   : > { %1194 = vmax.xlane.f32.xlu1 %v8773_v21  ;;  %7215 = vmatprep.subr.bf16.mxu0 %v8663_v23 }
 0x25d   : > { %7216 = vmatpush3.bf16.msra.mxu0 %v8663_v23 }
 0x25e   : > { %7217 = vmatprep.subr.bf16.mxu0 %v8669_v26 }
 0x261   : > { %7218 = vmatpush3.bf16.msra.mxu0 %v8669_v26 }
 0x2c8   : > { %v1169_v3 = vpop.xlane.xlu1 %1168 }
 0x2c9   : > { %v1198_v5 = vsub.f32 %v8730_v49, %v1169_v3  ;;  %v1165_v11 = vpop.xlane.xlu0 %1164 }
 0x2ca   : > { %v1196_v14 = vsub.f32 %v8732_v51, %v1165_v11 }
 0x2cb   : > { %v1216_v6 = vmul.f32 1.442695, %v1198_v5 }
 0x2cc   : > { %v1212_v4 = vmul.f32 1.442695, %v1196_v14  ;;  %v1171_v17 = vpop.xlane.xlu1 %1170 }
 0x2cd   : > { %v1199_v10 = vsub.f32 %v8736_v54, %v1171_v17  ;;  %v1167_v20 = vpop.xlane.xlu0 %1166 }
 0x2ce   : > { %7638 = vpow2.f32 %v1212_v4  ;;  %v1197_v12 = vsub.f32 %v8738_v55, %v1167_v20 }
 0x2cf   : > { %7640 = vpow2.f32 %v1216_v6  ;;  %v1218_v15 = vmul.f32 1.442695, %v1199_v10  ;;  %v851_v6 = vld [vmem:[%s8610_s3 + $0x40] sm:$0xff]  ;;  %v852_v10 = vld [vmem:[%s8610_s3 + $0x48] sm:$0xff] }
 0x2d0   : > { %v1214_v23 = vmul.f32 1.442695, %v1197_v12 }
 0x2d1   : > { %v1173_v16 = vpop.xlane.xlu0 %1172 }
 0x2d2   : > { %7642 = vpow2.f32 %v1214_v23  ;;  %v1200_v26 = vsub.f32 %v8742_v58, %v1173_v16  ;;  %v863_v23 = vpack.c.bf16 %v852_v10, %v851_v6 }
 0x2d3   : > { %v1175_v49 = vpop.xlane.xlu1 %1174  ;;  %7644 = vpow2.f32 %v1218_v15  ;;  %v853_v15 = vld [vmem:[%s8610_s3 + $0x50] sm:$0xff] }
 0x2d4   : > { %v1220_v22 = vmul.f32 1.442695, %v1200_v26  ;;  %v1201_v51 = vsub.f32 %v8746_v62, %v1175_v49  ;;  %7163 = vmatprep.mubr.bf16.mxu0 %v863_v23 }
 0x2d5   : > { %v1177_v24 = vpop.xlane.xlu0 %1176 }
 0x2d6   : > { %7646 = vpow2.f32 %v1220_v22  ;;  %v1222_v25 = vmul.f32 1.442695, %v1201_v51  ;;  %v1202_v54 = vsub.f32 %v8744_v61, %v1177_v24  ;;  %v855_v24 = vld [vmem:[%s8610_s3 + $0x60] sm:$0xff] }
 0x2d7   : > { %v1179_v31 = vpop.xlane.xlu1 %1178 }
 0x2d8   : > { %v8809_v32 = vpop.eup %7638  ;;  %v1224_v55 = vmul.f32 1.442695, %v1202_v54  ;;  %v1203_v37 = vsub.f32 %v8749_v63, %v1179_v31  ;;  %7648 = vpow2.f32 %v1222_v25  ;;  %v856_v25 = vld [vmem:[%s8610_s3 + $0x68] sm:$0xff]  ;;  %v857_v31 = vld [vmem:[%s8610_s3 + $0x70] sm:$0xff] }
 0x2d9   : > { %v1181_v38 = vpop.xlane.xlu0 %1180  ;;  %1244 = vadd.xlane.f32.xlu0 %v8809_v32  ;;  %v8814_v43 = vpop.eup %7640  ;;  %v865_v54 = vpack.c.bf16 %v856_v25, %v855_v24 }
 0x2da   : > { %7650 = vpow2.f32 %v1224_v55  ;;  %v1226_v58 = vmul.f32 1.442695, %v1203_v37  ;;  %v1204_v62 = vsub.f32 %v8753_v2, %v1181_v38  ;;  %v858_v55 = vld [vmem:[%s8610_s3 + $0x78] sm:$0xff] }
 0x2db   : > { %v1183_v44 = vpop.xlane.xlu1 %1182  ;;  %v866_v37 = vpack.c.bf16 %v858_v55, %v857_v31 }
 0x2dc   : > { %v8816_v47 = vpop.eup %7642  ;;  %v1228_v61 = vmul.f32 1.442695, %v1204_v62  ;;  %v1205_v48 = vsub.f32 %v8758_v8, %v1183_v44  ;;  %7652 = vpow2.f32 %v1226_v58 }
 0x2dd   : > { %v1185_v50 = vpop.xlane.xlu0 %1184  ;;  %1248 = vadd.xlane.f32.xlu0 %v8814_v43  ;;  %1246 = vadd.xlane.f32.xlu1 %v8816_v47  ;;  %v8822_v53 = vpop.eup %7644 }
 0x2de   : > { %7654 = vpow2.f32 %v1228_v61  ;;  %v1230_v63 = vmul.f32 1.442695, %v1205_v48  ;;  %v1206_v52 = vsub.f32 %v8756_v7, %v1185_v50 }
 0x2df   : > { %v1187_v2 = vpop.xlane.xlu1 %1186 }
 0x2e0   : > { %v8824_v56 = vpop.eup %7646  ;;  %v1232_v57 = vmul.f32 1.442695, %v1206_v52  ;;  %v1207_v59 = vsub.f32 %v8761_v9, %v1187_v2  ;;  %7656 = vpow2.f32 %v1230_v63 }
 0x2e1   : > { %1252 = vadd.xlane.f32.xlu0 %v8824_v56  ;;  %v1189_v8 = vpop.xlane.xlu0 %1188  ;;  %1250 = vadd.xlane.f32.xlu1 %v8822_v53 }
 0x2e2   : > { %7658 = vpow2.f32 %v1232_v57  ;;  %v1234_v60 = vmul.f32 1.442695, %v1207_v59  ;;  %v1208_v0 = vsub.f32 %v8765_v13, %v1189_v8  ;;  %v8830_v7 = vpop.eup %7648 }
 0x2e3   : > { %v1191_v1 = vpop.xlane.xlu1 %1190 }
 0x2e4   : > { %v8832_v3 = vpop.eup %7650  ;;  %v1236_v5 = vmul.f32 1.442695, %v1208_v0  ;;  %v1209_v9 = vsub.f32 %v8770_v19, %v1191_v1  ;;  %7660 = vpow2.f32 %v1234_v60 }
 0x2e5   : > { %1256 = vadd.xlane.f32.xlu0 %v8832_v3  ;;  %v1193_v11 = vpop.xlane.xlu0 %1192  ;;  %1254 = vadd.xlane.f32.xlu1 %v8830_v7 }
 0x2e6   : > { %7662 = vpow2.f32 %v1236_v5  ;;  %v1238_v14 = vmul.f32 1.442695, %v1209_v9  ;;  %v1210_v13 = vsub.f32 %v8768_v18, %v1193_v11  ;;  %v8838_v4 = vpop.eup %7652  ;;  %v854_v18 = vld [vmem:[%s8610_s3 + $0x58] sm:$0xff]  ;;  %s6048_s3 = sshll.u32 %s8884_s2, 4  ;;  %s10365_s3 = int_to_ptr.vmem [resolvable:$true] %s6048_s3 }
 0x2e7   : > { %v1195_v17 = vpop.xlane.xlu1 %1194  ;;  %v864_v26 = vpack.c.bf16 %v854_v18, %v853_v15  ;;  %s7998_s18 = scalar_lea.vmem %s10365_s3, 2048 }
 0x2e8   : > { %v8842_v20 = vpop.eup %7654  ;;  %v1240_v19 = vmul.f32 1.442695, %v1210_v13  ;;  %v1211_v12 = vsub.f32 %v8773_v21, %v1195_v17  ;;  %7664 = vpow2.f32 %v1238_v14  ;;  %p7999_p1 = scmp.ne.s32.totalorder %s10365_s3, %s7998_s18 }
 0x2e9   : > { %1260 = vadd.xlane.f32.xlu0 %v8842_v20  ;;  %1258 = vadd.xlane.f32.xlu1 %v8838_v4 }
 0x2ea   : > { %7666 = vpow2.f32 %v1240_v19  ;;  %v1242_v16 = vmul.f32 1.442695, %v1211_v12  ;;  %v8849_v49 = vpop.eup %7656  ;;  %7164 = vmatmul.mubr.bf16.gmra.mrb[8].mxu0 %v864_v26  ;;  %p8000_p5 = pnand %p7999_p1, %p10877_p12 }
 0x2eb   : > { %7167 = vmatprep.mubr.bf16.mxu0 %v865_v54 }
 0x2ec   : > { %v8851_v22 = vpop.eup %7658  ;;  %7668 = vpow2.f32 %v1242_v16  ;;  %p8001_p10 = pneg %p8000_p5 }
 0x2ed   : > { %1264 = vadd.xlane.f32.xlu0 %v8851_v22  ;;  %1262 = vadd.xlane.f32.xlu1 %v8849_v49 }
 0x2ee   : > { %v8855_v21 = vpop.eup %7660 }
 0x2f0   : > { %v8857_v51 = vpop.eup %7662 }
 0x2f1   : > { %1268 = vadd.xlane.f32.xlu0 %v8857_v51  ;;  %1266 = vadd.xlane.f32.xlu1 %v8855_v21 }
 0x2f2   : > { %v8865_v38 = vpop.eup %7664  ;;  %7168 = vmatmul.mubr.bf16.gmra.mrb[12].mxu0 %v866_v37 }
 0x2f4   : > { %v8867_v58 = vpop.eup %7666 }
 0x2f5   : > { %1272 = vadd.xlane.f32.xlu0 %v8867_v58  ;;  %1270 = vadd.xlane.f32.xlu1 %v8865_v38 }
 0x2f6   : > { %v8871_v62 = vpop.eup %7668 }
 0x2f9   : > { %1274 = vadd.xlane.f32.xlu1 %v8871_v62 }
 0x317   : > { %v8874_v52 = vpop.f32.mrb[0].mxu0 }
 0x318   : > { %v8876_v2 = vpop.f32.mrb[1].mxu0 }
 0x319   : > { %v8878_v59 = vpop.f32.mrb[2].mxu0 }
 0x31a   : > { %v8881_v1 = vpop.f32.mrb[3].mxu0 }
 0x366   : > { %v1245_v44 = vpop.xlane.xlu0 %1244 }
 0x367   : > { %7670 = vrcp.f32 %v1245_v44 }
 0x36a   : > { %v1249_v61 = vpop.xlane.xlu0 %1248  ;;  %v1247_v48 = vpop.xlane.xlu1 %1246 }
 0x36b   : > { %7672 = vrcp.f32 %v1249_v61 }
 0x36c   : > { %7674 = vrcp.f32 %v1247_v48 }
 0x36e   : > { %v1253_v50 = vpop.xlane.xlu0 %1252  ;;  %v1251_v63 = vpop.xlane.xlu1 %1250 }
 0x36f   : > { %7676 = vrcp.f32 %v1253_v50 }
 0x370   : > { %7678 = vrcp.f32 %v1251_v63 }
 0x371   : > { %v7671_v57 = vpop.eup %7670 }
 0x372   : > { %v1257_v8 = vpop.xlane.xlu0 %1256  ;;  %v1255_v60 = vpop.xlane.xlu1 %1254  ;;  %v1292_v0 = vmul.f32 %v7671_v57, %v8809_v32 }
 0x373   : > { %7680 = vrcp.f32 %v1257_v8  ;;  %v8889_v32 = vpop.f32.mrb[4].mxu0 }
 0x374   : > { %7682 = vrcp.f32 %v1255_v60  ;;  %5992 = vst [vmem:[%s8884_s2] sm:$0xff] %v1292_v0  ;;  %v8892_v6 = vpop.f32.mrb[5].mxu0 }
 0x375   : > { %v7673_v5 = vpop.eup %7672  ;;  %v8895_v12 = vpop.f32.mrb[6].mxu0 }
 0x376   : > { %v7675_v9 = vpop.eup %7674  ;;  %v1294_v11 = vmul.f32 %v7673_v5, %v8814_v43  ;;  %v1261_v14 = vpop.xlane.xlu0 %1260 }
 0x377   : > { %v1259_v13 = vpop.xlane.xlu1 %1258  ;;  %7684 = vrcp.f32 %v1261_v14  ;;  %v1293_v17 = vmul.f32 %v7675_v9, %v8816_v47  ;;  %v8899_v16 = vpop.f32.mrb[7].mxu0 }
 0x378   : > { %5994 = vst [vmem:[%s8884_s2 + $0x10] sm:$0xff] %v1294_v11  ;;  %7686 = vrcp.f32 %v1259_v13 }
 0x379   : > { %v7677_v10 = vpop.eup %7676  ;;  %v1308_v19 = vpack.c.bf16 %v1293_v17, %v1292_v0  ;;  %5993 = vst [vmem:[%s8884_s2 + $0x8] sm:$0xff] %v1293_v17 }
 0x37a   : > { %v7679_v23 = vpop.eup %7678  ;;  %v1265_v43 = vpop.xlane.xlu0 %1264  ;;  %v1296_v18 = vmul.f32 %v7677_v10, %v8824_v56 }
 0x37b   : > { %v1263_v15 = vpop.xlane.xlu1 %1262  ;;  %v1295_v47 = vmul.f32 %v7679_v23, %v8822_v53  ;;  %7688 = vrcp.f32 %v1265_v43  ;;  %7219 = vmatprep.mubr.bf16.mxu0 %v1308_v19 }
 0x37c   : > { %7690 = vrcp.f32 %v1263_v15  ;;  %5996 = vst [vmem:[%s8884_s2 + $0x20] sm:$0xff] %v1296_v18 }
 0x37d   : > { %v7681_v26 = vpop.eup %7680  ;;  %5995 = vst [vmem:[%s8884_s2 + $0x18] sm:$0xff] %v1295_v47  ;;  %v1309_v24 = vpack.c.bf16 %v1295_v47, %v1294_v11 }
 0x37e   : > { %v7683_v25 = vpop.eup %7682  ;;  %v1269_v54 = vpop.xlane.xlu0 %1268  ;;  %v1298_v55 = vmul.f32 %v7681_v26, %v8832_v3 }
 0x37f   : > { %v1267_v31 = vpop.xlane.xlu1 %1266  ;;  %7692 = vrcp.f32 %v1269_v54  ;;  %7220 = vmatmul.mubr.bf16.vlgmr.msra.gmra.mrb[16].mxu0 %v1309_v24  ;;  %v1297_v53 = vmul.f32 %v7683_v25, %v8830_v7  ;;  %v7766_v25 = vld [vmem:[%s8595_s4] sm:$0xff] }
 0x380   : > { %7694 = vrcp.f32 %v1267_v31  ;;  %5998 = vst [vmem:[%s8884_s2 + $0x30] sm:$0xff] %v1298_v55 }
 0x381   : > { %v7685_v56 = vpop.eup %7684  ;;  %v1310_v37 = vpack.c.bf16 %v1297_v53, %v1296_v18  ;;  %5997 = vst [vmem:[%s8884_s2 + $0x28] sm:$0xff] %v1297_v53  ;;  %v7767_v53 = vld [vmem:[%s8595_s4 + $0x8] sm:$0xff]  ;;  %s10856_s4 = sld [smem:[#allocation95_spill]] }
 0x382   : > { %v7687_v44 = vpop.eup %7686  ;;  %v1273_v61 = vpop.xlane.xlu0 %1272  ;;  %v1300_v50 = vmul.f32 %v7685_v56, %v8842_v20 }
 0x383   : > { %v1271_v48 = vpop.xlane.xlu1 %1270  ;;  %7696 = vrcp.f32 %v1273_v61  ;;  %7223 = vmatprep.mubr.bf16.mxu0 %v1310_v37  ;;  %v1299_v3 = vmul.f32 %v7687_v44, %v8838_v4 }
 0x384   : > { %7698 = vrcp.f32 %v1271_v48  ;;  %6000 = vst [vmem:[%s8884_s2 + $0x40] sm:$0xff] %v1300_v50 }
 0x385   : > { %v7689_v7 = vpop.eup %7688  ;;  %v1311_v63 = vpack.c.bf16 %v1299_v3, %v1298_v55  ;;  %5999 = vst [vmem:[%s8884_s2 + $0x38] sm:$0xff] %v1299_v3 }
 0x386   : > { %v7691_v57 = vpop.eup %7690  ;;  %v1302_v60 = vmul.f32 %v7689_v7, %v8851_v22 }
 0x387   : > { %v1275_v8 = vpop.xlane.xlu1 %1274  ;;  %7224 = vmatmul.mubr.bf16.gmra.mrb[20].mxu0 %v1311_v63  ;;  %v1301_v20 = vmul.f32 %v7691_v57, %v8849_v49 }
 0x388   : > { %7700 = vrcp.f32 %v1275_v8  ;;  %6002 = vst [vmem:[%s8884_s2 + $0x50] sm:$0xff] %v1302_v60 }
 0x389   : > { %v7693_v0 = vpop.eup %7692  ;;  %v1312_v5 = vpack.c.bf16 %v1301_v20, %v1300_v50  ;;  %6001 = vst [vmem:[%s8884_s2 + $0x48] sm:$0xff] %v1301_v20 }
 0x38a   : > { %v7695_v4 = vpop.eup %7694  ;;  %v1304_v9 = vmul.f32 %v7693_v0, %v8857_v51 }
 0x38b   : > { %7227 = vmatprep.mubr.bf16.mxu0 %v1312_v5  ;;  %v1303_v11 = vmul.f32 %v7695_v4, %v8855_v21 }
 0x38c   : > { %6004 = vst [vmem:[%s8884_s2 + $0x60] sm:$0xff] %v1304_v9 }
 0x38d   : > { %v7697_v14 = vpop.eup %7696  ;;  %v1313_v22 = vpack.c.bf16 %v1303_v11, %v1302_v60  ;;  %6003 = vst [vmem:[%s8884_s2 + $0x58] sm:$0xff] %v1303_v11  ;;  %v1736_v11 = vld [vmem:[#allocation11 + $0x20] sm:$0xff] }
 0x38e   : > { %v7699_v13 = vpop.eup %7698  ;;  %v1306_v49 = vmul.f32 %v7697_v14, %v8867_v58  ;;  %v1733_v14 = vld [vmem:[#allocation11 + $0x8] sm:$0xff] }
 0x38f   : > { %7228 = vmatmul.mubr.bf16.gmra.mrb[24].mxu0 %v1313_v22  ;;  %v1305_v17 = vmul.f32 %v7699_v13, %v8865_v38  ;;  %v1737_v13 = vld [vmem:[#allocation11 + $0x28] sm:$0xff] }
 0x390   : > { %6006 = vst [vmem:[%s8884_s2 + $0x70] sm:$0xff] %v1306_v49 }
 0x391   : > { %v1314_v19 = vpack.c.bf16 %v1305_v17, %v1304_v9  ;;  %6005 = vst [vmem:[%s8884_s2 + $0x68] sm:$0xff] %v1305_v17  ;;  %v1744_v17 = vld [vmem:[#allocation11 + $0x60] sm:$0xff] }
 0x392   : > { %v7701_v10 = vpop.eup %7700 }
 0x393   : > { %v1307_v51 = vmul.f32 %v7701_v10, %v8871_v62  ;;  %7231 = vmatprep.mubr.bf16.mxu0 %v1314_v19  ;;  %v6306_v10 = vcombine.low %v1733_v14, %v1737_v13 }
 0x395   : > { %v1315_v21 = vpack.c.bf16 %v1307_v51, %v1306_v49  ;;  %6007 = vst [vmem:[%s8884_s2 + $0x78] sm:$0xff] %v1307_v51  ;;  %v1740_v49 = vld [vmem:[#allocation11 + $0x40] sm:$0xff]  ;;  %v1741_v51 = vld [vmem:[#allocation11 + $0x48] sm:$0xff] }
 0x396   : > { %v6313_v19 = vcombine.high %v1740_v49, %v1744_v17 }
 0x397   : > { %7232 = vmatmul.mubr.bf16.gmra.mrb[28].mxu0 %v1315_v21  ;;  %v1745_v21 = vld [vmem:[#allocation11 + $0x68] sm:$0xff] }
 0x3bd   : > { %v8925_v23 = vpop.f32.mrb[8].mxu0 }
 0x3be   : > { %v8927_v43 = vpop.f32.mrb[9].mxu0 }
 0x3bf   : > { %v8929_v58 = vpop.f32.mrb[10].mxu0 }
 0x3c0   : > { %v8931_v15 = vpop.f32.mrb[11].mxu0 }
 0x3c5   : > { %v8933_v38 = vpop.f32.mrb[12].mxu0 }
 0x3c6   : > { %v8935_v18 = vpop.f32.mrb[13].mxu0 }
 0x3c7   : > { %v8937_v47 = vpop.f32.mrb[14].mxu0 }
 0x3c8   : > { %v8939_v62 = vpop.f32.mrb[15].mxu0 }
 0x452   : > { %v7221_v26 = vpop.f32.mrb[16].mxu0 }
 0x453   : > { %v1350_v24 = vpop.f32.mrb[17].mxu0  ;;  %v8949_v37 = vadd.f32 %v7221_v26, %v8674_v27  ;;  %v6312_v26 = vcombine.low %v1740_v49, %v1744_v17 }
 0x454   : > { %v8942_v54 = vadd.f32 %v7766_v25, %v1350_v24  ;;  %v7222_v31 = vpop.f32.mrb[18].mxu0  ;;  %v6314_v24 = vcombine.low %v1741_v51, %v1745_v21 }
 0x455   : > { %v1353_v55 = vpop.f32.mrb[19].mxu0  ;;  %v8953_v44 = vadd.f32 %v7222_v31, %v8677_v28 }
 0x456   : > { %v8945_v56 = vadd.f32 %v7767_v53, %v1353_v55  ;;  %1431 = vadd.xlane.f32.xlu0 %v8942_v54 }
 0x458   : > { %1433 = vadd.xlane.f32.xlu1 %v8945_v56 }
 0x45a   : > { %1435 = vadd.xlane.f32.xlu0 %v8949_v37  ;;  %v7225_v61 = vpop.f32.mrb[20].mxu0 }
 0x45b   : > { %v1366_v48 = vpop.f32.mrb[21].mxu0  ;;  %v8965_v27 = vadd.f32 %v7225_v61, %v8691_v33 }
 0x45c   : > { %v8957_v50 = vadd.f32 %v1366_v48, %v8680_v29  ;;  %1437 = vadd.xlane.f32.xlu1 %v8953_v44  ;;  %v7226_v3 = vpop.f32.mrb[22].mxu0 }
 0x45d   : > { %v1369_v7 = vpop.f32.mrb[23].mxu0  ;;  %v8969_v28 = vadd.f32 %v7226_v3, %v8694_v34 }
 0x45e   : > { %v8961_v63 = vadd.f32 %v1369_v7, %v8683_v30  ;;  %1439 = vadd.xlane.f32.xlu0 %v8957_v50 }
 0x460   : > { %1441 = vadd.xlane.f32.xlu1 %v8961_v63 }
 0x462   : > { %1443 = vadd.xlane.f32.xlu0 %v8965_v27  ;;  %v7229_v29 = vpop.f32.mrb[24].mxu0 }
 0x463   : > { %v1382_v57 = vpop.f32.mrb[25].mxu0  ;;  %v8981_v33 = vadd.f32 %v7229_v29, %v8707_v39 }
 0x464   : > { %v8973_v8 = vadd.f32 %v1382_v57, %v8697_v35  ;;  %1445 = vadd.xlane.f32.xlu1 %v8969_v28  ;;  %v7230_v30 = vpop.f32.mrb[26].mxu0 }
 0x465   : > { %v1385_v60 = vpop.f32.mrb[27].mxu0  ;;  %v8985_v34 = vadd.f32 %v7230_v30, %v8710_v40 }
 0x466   : > { %v8977_v20 = vadd.f32 %v1385_v60, %v8700_v36  ;;  %1447 = vadd.xlane.f32.xlu0 %v8973_v8 }
 0x468   : > { %1449 = vadd.xlane.f32.xlu1 %v8977_v20 }
 0x46a   : > { %1451 = vadd.xlane.f32.xlu0 %v8981_v33  ;;  %v7233_v35 = vpop.f32.mrb[28].mxu0 }
 0x46b   : > { %v1398_v0 = vpop.f32.mrb[29].mxu0  ;;  %v8997_v39 = vadd.f32 %v7233_v35, %v8723_v45  ;;  %v6307_v45 = vcombine.high %v1733_v14, %v1737_v13 }
 0x46c   : > { %v8989_v5 = vadd.f32 %v1398_v0, %v8713_v41  ;;  %1453 = vadd.xlane.f32.xlu1 %v8985_v34  ;;  %v7234_v36 = vpop.f32.mrb[30].mxu0  ;;  %v1732_v41 = vld [vmem:[#allocation11] sm:$0xff] }
 0x46d   : > { %v1401_v4 = vpop.f32.mrb[31].mxu0  ;;  %v9001_v40 = vadd.f32 %v7234_v36, %v8726_v46  ;;  %v6304_v22 = vcombine.low %v1732_v41, %v1736_v11  ;;  %v6315_v46 = vcombine.high %v1741_v51, %v1745_v21  ;;  %2229 = vmatprep.subr.bf16.mxu1 %v6307_v45 }
 0x46e   : > { %v8993_v9 = vadd.f32 %v1401_v4, %v8716_v42  ;;  %1455 = vadd.xlane.f32.xlu0 %v8989_v5  ;;  %v6305_v42 = vcombine.high %v1732_v41, %v1736_v11  ;;  %2230 = vmatpush1.bf16.msra.mxu1 %v6306_v10 }
 0x46f   : > { %2231 = vmatprep.subr.bf16.mxu1 %v6315_v46 }
 0x470   : > { %1457 = vadd.xlane.f32.xlu1 %v8993_v9  ;;  %2116 = vmatprep.subr.bf16.mxu0 %v6305_v42 }
 0x471   : > { %2117 = vmatpush1.bf16.msra.mxu0 %v6304_v22 }
 0x472   : > { %1459 = vadd.xlane.f32.xlu0 %v8997_v39  ;;  %2118 = vmatprep.subr.bf16.mxu0 %v6313_v19 }
 0x473   : > { %2232 = vmatpush1.bf16.msra.mxu1 %v6314_v24  ;;  %v1752_v24 = vld [vmem:[#allocation11 + $0xa0] sm:$0xff] }
 0x474   : > { %1461 = vadd.xlane.f32.xlu1 %v9001_v40 }
 0x475   : > { %2119 = vmatpush1.bf16.msra.mxu0 %v6312_v26  ;;  %v1748_v26 = vld [vmem:[#allocation11 + $0x80] sm:$0xff] }
 0x4e3   : > { %v1432_v25 = vpop.xlane.xlu0 %1431 }
 0x4e4   : > { %v1464_v31 = vmul.f32 0.0078125, %v1432_v25  ;;  %v1749_v25 = vld [vmem:[#allocation11 + $0x88] sm:$0xff] }
 0x4e5   : > { %v1434_v55 = vpop.xlane.xlu1 %1433 }
 0x4e6   : > { %v9006_v53 = vsub.f32 %v8942_v54, %v1464_v31  ;;  %v1465_v61 = vmul.f32 0.0078125, %v1434_v55  ;;  %v1753_v55 = vld [vmem:[#allocation11 + $0xa8] sm:$0xff] }
 0x4e7   : > { %v1436_v48 = vpop.xlane.xlu0 %1435 }
 0x4e8   : > { %v9009_v3 = vsub.f32 %v8945_v56, %v1465_v61  ;;  %v1466_v7 = vmul.f32 0.0078125, %v1436_v48  ;;  %v1496_v29 = vmul.f32 %v9006_v53, %v9006_v53 }
 0x4e9   : > { %v1438_v57 = vpop.xlane.xlu1 %1437 }
 0x4ea   : > { %v9014_v30 = vsub.f32 %v8949_v37, %v1466_v7  ;;  %v1467_v60 = vmul.f32 0.0078125, %v1438_v57  ;;  %1512 = vadd.xlane.f32.xlu0 %v1496_v29  ;;  %v1497_v35 = vmul.f32 %v9009_v3, %v9009_v3  ;;  %v6320_v7 = vcombine.low %v1748_v26, %v1752_v24 }
 0x4eb   : > { %v1440_v54 = vpop.xlane.xlu0 %1439  ;;  %v6322_v57 = vcombine.low %v1749_v25, %v1753_v55 }
 0x4ec   : > { %v9019_v0 = vsub.f32 %v8953_v44, %v1467_v60  ;;  %v1468_v36 = vmul.f32 0.0078125, %v1440_v54  ;;  %1514 = vadd.xlane.f32.xlu1 %v1497_v35  ;;  %v1498_v56 = vmul.f32 %v9014_v30, %v9014_v30  ;;  %v6323_v60 = vcombine.high %v1749_v25, %v1753_v55  ;;  %v1769_v25 = vld [vmem:[#allocation11 + $0x128] sm:$0xff] }
 0x4ed   : > { %v1442_v4 = vpop.xlane.xlu1 %1441 }
 0x4ee   : > { %v9024_v41 = vsub.f32 %v8957_v50, %v1468_v36  ;;  %v1469_v37 = vmul.f32 0.0078125, %v1442_v4  ;;  %1516 = vadd.xlane.f32.xlu0 %v1498_v56  ;;  %v1499_v11 = vmul.f32 %v9019_v0, %v9019_v0  ;;  %v1760_v56 = vld [vmem:[#allocation11 + $0xe0] sm:$0xff]  ;;  %v1757_v4 = vld [vmem:[#allocation11 + $0xc8] sm:$0xff]  ;;  %2233 = vmatprep.subr.bf16.mxu1 %v6323_v60 }
 0x4ef   : > { %v1444_v14 = vpop.xlane.xlu0 %1443  ;;  %2234 = vmatpush1.bf16.msra.mxu1 %v6322_v57  ;;  %v1772_v60 = vld [vmem:[#allocation11 + $0x140] sm:$0xff] }
 0x4f0   : > { %v9029_v22 = vsub.f32 %v8961_v63, %v1469_v37  ;;  %v1470_v44 = vmul.f32 0.0078125, %v1444_v14  ;;  %1518 = vadd.xlane.f32.xlu1 %v1499_v11  ;;  %v1500_v42 = vmul.f32 %v9024_v41, %v9024_v41  ;;  %v1761_v14 = vld [vmem:[#allocation11 + $0xe8] sm:$0xff] }
 0x4f1   : > { %v1446_v13 = vpop.xlane.xlu1 %1445 }
 0x4f2   : > { %v9034_v49 = vsub.f32 %v8965_v27, %v1470_v44  ;;  %v1471_v50 = vmul.f32 0.0078125, %v1446_v13  ;;  %1520 = vadd.xlane.f32.xlu0 %v1500_v42  ;;  %v1501_v17 = vmul.f32 %v9029_v22, %v9029_v22 }
 0x4f3   : > { %v1448_v10 = vpop.xlane.xlu0 %1447 }
 0x4f4   : > { %v9039_v45 = vsub.f32 %v8969_v28, %v1471_v50  ;;  %v1472_v63 = vmul.f32 0.0078125, %v1448_v10  ;;  %1522 = vadd.xlane.f32.xlu1 %v1501_v17  ;;  %v1502_v19 = vmul.f32 %v9034_v49, %v9034_v49  ;;  %v6321_v28 = vcombine.high %v1748_v26, %v1752_v24 }
 0x4f5   : > { %v1450_v51 = vpop.xlane.xlu1 %1449  ;;  %v6330_v17 = vcombine.low %v1757_v4, %v1761_v14  ;;  %v6331_v10 = vcombine.high %v1757_v4, %v1761_v14 }
 0x4f6   : > { %v9044_v21 = vsub.f32 %v8973_v8, %v1472_v63  ;;  %v1473_v27 = vmul.f32 0.0078125, %v1450_v51  ;;  %1524 = vadd.xlane.f32.xlu0 %v1502_v19  ;;  %v1503_v46 = vmul.f32 %v9039_v45, %v9039_v45  ;;  %2120 = vmatprep.subr.bf16.mxu0 %v6321_v28  ;;  %v1764_v51 = vld [vmem:[#allocation11 + $0x100] sm:$0xff] }
 0x4f7   : > { %v1452_v31 = vpop.xlane.xlu0 %1451  ;;  %2121 = vmatpush1.bf16.msra.mxu0 %v6320_v7  ;;  %2235 = vmatprep.subr.bf16.mxu1 %v6331_v10 }
 0x4f8   : > { %v9049_v61 = vsub.f32 %v8977_v20, %v1473_v27  ;;  %v1474_v48 = vmul.f32 0.0078125, %v1452_v31  ;;  %1526 = vadd.xlane.f32.xlu1 %v1503_v46  ;;  %v1504_v8 = vmul.f32 %v9044_v21, %v9044_v21  ;;  %v1756_v20 = vld [vmem:[#allocation11 + $0xc0] sm:$0xff]  ;;  %v1765_v46 = vld [vmem:[#allocation11 + $0x108] sm:$0xff]  ;;  %2236 = vmatpush1.bf16.msra.mxu1 %v6330_v17 }
 0x4f9   : > { %v1454_v29 = vpop.xlane.xlu1 %1453  ;;  %v6329_v11 = vcombine.high %v1756_v20, %v1760_v56  ;;  %v6328_v13 = vcombine.low %v1756_v20, %v1760_v56  ;;  %v1768_v27 = vld [vmem:[#allocation11 + $0x120] sm:$0xff]  ;;  %v6339_v7 = vcombine.high %v1765_v46, %v1769_v25  ;;  %v1777_v56 = vld [vmem:[#allocation11 + $0x168] sm:$0xff] }
 0x4fa   : > { %v9054_v35 = vsub.f32 %v8981_v33, %v1474_v48  ;;  %v1475_v54 = vmul.f32 0.0078125, %v1454_v29  ;;  %1528 = vadd.xlane.f32.xlu0 %v1504_v8  ;;  %v1505_v36 = vmul.f32 %v9049_v61, %v9049_v61  ;;  %v6337_v24 = vcombine.high %v1764_v51, %v1768_v27  ;;  %v1785_v17 = vld [vmem:[#allocation11 + $0x1a8] sm:$0xff] }
 0x4fb   : > { %v1456_v37 = vpop.xlane.xlu0 %1455  ;;  %2122 = vmatprep.subr.bf16.mxu0 %v6329_v11  ;;  %v6336_v55 = vcombine.low %v1764_v51, %v1768_v27  ;;  %v6338_v8 = vcombine.low %v1765_v46, %v1769_v25  ;;  %2237 = vmatprep.subr.bf16.mxu1 %v6339_v7  ;;  %v1788_v51 = vld [vmem:[#allocation11 + $0x1c0] sm:$0xff]  ;;  %v1789_v46 = vld [vmem:[#allocation11 + $0x1c8] sm:$0xff] }
 0x4fc   : > { %v9059_v44 = vsub.f32 %v8985_v34, %v1475_v54  ;;  %v1476_v42 = vmul.f32 0.0078125, %v1456_v37  ;;  %1530 = vadd.xlane.f32.xlu1 %v1505_v36  ;;  %v1506_v33 = vmul.f32 %v9054_v35, %v9054_v35  ;;  %2123 = vmatpush1.bf16.msra.mxu0 %v6328_v13  ;;  %v1776_v54 = vld [vmem:[#allocation11 + $0x160] sm:$0xff]  ;;  %v1773_v36 = vld [vmem:[#allocation11 + $0x148] sm:$0xff] }
 0x4fd   : > { %v1458_v50 = vpop.xlane.xlu1 %1457  ;;  %2124 = vmatprep.subr.bf16.mxu0 %v6337_v24  ;;  %v6345_v20 = vcombine.high %v1772_v60, %v1776_v54  ;;  %2238 = vmatpush1.bf16.msra.mxu1 %v6338_v8  ;;  %v6344_v37 = vcombine.low %v1772_v60, %v1776_v54  ;;  %v6346_v11 = vcombine.low %v1773_v36, %v1777_v56  ;;  %v1784_v13 = vld [vmem:[#allocation11 + $0x1a0] sm:$0xff]  ;;  %v1793_v24 = vld [vmem:[#allocation11 + $0x1e8] sm:$0xff]  ;;  %v9089_v8 = vld [vmem:[#allocation11 + $0x30] sm:$0xff] }
 0x4fe   : > { %v9064_v63 = vsub.f32 %v8989_v5, %v1476_v42  ;;  %v1477_v19 = vmul.f32 0.0078125, %v1458_v50  ;;  %1532 = vadd.xlane.f32.xlu0 %v1506_v33  ;;  %v1507_v34 = vmul.f32 %v9059_v44, %v9059_v44  ;;  %v6347_v14 = vcombine.high %v1773_v36, %v1777_v56  ;;  %v1780_v33 = vld [vmem:[#allocation11 + $0x180] sm:$0xff]  ;;  %v1781_v50 = vld [vmem:[#allocation11 + $0x188] sm:$0xff]  ;;  %v9097_v60 = vld [vmem:[#allocation11 + $0x38] sm:$0xff] }
 0x4ff   : > { %v1460_v26 = vpop.xlane.xlu0 %1459  ;;  %v6352_v10 = vcombine.low %v1780_v33, %v1784_v13  ;;  %v1792_v27 = vld [vmem:[#allocation11 + $0x1e0] sm:$0xff] }
 0x500   : > { %v9069_v31 = vsub.f32 %v8993_v9, %v1477_v19  ;;  %v1478_v28 = vmul.f32 0.0078125, %v1460_v26  ;;  %1534 = vadd.xlane.f32.xlu1 %v1507_v34  ;;  %v1508_v5 = vmul.f32 %v9064_v63, %v9064_v63  ;;  %2125 = vmatpush1.bf16.msra.mxu0 %v6336_v55  ;;  %v6354_v19 = vcombine.low %v1781_v50, %v1785_v17 }
 0x501   : > { %v1462_v48 = vpop.xlane.xlu1 %1461  ;;  %2126 = vmatprep.subr.bf16.mxu0 %v6345_v20  ;;  %2239 = vmatprep.subr.bf16.mxu1 %v6347_v14  ;;  %v6355_v34 = vcombine.high %v1781_v50, %v1785_v17  ;;  %v6361_v26 = vcombine.high %v1788_v51, %v1792_v27  ;;  %v6360_v25 = vcombine.low %v1788_v51, %v1792_v27  ;;  %v8144_v55 = vmov 0  }
 0x502   : > { %v9074_v29 = vsub.f32 %v8997_v39, %v1478_v28  ;;  %v1479_v57 = vmul.f32 0.0078125, %v1462_v48  ;;  %1536 = vadd.xlane.f32.xlu0 %v1508_v5  ;;  %v1509_v9 = vmul.f32 %v9069_v31, %v9069_v31  ;;  %2240 = vmatpush1.bf16.msra.mxu1 %v6346_v11  ;;  %v6362_v28 = vcombine.low %v1789_v46, %v1793_v24  ;;  %v9087_v48 = vld [vmem:[#allocation11 + $0x10] sm:$0xff] }
 0x503   : > { %2241 = vmatprep.subr.bf16.mxu1 %v6355_v34  ;;  %v6363_v5 = vcombine.high %v1789_v46, %v1793_v24  ;;  %2148 = vmatprep.mubr.bf16.mxu0 %v8144_v55  ;;  %v6308_v7 = vcombine.low %v9087_v48, %v9089_v8 }
 0x504   : > { %v9079_v4 = vsub.f32 %v9001_v40, %v1479_v57  ;;  %1538 = vadd.xlane.f32.xlu1 %v1509_v9  ;;  %v1510_v39 = vmul.f32 %v9074_v29, %v9074_v29  ;;  %2127 = vmatpush1.bf16.msra.mxu0 %v6344_v37  ;;  %v6353_v40 = vcombine.high %v1780_v33, %v1784_v13  ;;  %v9095_v9 = vld [vmem:[#allocation11 + $0x18] sm:$0xff] }
 0x505   : > { %2261 = vmatprep.mubr.bf16.mxu1 %v8144_v55  ;;  %v6309_v57 = vcombine.high %v9087_v48, %v9089_v8  ;;  %v6310_v54 = vcombine.low %v9095_v9, %v9097_v60  ;;  %v6311_v36 = vcombine.high %v9095_v9, %v9097_v60 }
 0x506   : > { %1540 = vadd.xlane.f32.xlu0 %v1510_v39  ;;  %v1511_v42 = vmul.f32 %v9079_v4, %v9079_v4  ;;  %2128 = vmatprep.subr.bf16.mxu0 %v6353_v40 }
 0x507   : > { %2242 = vmatpush1.bf16.msra.mxu1 %v6354_v19 }
 0x508   : > { %1542 = vadd.xlane.f32.xlu1 %v1511_v42  ;;  %2129 = vmatpush1.bf16.msra.mxu0 %v6352_v10 }
 0x509   : > { %2130 = vmatprep.subr.bf16.mxu0 %v6361_v26  ;;  %2243 = vmatprep.subr.bf16.mxu1 %v6363_v5 }
 0x50b   : > { %2244 = vmatpush1.bf16.msra.mxu1 %v6362_v28  ;;  %v9106_v28 = vld [vmem:[%s10603_s5] ss:$0 sm:$0xff] }
 0x50c   : > { %2131 = vmatpush1.bf16.msra.mxu0 %v6360_v25  ;;  %2455 = vmatprep.subr.bf16.mxu1 %v6311_v36 }
 0x50d   : > { %2342 = vmatprep.subr.bf16.mxu0 %v6309_v57 }
 0x577   : > { %v1513_v20 = vpop.xlane.xlu0 %1512 }
 0x578   : > { %v1544_v56 = vmul.f32 0.0078125, %v1513_v20 }
 0x579   : > { %v1515_v39 = vpop.xlane.xlu1 %1514 }
 0x57a   : > { %v1560_v37 = vadd.f32 1e-05, %v1544_v56  ;;  %v1545_v11 = vmul.f32 0.0078125, %v1515_v39 }
 0x57b   : > { %v1517_v14 = vpop.xlane.xlu0 %1516 }
 0x57c   : > { %7702 = vrsqrt.f32 %v1560_v37  ;;  %v1561_v42 = vadd.f32 1e-05, %v1545_v11  ;;  %v1546_v33 = vmul.f32 0.0078125, %v1517_v14  ;;  %v9114_v14 = vld [vmem:[%s10765_s1] ss:$0 sm:$0xff]  ;;  %s6014_s1 = scalar_lea.sflag [#allocation18], %s8588_s13 }
 0x57d   : > { %v1519_v13 = vpop.xlane.xlu1 %1518 }
 0x57e   : > { %7704 = vrsqrt.f32 %v1561_v42  ;;  %v1562_v50 = vadd.f32 1e-05, %v1546_v33  ;;  %v1547_v40 = vmul.f32 0.0078125, %v1519_v13 }
 0x57f   : > { %v1521_v17 = vpop.xlane.xlu0 %1520 }
 0x580   : > { %7706 = vrsqrt.f32 %v1562_v50  ;;  %v1563_v10 = vadd.f32 1e-05, %v1547_v40  ;;  %v1548_v19 = vmul.f32 0.0078125, %v1521_v17 }
 0x581   : > { %v1523_v34 = vpop.xlane.xlu1 %1522 }
 0x582   : > { %7708 = vrsqrt.f32 %v1563_v10  ;;  %v1549_v51 = vmul.f32 0.0078125, %v1523_v34  ;;  %v1564_v27 = vadd.f32 1e-05, %v1548_v19  ;;  %v1746_v34 = vld [vmem:[#allocation11 + $0x70] sm:$0xff] }
 0x583   : > { %v1525_v26 = vpop.xlane.xlu0 %1524 }
 0x584   : > { %v1565_v46 = vadd.f32 1e-05, %v1549_v51  ;;  %v1550_v20 = vmul.f32 0.0078125, %v1525_v26  ;;  %v1743_v51 = vld [vmem:[#allocation11 + $0x58] sm:$0xff] }
 0x585   : > { %v1527_v24 = vpop.xlane.xlu1 %1526 }
 0x586   : > { %v7703_v25 = vpop.eup %7702  ;;  %7710 = vrsqrt.f32 %v1565_v46  ;;  %v1551_v5 = vmul.f32 0.0078125, %v1527_v24  ;;  %v1566_v50 = vadd.f32 1e-05, %v1550_v20  ;;  %v9130_v24 = vld [vmem:[#allocation11 + $0x90] sm:$0xff]  ;;  %v1751_v20 = vld [vmem:[#allocation11 + $0x98] sm:$0xff] }
 0x587   : > { %v1592_v57 = vmul.f32 %v7703_v25, %v9006_v53  ;;  %7712 = vrsqrt.f32 %v1564_v27  ;;  %v1742_v53 = vld [vmem:[#allocation11 + $0x50] sm:$0xff]  ;;  %v1529_v10 = vpop.xlane.xlu0 %1528  ;;  %v1747_v27 = vld [vmem:[#allocation11 + $0x78] sm:$0xff] }
 0x588   : > { %v7705_v36 = vpop.eup %7704  ;;  %v1567_v11 = vadd.f32 1e-05, %v1551_v5  ;;  %v1552_v5 = vmul.f32 0.0078125, %v1529_v10  ;;  %v1763_v10 = vld [vmem:[#allocation11 + $0xf8] sm:$0xff] }
 0x589   : > { %v1614_v56 = vmul.f32 %v9106_v28, %v1592_v57  ;;  %v1593_v39 = vmul.f32 %v7705_v36, %v9009_v3  ;;  %v1531_v33 = vpop.xlane.xlu1 %1530  ;;  %v6317_v57 = vcombine.high %v1742_v53, %v1746_v34  ;;  %v6319_v36 = vcombine.high %v1743_v51, %v1747_v27 }
 0x58a   : > { %v7707_v37 = vpop.eup %7706  ;;  %7714 = vrsqrt.f32 %v1567_v11  ;;  %v1553_v46 = vmul.f32 0.0078125, %v1531_v33  ;;  %v6318_v33 = vcombine.low %v1743_v51, %v1747_v27  ;;  %v1568_v8 = vadd.f32 1e-05, %v1552_v5 }
 0x58b   : > { %v1615_v42 = vmul.f32 %v9106_v28, %v1593_v39  ;;  %v1594_v40 = vmul.f32 %v7707_v37, %v9014_v30  ;;  %v9120_v3 = vadd.f32 %v9114_v14, %v1614_v56  ;;  %7716 = vrsqrt.f32 %v1566_v50  ;;  %v1755_v56 = vld [vmem:[#allocation11 + $0xb8] sm:$0xff]  ;;  %v1533_v60 = vpop.xlane.xlu0 %1532 }
 0x58c   : > { %v7709_v13 = vpop.eup %7708  ;;  %v1569_v11 = vadd.f32 1e-05, %v1553_v46  ;;  %v6327_v48 = vcombine.high %v1751_v20, %v1755_v56  ;;  %v6326_v46 = vcombine.low %v1751_v20, %v1755_v56 }
 0x58d   : > { %v1595_v17 = vmul.f32 %v7709_v13, %v9019_v0  ;;  %10766 = vst [vmem:[#allocation34_spill] sm:$0xff] %v9120_v3  ;;  %v9123_v19 = vadd.f32 %v9114_v14, %v1615_v42  ;;  %v9132_v0 = vld [vmem:[#allocation11 + $0xb0] sm:$0xff]  ;;  %v1616_v39 = vmul.f32 %v9106_v28, %v1594_v40  ;;  %v6316_v42 = vcombine.low %v1742_v53, %v1746_v34  ;;  %v1759_v53 = vld [vmem:[#allocation11 + $0xd8] sm:$0xff] }
 0x58e   : > { %v6325_v13 = vcombine.high %v9130_v24, %v9132_v0  ;;  %7718 = vrsqrt.f32 %v1569_v11  ;;  %v6324_v51 = vcombine.low %v9130_v24, %v9132_v0  ;;  %v1770_v0 = vld [vmem:[#allocation11 + $0x130] sm:$0xff] }
 0x58f   : > { %10767 = vst [vmem:[#allocation35_spill] sm:$0xff] %v9123_v19  ;;  %v9127_v26 = vpack.c.bf16 %v9123_v19, %v9120_v3  ;;  %v1617_v30 = vmul.f32 %v9106_v28, %v1595_v17  ;;  %v1535_v17 = vpop.xlane.xlu1 %1534  ;;  %7720 = vrsqrt.f32 %v1568_v8 }
 0x590   : > { %v7711_v25 = vpop.eup %7710  ;;  %v1555_v34 = vmul.f32 0.0078125, %v1535_v17 }
 0x591   : > { %2149 = vmatmul.mubr.bf16.vlgmr.msra.gmra.mrb[32].mxu0 %v9127_v26  ;;  %2262 = vmatmul.mubr.bf16.vlgmr.msra.gmra.mrb[16].mxu1 %v9127_v26  ;;  %v7713_v37 = vpop.eup %7712  ;;  %v1597_v50 = vmul.f32 %v7711_v25, %v9029_v22  ;;  %v9149_v40 = vadd.f32 %v9114_v14, %v1617_v30  ;;  %v1762_v22 = vld [vmem:[#allocation11 + $0xf0] sm:$0xff]  ;;  %v1554_v25 = vmul.f32 0.0078125, %v1533_v60 }
 0x592   : > { %2343 = vmatpush1.bf16.msra.mxu0 %v6308_v7  ;;  %2456 = vmatpush1.bf16.msra.mxu1 %v6310_v54  ;;  %v1758_v7 = vld [vmem:[#allocation11 + $0xd0] sm:$0xff]  ;;  %v1596_v9 = vmul.f32 %v7713_v37, %v9024_v41  ;;  %v9153_v54 = vadd.f32 %v9114_v14, %v1616_v39  ;;  %v1767_v39 = vld [vmem:[#allocation11 + $0x118] sm:$0xff] }
 0x593   : > { %2158 = vmatprep.mubr.bf16.mxu0 %v8144_v55  ;;  %2271 = vmatprep.mubr.bf16.mxu1 %v8144_v55  ;;  %10768 = vst [vmem:[#allocation36_spill] sm:$0xff] %v9149_v40  ;;  %v1619_v41 = vmul.f32 %v9106_v28, %v1597_v50  ;;  %v6333_v5 = vcombine.high %v1758_v7, %v1762_v22  ;;  %v1771_v37 = vld [vmem:[#allocation11 + $0x138] sm:$0xff]  ;;  %v1570_v17 = vadd.f32 1e-05, %v1554_v25 }
 0x594   : > { %2344 = vmatprep.subr.bf16.mxu0 %v6317_v57  ;;  %2457 = vmatprep.subr.bf16.mxu1 %v6319_v36  ;;  %10769 = vst [vmem:[#allocation37_spill] sm:$0xff] %v9153_v54  ;;  %v9159_v27 = vpack.c.bf16 %v9149_v40, %v9153_v54  ;;  %v7715_v30 = vpop.eup %7714  ;;  %v6335_v57 = vcombine.high %v1759_v53, %v1763_v10  ;;  %v1766_v36 = vld [vmem:[#allocation11 + $0x110] sm:$0xff] }
 0x595   : > { %v1618_v24 = vmul.f32 %v9106_v28, %v1596_v9  ;;  %v7717_v11 = vpop.eup %7716  ;;  %v6332_v20 = vcombine.low %v1758_v7, %v1762_v22  ;;  %v1599_v56 = vmul.f32 %v7715_v30, %v9039_v45  ;;  %v6334_v50 = vcombine.low %v1759_v53, %v1763_v10  ;;  %v1774_v9 = vld [vmem:[#allocation11 + $0x150] sm:$0xff]  ;;  %v1775_v22 = vld [vmem:[#allocation11 + $0x158] sm:$0xff] }
 0x596   : > { %2345 = vmatpush1.bf16.msra.mxu0 %v6316_v42  ;;  %2458 = vmatpush1.bf16.msra.mxu1 %v6318_v33  ;;  %v1571_v42 = vadd.f32 1e-05, %v1555_v34  ;;  %v1539_v33 = vpop.xlane.xlu1 %1538  ;;  %v6343_v8 = vcombine.high %v1767_v39, %v1771_v37  ;;  %v1598_v60 = vmul.f32 %v7717_v11, %v9034_v49  ;;  %v1537_v34 = vpop.xlane.xlu0 %1536  ;;  %v1778_v45 = vld [vmem:[#allocation11 + $0x170] sm:$0xff]  ;;  %v1779_v30 = vld [vmem:[#allocation11 + $0x178] sm:$0xff] }
 0x597   : > { %2346 = vmatprep.subr.bf16.mxu0 %v6325_v13  ;;  %2459 = vmatprep.subr.bf16.mxu1 %v6327_v48  ;;  %v9169_v13 = vadd.f32 %v9114_v14, %v1619_v41  ;;  %v6341_v48 = vcombine.high %v1766_v36, %v1770_v0  ;;  %v9173_v7 = vadd.f32 %v9114_v14, %v1618_v24  ;;  %v1557_v41 = vmul.f32 0.0078125, %v1539_v33  ;;  %v1782_v24 = vld [vmem:[#allocation11 + $0x190] sm:$0xff]  ;;  %v1783_v11 = vld [vmem:[#allocation11 + $0x198] sm:$0xff] }
 0x598   : > { %7722 = vrsqrt.f32 %v1571_v42  ;;  %v1621_v10 = vmul.f32 %v9106_v28, %v1599_v56  ;;  %v7719_v49 = vpop.eup %7718  ;;  %v1556_v25 = vmul.f32 0.0078125, %v1537_v34  ;;  %v1787_v42 = vld [vmem:[#allocation11 + $0x1b8] sm:$0xff]  ;;  %v1790_v34 = vld [vmem:[#allocation11 + $0x1d0] sm:$0xff] }
 0x599   : > { %2159 = vmatmul.mubr.bf16.gmra.mrb[36].mxu0 %v9159_v27  ;;  %2272 = vmatmul.mubr.bf16.gmra.mrb[20].mxu1 %v9159_v27  ;;  %10770 = vst [vmem:[#allocation38_spill] sm:$0xff] %v9169_v13  ;;  %10771 = vst [vmem:[#allocation39_spill] sm:$0xff] %v9173_v7  ;;  %v9177_v53 = vpack.c.bf16 %v9169_v13, %v9173_v7  ;;  %7724 = vrsqrt.f32 %v1570_v17  ;;  %v1573_v56 = vadd.f32 1e-05, %v1557_v41 }
 0x59a   : > { %2168 = vmatprep.mubr.bf16.mxu0 %v8144_v55  ;;  %2281 = vmatprep.mubr.bf16.mxu1 %v8144_v55  ;;  %v1543_v33 = vpop.xlane.xlu1 %1542  ;;  %v6350_v17 = vcombine.low %v1775_v22, %v1779_v30  ;;  %v1541_v13 = vpop.xlane.xlu0 %1540 }
 0x59b   : > { %2347 = vmatpush1.bf16.msra.mxu0 %v6324_v51  ;;  %2460 = vmatpush1.bf16.msra.mxu1 %v6326_v46  ;;  %v6340_v51 = vcombine.low %v1766_v36, %v1770_v0  ;;  %v6342_v46 = vcombine.low %v1767_v39, %v1771_v37  ;;  %v1620_v36 = vmul.f32 %v9106_v28, %v1598_v60  ;;  %v1786_v0 = vld [vmem:[#allocation11 + $0x1b0] sm:$0xff]  ;;  %7726 = vrsqrt.f32 %v1573_v56 }
 0x59c   : > { %2348 = vmatprep.subr.bf16.mxu0 %v6333_v5  ;;  %2461 = vmatprep.subr.bf16.mxu1 %v6335_v57  ;;  %v6349_v5 = vcombine.high %v1774_v9, %v1778_v45  ;;  %v6351_v57 = vcombine.high %v1775_v22, %v1779_v30  ;;  %v6348_v39 = vcombine.low %v1774_v9, %v1778_v45  ;;  %v1791_v45 = vld [vmem:[#allocation11 + $0x1d8] sm:$0xff] }
 0x59d   : > { %v1601_v37 = vmul.f32 %v7719_v49, %v9049_v61  ;;  %v6359_v60 = vcombine.high %v1783_v11, %v1787_v42  ;;  %v9191_v9 = vadd.f32 %v9114_v14, %v1620_v36  ;;  %v1794_v61 = vld [vmem:[#allocation11 + $0x1f0] sm:$0xff]  ;;  %v1795_v49 = vld [vmem:[#allocation11 + $0x1f8] sm:$0xff]  ;;  %v9198_v36 = vld [vmem:[#allocation10] sm:$0xff] }
 0x59e   : > { %v6364_v56 = vcombine.low %v1790_v34, %v1794_v61 }
 0x59f   : > { %2349 = vmatpush1.bf16.msra.mxu0 %v6332_v20  ;;  %2462 = vmatpush1.bf16.msra.mxu1 %v6334_v50  ;;  %v7721_v20 = vpop.eup %7720  ;;  %v9187_v50 = vadd.f32 %v9114_v14, %v1621_v10  ;;  %10773 = vst [vmem:[#allocation41_spill] sm:$0xff] %v9191_v9  ;;  %v1559_v10 = vmul.f32 0.0078125, %v1543_v33  ;;  %v1623_v30 = vmul.f32 %v9106_v28, %v1601_v37 }
 0x5a0   : > { %2350 = vmatprep.subr.bf16.mxu0 %v6341_v48  ;;  %2463 = vmatprep.subr.bf16.mxu1 %v6343_v8  ;;  %v1572_v48 = vadd.f32 1e-05, %v1556_v25  ;;  %v6357_v8 = vcombine.high %v1782_v24, %v1786_v0  ;;  %v1600_v41 = vmul.f32 %v7721_v20, %v9044_v21  ;;  %v1558_v25 = vmul.f32 0.0078125, %v1541_v13  ;;  %v9205_v20 = vld [vmem:[#allocation10 + $0x8] sm:$0xff] }
 0x5a1   : > { %2169 = vmatmul.mubr.bf16.gmra.mrb[40].mxu0 %v9177_v53  ;;  %2282 = vmatmul.mubr.bf16.gmra.mrb[24].mxu1 %v9177_v53  ;;  %10772 = vst [vmem:[#allocation40_spill] sm:$0xff] %v9187_v50  ;;  %v9195_v22 = vpack.c.bf16 %v9187_v50, %v9191_v9  ;;  %v1575_v13 = vadd.f32 1e-05, %v1559_v10  ;;  %v9213_v37 = vadd.f32 %v9114_v14, %v1623_v30 }
 0x5a2   : > { %2178 = vmatprep.mubr.bf16.mxu0 %v8144_v55  ;;  %2291 = vmatprep.mubr.bf16.mxu1 %v8144_v55  ;;  %v7723_v21 = vpop.eup %7722  ;;  %7728 = vrsqrt.f32 %v1572_v48  ;;  %v6366_v33 = vcombine.low %v1791_v45, %v1795_v49 }
 0x5a3   : > { %2351 = vmatpush1.bf16.msra.mxu0 %v6340_v51  ;;  %2464 = vmatpush1.bf16.msra.mxu1 %v6342_v46  ;;  %v6356_v51 = vcombine.low %v1782_v24, %v1786_v0  ;;  %v6358_v46 = vcombine.low %v1783_v11, %v1787_v42  ;;  %v1622_v24 = vmul.f32 %v9106_v28, %v1600_v41  ;;  %v9203_v0 = vld [vmem:[#allocation10 + $0x20] sm:$0xff]  ;;  %v9207_v11 = vld [vmem:[#allocation10 + $0x28] sm:$0xff]  ;;  %v7725_v42 = vpop.eup %7724  ;;  %7730 = vrsqrt.f32 %v1575_v13 }
 0x5a4   : > { %2352 = vmatprep.subr.bf16.mxu0 %v6349_v5  ;;  %2465 = vmatprep.subr.bf16.mxu1 %v6351_v57  ;;  %v6365_v5 = vcombine.high %v1790_v34, %v1794_v61  ;;  %v6367_v57 = vcombine.high %v1791_v45, %v1795_v49  ;;  %10774 = vst [vmem:[#allocation42_spill] sm:$0xff] %v9213_v37 }
 0x5a5   : > { %v6369_v48 = vcombine.high %v9198_v36, %v9203_v0  ;;  %v9221_v34 = vadd.f32 %v9114_v14, %v1622_v24  ;;  %v7727_v61 = vpop.eup %7726 }
 0x5a6   : > { %v1605_v49 = vmul.f32 %v7727_v61, %v9069_v31 }
 0x5a7   : > { %2353 = vmatpush1.bf16.msra.mxu0 %v6348_v39  ;;  %2466 = vmatpush1.bf16.msra.mxu1 %v6350_v17  ;;  %v1603_v39 = vmul.f32 %v7723_v21, %v9059_v44  ;;  %v1574_v17 = vadd.f32 1e-05, %v1558_v25  ;;  %10775 = vst [vmem:[#allocation43_spill] sm:$0xff] %v9221_v34  ;;  %v9225_v44 = vpack.c.bf16 %v9213_v37, %v9221_v34 }
 0x5a8   : > { %2354 = vmatprep.subr.bf16.mxu0 %v6357_v8  ;;  %2467 = vmatprep.subr.bf16.mxu1 %v6359_v60  ;;  %v6371_v8 = vcombine.high %v9205_v20, %v9207_v11  ;;  %v1602_v60 = vmul.f32 %v7725_v42, %v9054_v35  ;;  %v1627_v21 = vmul.f32 %v9106_v28, %v1605_v49  ;;  %v1677_v49 = vld [vmem:[#allocation10 + $0x88] sm:$0xff] }
 0x5a9   : > { %2179 = vmatmul.mubr.bf16.gmra.mrb[44].mxu0 %v9195_v22  ;;  %2292 = vmatmul.mubr.bf16.gmra.mrb[28].mxu1 %v9195_v22  ;;  %v1625_v41 = vmul.f32 %v9106_v28, %v1603_v39  ;;  %7732 = vrsqrt.f32 %v1574_v17  ;;  %v1672_v17 = vld [vmem:[#allocation10 + $0x60] sm:$0xff] }
 0x5aa   : > { %2188 = vmatprep.mubr.bf16.mxu0 %v8144_v55  ;;  %2301 = vmatprep.mubr.bf16.mxu1 %v8144_v55  ;;  %v1624_v35 = vmul.f32 %v9106_v28, %v1602_v60  ;;  %v6370_v60 = vcombine.low %v9205_v20, %v9207_v11  ;;  %v1684_v20 = vld [vmem:[#allocation10 + $0xc0] sm:$0xff] }
 0x5ab   : > { %2355 = vmatpush1.bf16.msra.mxu0 %v6356_v51  ;;  %2468 = vmatpush1.bf16.msra.mxu1 %v6358_v46  ;;  %v9235_v10 = vadd.f32 %v9114_v14, %v1625_v41  ;;  %v1676_v41 = vld [vmem:[#allocation10 + $0x80] sm:$0xff] }
 0x5ac   : > { %2356 = vmatprep.subr.bf16.mxu0 %v6365_v5  ;;  %2469 = vmatprep.subr.bf16.mxu1 %v6367_v57  ;;  %v7729_v45 = vpop.eup %7728  ;;  %v9239_v30 = vadd.f32 %v9114_v14, %v1624_v35  ;;  %v9253_v57 = vadd.f32 %v9114_v14, %v1627_v21  ;;  %v1688_v11 = vld [vmem:[#allocation10 + $0xe0] sm:$0xff] }
 0x5ad   : > { %10776 = vst [vmem:[#allocation44_spill] sm:$0xff] %v9235_v10  ;;  %v1604_v51 = vmul.f32 %v7729_v45, %v9064_v63  ;;  %v7731_v25 = vpop.eup %7730  ;;  %v1680_v45 = vld [vmem:[#allocation10 + $0xa0] sm:$0xff] }
 0x5ae   : > { %10777 = vst [vmem:[#allocation45_spill] sm:$0xff] %v9239_v30  ;;  %v9243_v46 = vpack.c.bf16 %v9235_v10, %v9239_v30  ;;  %v1607_v63 = vmul.f32 %v7731_v25, %v9079_v4  ;;  %10778 = vst [vmem:[#allocation46_spill] sm:$0xff] %v9253_v57 }
 0x5af   : > { %2357 = vmatpush1.bf16.msra.mxu0 %v6364_v56  ;;  %2470 = vmatpush1.bf16.msra.mxu1 %v6366_v33  ;;  %v1626_v31 = vmul.f32 %v9106_v28, %v1604_v51  ;;  %v1681_v51 = vld [vmem:[#allocation10 + $0xa8] sm:$0xff] }
 0x5b0   : > { %2888 = vmatprep.subr.bf16.mxu0 %v6369_v48  ;;  %3001 = vmatprep.subr.bf16.mxu1 %v6371_v8  ;;  %v1629_v56 = vmul.f32 %v9106_v28, %v1607_v63  ;;  %v1669_v48 = vld [vmem:[#allocation10 + $0x48] sm:$0xff]  ;;  %v6384_v63 = vcombine.low %v1676_v41, %v1680_v45 }
 0x5b1   : > { %2189 = vmatmul.mubr.bf16.gmra.mrb[48].mxu0 %v9225_v44  ;;  %2302 = vmatmul.mubr.bf16.gmra.mrb[32].mxu1 %v9225_v44  ;;  %v9257_v42 = vadd.f32 %v9114_v14, %v1626_v31  ;;  %v1673_v8 = vld [vmem:[#allocation10 + $0x68] sm:$0xff] }
 0x5b2   : > { %2198 = vmatprep.mubr.bf16.mxu0 %v8144_v55  ;;  %2311 = vmatprep.mubr.bf16.mxu1 %v8144_v55  ;;  %v6379_v35 = vcombine.high %v1669_v48, %v1673_v8  ;;  %v6378_v25 = vcombine.low %v1669_v48, %v1673_v8  ;;  %v1685_v31 = vld [vmem:[#allocation10 + $0xc8] sm:$0xff]  ;;  %v6392_v8 = vcombine.low %v1684_v20, %v1688_v11 }
 0x5b3   : > { %v7733_v5 = vpop.eup %7732  ;;  %10779 = vst [vmem:[#allocation47_spill] sm:$0xff] %v9257_v42  ;;  %v9261_v13 = vpack.c.bf16 %v9253_v57, %v9257_v42  ;;  %v1697_v48 = vld [vmem:[#allocation10 + $0x128] sm:$0xff] }
 0x5b4   : > { %v1606_v24 = vmul.f32 %v7733_v5, %v9074_v29  ;;  %v9270_v29 = vadd.f32 %v9114_v14, %v1629_v56  ;;  %v1689_v5 = vld [vmem:[#allocation10 + $0xe8] sm:$0xff] }
 0x5b5   : > { %v6395_v56 = vcombine.high %v1685_v31, %v1689_v5 }
 0x5b6   : > { %v1628_v4 = vmul.f32 %v9106_v28, %v1606_v24  ;;  %10780 = vst [vmem:[#allocation48_spill] sm:$0xff] %v9270_v29  ;;  %v1668_v28 = vld [vmem:[#allocation10 + $0x40] sm:$0xff]  ;;  %v6393_v24 = vcombine.high %v1684_v20, %v1688_v11  ;;  %v1709_v20 = vld [vmem:[#allocation10 + $0x188] sm:$0xff] }
 0x5b7   : > { %v6377_v61 = vcombine.high %v1668_v28, %v1672_v17  ;;  %v6376_v21 = vcombine.low %v1668_v28, %v1672_v17  ;;  %v1696_v28 = vld [vmem:[#allocation10 + $0x120] sm:$0xff]  ;;  %v1693_v17 = vld [vmem:[#allocation10 + $0x108] sm:$0xff] }
 0x5b8   : > { %v9273_v39 = vadd.f32 %v9114_v14, %v1628_v4  ;;  %v6368_v14 = vcombine.low %v9198_v36, %v9203_v0  ;;  %v6385_v36 = vcombine.high %v1676_v41, %v1680_v45  ;;  %v6387_v0 = vcombine.high %v1677_v49, %v1681_v51  ;;  %v1692_v4 = vld [vmem:[#allocation10 + $0x100] sm:$0xff]  ;;  %v1701_v45 = vld [vmem:[#allocation10 + $0x148] sm:$0xff] }
 0x5b9   : > { %2199 = vmatmul.mubr.bf16.gmra.mrb[52].mxu0 %v9243_v46  ;;  %2312 = vmatmul.mubr.bf16.gmra.mrb[36].mxu1 %v9243_v46  ;;  %v6403_v41 = vcombine.high %v1693_v17, %v1697_v48  ;;  %v1713_v11 = vld [vmem:[#allocation10 + $0x1a8] sm:$0xff] }
 0x5ba   : > { %2208 = vmatprep.mubr.bf16.mxu0 %v8144_v55  ;;  %2321 = vmatprep.mubr.bf16.mxu1 %v8144_v55  ;;  %10781 = vst [vmem:[#allocation49_spill] sm:$0xff] %v9273_v39  ;;  %v9277_v33 = vpack.c.bf16 %v9270_v29, %v9273_v39 }
 0x5c1   : > { %2209 = vmatmul.mubr.bf16.gmra.mrb[56].mxu0 %v9261_v13  ;;  %2322 = vmatmul.mubr.bf16.gmra.mrb[40].mxu1 %v9261_v13 }
 0x5c2   : > { %2218 = vmatprep.mubr.bf16.mxu0 %v8144_v55  ;;  %2331 = vmatprep.mubr.bf16.mxu1 %v8144_v55 }
 0x5c9   : > { %2219 = vmatmul.mubr.bf16.gmra.mrb[60].mxu0 %v9277_v33  ;;  %2332 = vmatmul.mubr.bf16.gmra.mrb[44].mxu1 %v9277_v33 }
 0x5ca   : > { %2374 = vmatprep.mubr.bf16.mxu0 %v8144_v55  ;;  %2487 = vmatprep.mubr.bf16.mxu1 %v8144_v55 }
 0x5d1   : > { %2375 = vmatmul.mubr.bf16.vlgmr.msra.gmra.mrb[64].mxu0 %v9127_v26  ;;  %2488 = vmatmul.mubr.bf16.vlgmr.msra.gmra.mrb[48].mxu1 %v9127_v26  ;;  %v6386_v26 = vcombine.low %v1677_v49, %v1681_v51  ;;  %v1705_v49 = vld [vmem:[#allocation10 + $0x168] sm:$0xff]  ;;  %v6402_v51 = vcombine.low %v1693_v17, %v1697_v48  ;;  %v6418_v17 = vcombine.low %v1709_v20, %v1713_v11 }
 0x5d2   : > { %2889 = vmatpush1.bf16.msra.mxu0 %v6368_v14  ;;  %3002 = vmatpush1.bf16.msra.mxu1 %v6370_v60  ;;  %v6394_v14 = vcombine.low %v1685_v31, %v1689_v5  ;;  %v6401_v60 = vcombine.high %v1692_v4, %v1696_v28  ;;  %v6410_v5 = vcombine.low %v1701_v45, %v1705_v49 }
 0x5d3   : > { %2384 = vmatprep.mubr.bf16.mxu0 %v8144_v55  ;;  %2497 = vmatprep.mubr.bf16.mxu1 %v8144_v55 }
 0x5d4   : > { %2890 = vmatprep.subr.bf16.mxu0 %v6377_v61  ;;  %3003 = vmatprep.subr.bf16.mxu1 %v6379_v35  ;;  %v1700_v61 = vld [vmem:[#allocation10 + $0x140] sm:$0xff] }
 0x5d5   : > { %v1704_v35 = vld [vmem:[#allocation10 + $0x160] sm:$0xff] }
 0x5d6   : > { %2891 = vmatpush1.bf16.msra.mxu0 %v6376_v21  ;;  %3004 = vmatpush1.bf16.msra.mxu1 %v6378_v25  ;;  %v6409_v21 = vcombine.high %v1700_v61, %v1704_v35  ;;  %v6411_v25 = vcombine.high %v1701_v45, %v1705_v49  ;;  %v6408_v31 = vcombine.low %v1700_v61, %v1704_v35  ;;  %v1667_v61 = vld [vmem:[#allocation10 + $0x38] sm:$0xff] }
 0x5d7   : > { %2892 = vmatprep.subr.bf16.mxu0 %v6385_v36  ;;  %3005 = vmatprep.subr.bf16.mxu1 %v6387_v0  ;;  %v1708_v36 = vld [vmem:[#allocation10 + $0x180] sm:$0xff] }
 0x5d8   : > { %v1712_v0 = vld [vmem:[#allocation10 + $0x1a0] sm:$0xff] }
 0x5d9   : > { %2385 = vmatmul.mubr.bf16.gmra.mrb[68].mxu0 %v9159_v27  ;;  %2498 = vmatmul.mubr.bf16.gmra.mrb[52].mxu1 %v9159_v27  ;;  %v6400_v27 = vcombine.low %v1692_v4, %v1696_v28  ;;  %v1717_v4 = vld [vmem:[#allocation10 + $0x1c8] sm:$0xff] }
 0x5da   : > { %2394 = vmatprep.mubr.bf16.mxu0 %v8144_v55  ;;  %2507 = vmatprep.mubr.bf16.mxu1 %v8144_v55  ;;  %v1721_v28 = vld [vmem:[#allocation10 + $0x1e8] sm:$0xff] }
 0x5db   : > { %2893 = vmatpush1.bf16.msra.mxu0 %v6384_v63  ;;  %3006 = vmatpush1.bf16.msra.mxu1 %v6386_v26  ;;  %v6417_v63 = vcombine.high %v1708_v36, %v1712_v0  ;;  %v6419_v26 = vcombine.high %v1709_v20, %v1713_v11  ;;  %v6426_v45 = vcombine.low %v1717_v4, %v1721_v28  ;;  %v1678_v20 = vld [vmem:[#allocation10 + $0x90] sm:$0xff] }
 0x5dc   : > { %2894 = vmatprep.subr.bf16.mxu0 %v6393_v24  ;;  %3007 = vmatprep.subr.bf16.mxu1 %v6395_v56  ;;  %v1716_v24 = vld [vmem:[#allocation10 + $0x1c0] sm:$0xff] }
 0x5dd   : > { %v1720_v56 = vld [vmem:[#allocation10 + $0x1e0] sm:$0xff] }
 0x5de   : > { %v6425_v48 = vcombine.high %v1716_v24, %v1720_v56  ;;  %v6424_v35 = vcombine.low %v1716_v24, %v1720_v56 }
 0x5df   : > { %2895 = vmatpush1.bf16.msra.mxu0 %v6392_v8  ;;  %3008 = vmatpush1.bf16.msra.mxu1 %v6394_v14  ;;  %v6427_v8 = vcombine.high %v1717_v4, %v1721_v28  ;;  %v1662_v14 = vld [vmem:[#allocation10 + $0x10] sm:$0xff] }
 0x5e0   : > { %2896 = vmatprep.subr.bf16.mxu0 %v6401_v60  ;;  %3009 = vmatprep.subr.bf16.mxu1 %v6403_v41  ;;  %v1666_v60 = vld [vmem:[#allocation10 + $0x30] sm:$0xff]  ;;  %v1663_v41 = vld [vmem:[#allocation10 + $0x18] sm:$0xff] }
 0x5e1   : > { %2395 = vmatmul.mubr.bf16.gmra.mrb[72].mxu0 %v9177_v53  ;;  %2508 = vmatmul.mubr.bf16.gmra.mrb[56].mxu1 %v9177_v53  ;;  %v6416_v53 = vcombine.low %v1708_v36, %v1712_v0  ;;  %v6373_v49 = vcombine.high %v1662_v14, %v1666_v60  ;;  %v6372_v36 = vcombine.low %v1662_v14, %v1666_v60 }
 0x5e2   : > { %2404 = vmatprep.mubr.bf16.mxu0 %v8144_v55  ;;  %2517 = vmatprep.mubr.bf16.mxu1 %v8144_v55  ;;  %v6374_v0 = vcombine.low %v1663_v41, %v1667_v61 }
 0x5e3   : > { %2897 = vmatpush1.bf16.msra.mxu0 %v6400_v27  ;;  %3010 = vmatpush1.bf16.msra.mxu1 %v6402_v51  ;;  %v6375_v27 = vcombine.high %v1663_v41, %v1667_v61  ;;  %v1674_v51 = vld [vmem:[#allocation10 + $0x70] sm:$0xff] }
 0x5e4   : > { %2898 = vmatprep.subr.bf16.mxu0 %v6409_v21  ;;  %3011 = vmatprep.subr.bf16.mxu1 %v6411_v25  ;;  %v1671_v21 = vld [vmem:[#allocation10 + $0x58] sm:$0xff]  ;;  %v1694_v61 = vld [vmem:[#allocation10 + $0x110] sm:$0xff] }
 0x5e5   : > { %v1675_v25 = vld [vmem:[#allocation10 + $0x78] sm:$0xff] }
 0x5e6   : > { %v6382_v24 = vcombine.low %v1671_v21, %v1675_v25 }
 0x5e7   : > { %2899 = vmatpush1.bf16.msra.mxu0 %v6408_v31  ;;  %3012 = vmatpush1.bf16.msra.mxu1 %v6410_v5  ;;  %v6383_v31 = vcombine.high %v1671_v21, %v1675_v25  ;;  %v1682_v5 = vld [vmem:[#allocation10 + $0xb0] sm:$0xff] }
 0x5e8   : > { %2900 = vmatprep.subr.bf16.mxu0 %v6417_v63  ;;  %3013 = vmatprep.subr.bf16.mxu1 %v6419_v26  ;;  %v1683_v63 = vld [vmem:[#allocation10 + $0xb8] sm:$0xff]  ;;  %v6389_v4 = vcombine.high %v1678_v20, %v1682_v5 }
 0x5e9   : > { %2405 = vmatmul.mubr.bf16.gmra.mrb[76].mxu0 %v9195_v22  ;;  %2518 = vmatmul.mubr.bf16.gmra.mrb[60].mxu1 %v9195_v22  ;;  %v9318_v22 = vld [vmem:[%s10782_s24] ss:$0 sm:$0xff]  ;;  %s8002_s24 = sshll.u32 %s8145_s25, 4  ;;  %s8003_s24 = int_to_ptr.vmem [resolvable:$false] %s8002_s24 }
 0x5ea   : > { %2414 = vmatprep.mubr.bf16.mxu0 %v8144_v55  ;;  %2527 = vmatprep.mubr.bf16.mxu1 %v8144_v55  ;;  %v9344_v56 = vadd.f32 %v8878_v59, %v9318_v22  ;;  %v6388_v59 = vcombine.low %v1678_v20, %v1682_v5  ;;  %v1706_v20 = vld [vmem:[#allocation10 + $0x170] sm:$0xff]  ;;  %s8004_s2 = scalar_lea.vmem %s8003_s24, 4096  ;;  %p8005_p3 = scmp.lt.s32.totalorder %s10365_s3, %s8003_s24 }
 0x5eb   : > { %2901 = vmatpush1.bf16.msra.mxu0 %v6416_v53  ;;  %3014 = vmatpush1.bf16.msra.mxu1 %v6418_v17  ;;  %v1686_v53 = vld [vmem:[#allocation10 + $0xd0] sm:$0xff]  ;;  %p8006_p6 = scmp.lt.s32.totalorder %s8004_s2, %s7998_s18 }
 0x5ec   : > { %2902 = vmatprep.subr.bf16.mxu0 %v6425_v48  ;;  %3015 = vmatprep.subr.bf16.mxu1 %v6427_v8  ;;  %10786 = vst [vmem:[#allocation53_spill] sm:$0xff] %v9344_v56  ;;  %v1690_v17 = vld [vmem:[#allocation10 + $0xf0] sm:$0xff]  ;;  %v1691_v48 = vld [vmem:[#allocation10 + $0xf8] sm:$0xff] }
 0x5ed   : > { %v6397_v60 = vcombine.high %v1686_v53, %v1690_v17  ;;  %p8007_p13 = por %p8006_p6, %p8005_p3 }
 0x5ef   : > { %2903 = vmatpush1.bf16.msra.mxu0 %v6424_v35  ;;  %3016 = vmatpush1.bf16.msra.mxu1 %v6426_v45  ;;  %v1698_v35 = vld [vmem:[#allocation10 + $0x130] sm:$0xff]  ;;  %v1695_v45 = vld [vmem:[#allocation10 + $0x118] sm:$0xff]  ;;  %p8008_p11 = pnand %p8007_p13, %p8001_p10 }
 0x5f0   : > { %3114 = vmatprep.subr.bf16.mxu0 %v6373_v49  ;;  %3227 = vmatprep.subr.bf16.mxu1 %v6375_v27  ;;  %v1699_v49 = vld [vmem:[#allocation10 + $0x138] sm:$0xff]  ;;  %v9356_v27 = vadd.f32 %v9318_v22, %v8892_v6  ;;  %v6405_v25 = vcombine.high %v1694_v61, %v1698_v35 }
 0x5f1   : > { %2415 = vmatmul.mubr.bf16.gmra.mrb[80].mxu0 %v9225_v44  ;;  %2528 = vmatmul.mubr.bf16.gmra.mrb[64].mxu1 %v9225_v44  ;;  %v9326_v44 = vadd.f32 %v9318_v22, %v8876_v2  ;;  %v1679_v2 = vld [vmem:[#allocation10 + $0x98] sm:$0xff]  ;;  %v6406_v5 = vcombine.low %v1695_v45, %v1699_v49 }
 0x5f2   : > { %2424 = vmatprep.mubr.bf16.mxu0 %v8144_v55  ;;  %2537 = vmatprep.mubr.bf16.mxu1 %v8144_v55  ;;  %v6391_v28 = vcombine.high %v1679_v2, %v1683_v63  ;;  %v6390_v14 = vcombine.low %v1679_v2, %v1683_v63  ;;  %10787 = vst [vmem:[#allocation54_spill] sm:$0xff] %v9356_v27  ;;  %v1703_v6 = vld [vmem:[#allocation10 + $0x158] sm:$0xff] }
 0x5f3   : > { %10783 = vst [vmem:[#allocation50_spill] sm:$0xff] %v9326_v44 }
 0x5f9   : > { %2425 = vmatmul.mubr.bf16.gmra.mrb[84].mxu0 %v9243_v46  ;;  %2538 = vmatmul.mubr.bf16.gmra.mrb[68].mxu1 %v9243_v46  ;;  %v9330_v46 = vadd.f32 %v9318_v22, %v8881_v1  ;;  %v9340_v1 = vadd.f32 %v8874_v52, %v9318_v22  ;;  %v1687_v52 = vld [vmem:[#allocation10 + $0xd8] sm:$0xff] }
 0x5fa   : > { %2434 = vmatprep.mubr.bf16.mxu0 %v8144_v55  ;;  %2547 = vmatprep.mubr.bf16.mxu1 %v8144_v55  ;;  %v6399_v41 = vcombine.high %v1687_v52, %v1691_v48  ;;  %v6398_v21 = vcombine.low %v1687_v52, %v1691_v48 }
 0x5fb   : > { %10784 = vst [vmem:[#allocation51_spill] sm:$0xff] %v9330_v46  ;;  %10785 = vst [vmem:[#allocation52_spill] sm:$0xff] %v9340_v1  ;;  %v9350_v8 = vpack.c.bf16 %v9344_v56, %v9340_v1  ;;  %v7584_v1 = vld [vmem:[#allocation14 + $0xd0] sm:$0xff]  }
 0x601   : > { %2435 = vmatmul.mubr.bf16.gmra.mrb[88].mxu0 %v9261_v13  ;;  %2548 = vmatmul.mubr.bf16.gmra.mrb[72].mxu1 %v9261_v13  ;;  %v1670_v13 = vld [vmem:[#allocation10 + $0x50] sm:$0xff] }
 0x602   : > { %2444 = vmatprep.mubr.bf16.mxu0 %v8144_v55  ;;  %2557 = vmatprep.mubr.bf16.mxu1 %v8144_v55  ;;  %v6381_v11 = vcombine.high %v1670_v13, %v1674_v51  ;;  %v6380_v26 = vcombine.low %v1670_v13, %v1674_v51  ;;  %v9362_v13 = vadd.f32 %v9318_v22, %v8899_v16 }
 0x603   : > { %v6396_v51 = vcombine.low %v1686_v53, %v1690_v17  ;;  %v6404_v16 = vcombine.low %v1694_v61, %v1698_v35  ;;  %v9372_v53 = vadd.f32 %v8889_v32, %v9318_v22  ;;  %v9378_v17 = vadd.f32 %v8895_v12, %v9318_v22  ;;  %v1719_v32 = vld [vmem:[#allocation10 + $0x1d8] sm:$0xff] }
 0x604   : > { %10788 = vst [vmem:[#allocation55_spill] sm:$0xff] %v9362_v13  ;;  %v1723_v61 = vld [vmem:[#allocation10 + $0x1f8] sm:$0xff] }
 0x605   : > { %10789 = vst [vmem:[#allocation56_spill] sm:$0xff] %v9372_v53  ;;  %10790 = vst [vmem:[#allocation57_spill] sm:$0xff] %v9378_v17  ;;  %v9382_v35 = vpack.c.bf16 %v9378_v17, %v9372_v53 }
 0x609   : > { %2445 = vmatmul.mubr.bf16.gmra.mrb[92].mxu0 %v9277_v33  ;;  %2558 = vmatmul.mubr.bf16.gmra.mrb[76].mxu1 %v9277_v33  ;;  %v9334_v33 = vpack.c.bf16 %v9330_v46, %v9326_v44 }
 0x60a   : > { %2920 = vmatprep.mubr.bf16.mxu0 %v8144_v55  ;;  %3033 = vmatprep.mubr.bf16.mxu1 %v8144_v55 }
 0x611   : > { %2921 = vmatmul.mubr.bf16.vlgmr.msra.gmra.mrb[32].mxu0 %v9334_v33  ;;  %3034 = vmatmul.mubr.bf16.vlgmr.msra.gmra.mrb[16].mxu1 %v9334_v33 }
 0x612   : > { %3115 = vmatpush1.bf16.msra.mxu0 %v6372_v36  ;;  %3228 = vmatpush1.bf16.msra.mxu1 %v6374_v0  ;;  %v6407_v36 = vcombine.high %v1695_v45, %v1699_v49  ;;  %v1702_v0 = vld [vmem:[#allocation10 + $0x150] sm:$0xff] }
 0x613   : > { %2930 = vmatprep.mubr.bf16.mxu0 %v8144_v55  ;;  %3043 = vmatprep.mubr.bf16.mxu1 %v8144_v55  ;;  %v6413_v2 = vcombine.high %v1702_v0, %v1706_v20  ;;  %v6412_v52 = vcombine.low %v1702_v0, %v1706_v20  ;;  %v6430_v0 = vcombine.low %v1719_v32, %v1723_v61  ;;  %v7510_v20 = vld [vmem:[#allocation13 + $0x40] sm:$0xff]  }
 0x614   : > { %3116 = vmatprep.subr.bf16.mxu0 %v6381_v11  ;;  %3229 = vmatprep.subr.bf16.mxu1 %v6383_v31  ;;  %v1707_v11 = vld [vmem:[#allocation10 + $0x178] sm:$0xff]  ;;  %v9366_v31 = vpack.c.bf16 %v9362_v13, %v9356_v27  ;;  %v7575_v27 = vld [vmem:[#allocation14] sm:$0xff]  }
 0x615   : > { %v6415_v63 = vcombine.high %v1703_v6, %v1707_v11  ;;  %v6414_v48 = vcombine.low %v1703_v6, %v1707_v11  ;;  %v7512_v6 = vld [vmem:[#allocation13 + $0xc0] sm:$0xff]   ;;  %v9410_v11 = vadd.f32 %v8929_v58, %v9318_v22  ;;  %v9426_v58 = vadd.f32 %v9318_v22, %v8939_v62 }
 0x616   : > { %3117 = vmatpush1.bf16.msra.mxu0 %v6380_v26  ;;  %3230 = vmatpush1.bf16.msra.mxu1 %v6382_v24  ;;  %v1710_v26 = vld [vmem:[#allocation10 + $0x190] sm:$0xff]  ;;  %v9442_v62 = vadd.f32 %v8937_v47, %v9318_v22  ;;  %v7515_v47 = vld [vmem:[#allocation13 + $0x8] sm:$0xff]  }
 0x617   : > { %3118 = vmatprep.subr.bf16.mxu0 %v6389_v4  ;;  %3231 = vmatprep.subr.bf16.mxu1 %v6391_v28  ;;  %v1714_v24 = vld [vmem:[#allocation10 + $0x1b0] sm:$0xff]  ;;  %v1711_v4 = vld [vmem:[#allocation10 + $0x198] sm:$0xff]  ;;  %10794 = vst [vmem:[#allocation61_spill] sm:$0xff] %v9410_v11  ;;  %10796 = vst [vmem:[#allocation63_spill] sm:$0xff] %v9426_v58 }
 0x618   : > { %v1715_v28 = vld [vmem:[#allocation10 + $0x1b8] sm:$0xff]  ;;  %v6420_v12 = vcombine.low %v1710_v26, %v1714_v24  ;;  %10798 = vst [vmem:[#allocation65_spill] sm:$0xff] %v9442_v62 }
 0x619   : > { %2931 = vmatmul.mubr.bf16.gmra.mrb[36].mxu0 %v9350_v8  ;;  %3044 = vmatmul.mubr.bf16.gmra.mrb[20].mxu1 %v9350_v8  ;;  %v6422_v45 = vcombine.low %v1711_v4, %v1715_v28 }
 0x61a   : > { %2940 = vmatprep.mubr.bf16.mxu0 %v8144_v55  ;;  %3053 = vmatprep.mubr.bf16.mxu1 %v8144_v55 }
 0x61b   : > { %3119 = vmatpush1.bf16.msra.mxu0 %v6388_v59  ;;  %3232 = vmatpush1.bf16.msra.mxu1 %v6390_v14  ;;  %v6421_v59 = vcombine.high %v1710_v26, %v1714_v24  ;;  %v6423_v14 = vcombine.high %v1711_v4, %v1715_v28  ;;  %v7513_v26 = vld [vmem:[#allocation13 + $0x80] sm:$0xff]   ;;  %v7516_v24 = vld [vmem:[#allocation13 + $0xc8] sm:$0xff]   ;;  %v7518_v4 = vld [vmem:[#allocation13 + $0x50] sm:$0xff]  }
 0x61c   : > { %3120 = vmatprep.subr.bf16.mxu0 %v6397_v60  ;;  %3233 = vmatprep.subr.bf16.mxu1 %v6399_v41  ;;  %v1718_v60 = vld [vmem:[#allocation10 + $0x1d0] sm:$0xff] }
 0x61d   : > { %v1722_v41 = vld [vmem:[#allocation10 + $0x1f0] sm:$0xff] }
 0x61e   : > { %v6429_v49 = vcombine.high %v1718_v60, %v1722_v41  ;;  %v7520_v28 = vld [vmem:[#allocation13 + $0xd0] sm:$0xff]  }
 0x61f   : > { %3121 = vmatpush1.bf16.msra.mxu0 %v6396_v51  ;;  %3234 = vmatpush1.bf16.msra.mxu1 %v6398_v21  ;;  %v6431_v51 = vcombine.high %v1719_v32, %v1723_v61  ;;  %v9388_v21 = vadd.f32 %v9318_v22, %v8927_v43  ;;  %v7528_v32 = vld [vmem:[#allocation13 + $0xe0] sm:$0xff]  }
 0x620   : > { %3122 = vmatprep.subr.bf16.mxu0 %v6405_v25  ;;  %3235 = vmatprep.subr.bf16.mxu1 %v6407_v36  ;;  %v9394_v25 = vadd.f32 %v9318_v22, %v8931_v15  ;;  %v6428_v36 = vcombine.low %v1718_v60, %v1722_v41  ;;  %v9406_v15 = vadd.f32 %v8925_v23, %v9318_v22  ;;  %v7525_v60 = vld [vmem:[#allocation13 + $0x98] sm:$0xff]   ;;  %v7526_v41 = vld [vmem:[#allocation13 + $0x60] sm:$0xff]  }
 0x621   : > { %2941 = vmatmul.mubr.bf16.gmra.mrb[40].mxu0 %v9366_v31  ;;  %3054 = vmatmul.mubr.bf16.gmra.mrb[24].mxu1 %v9366_v31  ;;  %10791 = vst [vmem:[#allocation58_spill] sm:$0xff] %v9388_v21  ;;  %v9422_v23 = vadd.f32 %v9318_v22, %v8935_v18  ;;  %v9438_v18 = vadd.f32 %v8933_v38, %v9318_v22  ;;  %v7514_v38 = vld [vmem:[#allocation13 + $0x48] sm:$0xff]   ;;  %v7527_v61 = vld [vmem:[#allocation13 + $0x20] sm:$0xff]  }
 0x622   : > { %2950 = vmatprep.mubr.bf16.mxu0 %v8144_v55  ;;  %3063 = vmatprep.mubr.bf16.mxu1 %v8144_v55  ;;  %10792 = vst [vmem:[#allocation59_spill] sm:$0xff] %v9394_v25  ;;  %v9398_v43 = vpack.c.bf16 %v9394_v25, %v9388_v21  ;;  %10793 = vst [vmem:[#allocation60_spill] sm:$0xff] %v9406_v15  ;;  %v7517_v22 = vld [vmem:[#allocation13 + $0x88] sm:$0xff]  }
 0x623   : > { %3123 = vmatpush1.bf16.msra.mxu0 %v6404_v16  ;;  %3236 = vmatpush1.bf16.msra.mxu1 %v6406_v5  ;;  %v9414_v16 = vpack.c.bf16 %v9410_v11, %v9406_v15  ;;  %10795 = vst [vmem:[#allocation62_spill] sm:$0xff] %v9422_v23  ;;  %v9430_v5 = vpack.c.bf16 %v9426_v58, %v9422_v23  ;;  %10797 = vst [vmem:[#allocation64_spill] sm:$0xff] %v9438_v18 }
 0x624   : > { %3124 = vmatprep.subr.bf16.mxu0 %v6413_v2  ;;  %3237 = vmatprep.subr.bf16.mxu1 %v6415_v63  ;;  %v9446_v2 = vpack.c.bf16 %v9442_v62, %v9438_v18  ;;  %v7511_v63 = vld [vmem:[#allocation13] sm:$0xff]  }
 0x627   : > { %3125 = vmatpush1.bf16.msra.mxu0 %v6412_v52  ;;  %3238 = vmatpush1.bf16.msra.mxu1 %v6414_v48  ;;  %v7519_v52 = vld [vmem:[#allocation13 + $0x10] sm:$0xff]  }
 0x628   : > { %3126 = vmatprep.subr.bf16.mxu0 %v6421_v59  ;;  %3239 = vmatprep.subr.bf16.mxu1 %v6423_v14  ;;  %v7521_v48 = vld [vmem:[#allocation13 + $0x90] sm:$0xff]   ;;  %v7522_v59 = vld [vmem:[#allocation13 + $0x58] sm:$0xff]  }
 0x629   : > { %2951 = vmatmul.mubr.bf16.gmra.mrb[44].mxu0 %v9382_v35  ;;  %3064 = vmatmul.mubr.bf16.gmra.mrb[28].mxu1 %v9382_v35  ;;  %v7523_v14 = vld [vmem:[#allocation13 + $0x18] sm:$0xff]  }
 0x62a   : > { %2960 = vmatprep.mubr.bf16.mxu0 %v8144_v55  ;;  %3073 = vmatprep.mubr.bf16.mxu1 %v8144_v55 }
 0x62b   : > { %3127 = vmatpush1.bf16.msra.mxu0 %v6420_v12  ;;  %3240 = vmatpush1.bf16.msra.mxu1 %v6422_v45  ;;  %v7529_v12 = vld [vmem:[#allocation13 + $0xa0] sm:$0xff]   ;;  %v7530_v45 = vld [vmem:[#allocation13 + $0x68] sm:$0xff]  }
 0x62c   : > { %3128 = vmatprep.subr.bf16.mxu0 %v6429_v49  ;;  %3241 = vmatprep.subr.bf16.mxu1 %v6431_v51  ;;  %v7531_v49 = vld [vmem:[#allocation13 + $0x28] sm:$0xff]  }
 0x62d   : > { %v7533_v51 = vld [vmem:[#allocation13 + $0xa8] sm:$0xff]  }
 0x62f   : > { %3129 = vmatpush1.bf16.msra.mxu0 %v6428_v36  ;;  %3242 = vmatpush1.bf16.msra.mxu1 %v6430_v0  ;;  %v7534_v36 = vld [vmem:[#allocation13 + $0x70] sm:$0xff]  }
 0x630   : > { %6627 = vmatprep.subr.bf16.mxu0 %v7510_v20  ;;  %6691 = vmatprep.subr.bf16.mxu1 %v7512_v6  ;;  %v7536_v0 = vld [vmem:[#allocation13 + $0xf0] sm:$0xff]  }
 0x631   : > { %2961 = vmatmul.mubr.bf16.gmra.mrb[48].mxu0 %v9398_v43  ;;  %3074 = vmatmul.mubr.bf16.gmra.mrb[32].mxu1 %v9398_v43  ;;  %v7535_v20 = vld [vmem:[#allocation13 + $0x30] sm:$0xff]  }
 0x632   : > { %2970 = vmatprep.mubr.bf16.mxu0 %v8144_v55  ;;  %3083 = vmatprep.mubr.bf16.mxu1 %v8144_v55  ;;  %v7537_v6 = vld [vmem:[#allocation13 + $0xb0] sm:$0xff]  }
 0x639   : > { %2971 = vmatmul.mubr.bf16.gmra.mrb[52].mxu0 %v9414_v16  ;;  %3084 = vmatmul.mubr.bf16.gmra.mrb[36].mxu1 %v9414_v16 }
 0x63a   : > { %2980 = vmatprep.mubr.bf16.mxu0 %v8144_v55  ;;  %3093 = vmatprep.mubr.bf16.mxu1 %v8144_v55 }
 0x641   : > { %2981 = vmatmul.mubr.bf16.gmra.mrb[56].mxu0 %v9430_v5  ;;  %3094 = vmatmul.mubr.bf16.gmra.mrb[40].mxu1 %v9430_v5 }
 0x642   : > { %2990 = vmatprep.mubr.bf16.mxu0 %v8144_v55  ;;  %3103 = vmatprep.mubr.bf16.mxu1 %v8144_v55 }
 0x649   : > { %2991 = vmatmul.mubr.bf16.gmra.mrb[60].mxu0 %v9446_v2  ;;  %3104 = vmatmul.mubr.bf16.gmra.mrb[44].mxu1 %v9446_v2 }
 0x64a   : > { %3146 = vmatprep.mubr.bf16.mxu0 %v8144_v55  ;;  %3259 = vmatprep.mubr.bf16.mxu1 %v8144_v55 }
 0x651   : > { %3147 = vmatmul.mubr.bf16.vlgmr.msra.gmra.mrb[64].mxu0 %v9334_v33  ;;  %3260 = vmatmul.mubr.bf16.vlgmr.msra.gmra.mrb[48].mxu1 %v9334_v33  ;;  %v7524_v33 = vld [vmem:[#allocation13 + $0xd8] sm:$0xff]  }
 0x652   : > { %3156 = vmatprep.mubr.bf16.mxu0 %v8144_v55  ;;  %3269 = vmatprep.mubr.bf16.mxu1 %v8144_v55 }
 0x653   : > { %6628 = vmatpush3.bf16.msra.mxu0 %v7511_v63  ;;  %6692 = vmatpush3.bf16.msra.mxu1 %v7513_v26  ;;  %v7540_v63 = vld [vmem:[#allocation13 + $0xf8] sm:$0xff]  }
 0x654   : > { %6629 = vmatprep.subr.bf16.mxu0 %v7514_v38  ;;  %6693 = vmatprep.subr.bf16.mxu1 %v7516_v24  ;;  %v7539_v26 = vld [vmem:[#allocation13 + $0x38] sm:$0xff]   ;;  %v7544_v24 = vld [vmem:[#allocation13 + $0x1c0] sm:$0xff]  }
 0x655   : > { %v7541_v38 = vld [vmem:[#allocation13 + $0xb8] sm:$0xff]  }
 0x657   : > { %6630 = vmatpush3.bf16.msra.mxu0 %v7515_v47  ;;  %6694 = vmatpush3.bf16.msra.mxu1 %v7517_v22 }
 0x658   : > { %6631 = vmatprep.subr.bf16.mxu0 %v7518_v4  ;;  %6695 = vmatprep.subr.bf16.mxu1 %v7520_v28  ;;  %v9489_v4 = vld [vmem:[%s10799_s28] sm:$0xff] }
 0x659   : > { %3157 = vmatmul.mubr.bf16.gmra.mrb[68].mxu0 %v9350_v8  ;;  %3270 = vmatmul.mubr.bf16.gmra.mrb[52].mxu1 %v9350_v8  ;;  %v7532_v8 = vld [vmem:[#allocation13 + $0xe8] sm:$0xff]  }
 0x65a   : > { %3166 = vmatprep.mubr.bf16.mxu0 %v8144_v55  ;;  %3279 = vmatprep.mubr.bf16.mxu1 %v8144_v55 }
 0x65b   : > { %6632 = vmatpush3.bf16.msra.mxu0 %v7519_v52  ;;  %6696 = vmatpush3.bf16.msra.mxu1 %v7521_v48 }
 0x65c   : > { %6633 = vmatprep.subr.bf16.mxu0 %v7522_v59  ;;  %6697 = vmatprep.subr.bf16.mxu1 %v7524_v33 }
 0x65f   : > { %6634 = vmatpush3.bf16.msra.mxu0 %v7523_v14  ;;  %6698 = vmatpush3.bf16.msra.mxu1 %v7525_v60 }
 0x660   : > { %6635 = vmatprep.subr.bf16.mxu0 %v7526_v41  ;;  %6699 = vmatprep.subr.bf16.mxu1 %v7528_v32 }
 0x661   : > { %3167 = vmatmul.mubr.bf16.gmra.mrb[72].mxu0 %v9366_v31  ;;  %3280 = vmatmul.mubr.bf16.gmra.mrb[56].mxu1 %v9366_v31  ;;  %v7538_v31 = vld [vmem:[#allocation13 + $0x78] sm:$0xff]  }
 0x662   : > { %3176 = vmatprep.mubr.bf16.mxu0 %v8144_v55  ;;  %3289 = vmatprep.mubr.bf16.mxu1 %v8144_v55 }
 0x663   : > { %6636 = vmatpush3.bf16.msra.mxu0 %v7527_v61  ;;  %6700 = vmatpush3.bf16.msra.mxu1 %v7529_v12 }
 0x664   : > { %6637 = vmatprep.subr.bf16.mxu0 %v7530_v45  ;;  %6701 = vmatprep.subr.bf16.mxu1 %v7532_v8 }
 0x667   : > { %6638 = vmatpush3.bf16.msra.mxu0 %v7531_v49  ;;  %6702 = vmatpush3.bf16.msra.mxu1 %v7533_v51 }
 0x668   : > { %6639 = vmatprep.subr.bf16.mxu0 %v7534_v36  ;;  %6703 = vmatprep.subr.bf16.mxu1 %v7536_v0 }
 0x669   : > { %3177 = vmatmul.mubr.bf16.gmra.mrb[76].mxu0 %v9382_v35  ;;  %3290 = vmatmul.mubr.bf16.gmra.mrb[60].mxu1 %v9382_v35  ;;  %v7542_v35 = vld [vmem:[#allocation13 + $0x140] sm:$0xff]  }
 0x66a   : > { %3186 = vmatprep.mubr.bf16.mxu0 %v8144_v55  ;;  %3299 = vmatprep.mubr.bf16.mxu1 %v8144_v55 }
 0x66b   : > { %6640 = vmatpush3.bf16.msra.mxu0 %v7535_v20  ;;  %6704 = vmatpush3.bf16.msra.mxu1 %v7537_v6 }
 0x66c   : > { %6641 = vmatprep.subr.bf16.mxu0 %v7538_v31  ;;  %6705 = vmatprep.subr.bf16.mxu1 %v7540_v63 }
 0x66f   : > { %6642 = vmatpush3.bf16.msra.mxu0 %v7539_v26  ;;  %6706 = vmatpush3.bf16.msra.mxu1 %v7541_v38 }
 0x670   : > { %6755 = vmatprep.subr.bf16.mxu0 %v7542_v35  ;;  %6819 = vmatprep.subr.bf16.mxu1 %v7544_v24 }
 0x671   : > { %3187 = vmatmul.mubr.bf16.gmra.mrb[80].mxu0 %v9398_v43  ;;  %3300 = vmatmul.mubr.bf16.gmra.mrb[64].mxu1 %v9398_v43  ;;  %v3342_v43 = vlaneseq }
 0x672   : > { %3196 = vmatprep.mubr.bf16.mxu0 %v8144_v55  ;;  %3309 = vmatprep.mubr.bf16.mxu1 %v8144_v55 }
 0x673   : > { %v9482_v47 = vshrl.u32 %v3342_v43, 7 }
 0x675   : > { %v3352_v22 = vsub.s32 2, %v9482_v47  ;;  %v3368_v23 = vsub.s32 6, %v9482_v47 }
 0x679   : > { %3197 = vmatmul.mubr.bf16.gmra.mrb[84].mxu0 %v9414_v16  ;;  %3310 = vmatmul.mubr.bf16.gmra.mrb[68].mxu1 %v9414_v16  ;;  %v3344_v16 = vsub.s32 0, %v9482_v47 }
 0x67a   : > { %3206 = vmatprep.mubr.bf16.mxu0 %v8144_v55  ;;  %3319 = vmatprep.mubr.bf16.mxu1 %v8144_v55 }
 0x67b   : > { %v9494_v28 = vrot.slane %v9489_v4, %v3344_v16 }
 0x681   : > { %3207 = vmatmul.mubr.bf16.gmra.mrb[88].mxu0 %v9430_v5  ;;  %3320 = vmatmul.mubr.bf16.gmra.mrb[72].mxu1 %v9430_v5  ;;  %v3348_v5 = vsub.s32 1, %v9482_v47 }
 0x682   : > { %3216 = vmatprep.mubr.bf16.mxu0 %v8144_v55  ;;  %3329 = vmatprep.mubr.bf16.mxu1 %v8144_v55  ;;  %v3356_v55 = vsub.s32 3, %v9482_v47 }
 0x683   : > { %v9500_v52 = vrot.slane %v9489_v4, %v3348_v5 }
 0x684   : > { %v9503_v48 = vrot.slane %v9489_v4, %v3356_v55 }
 0x689   : > { %3217 = vmatmul.mubr.bf16.gmra.mrb[92].mxu0 %v9446_v2  ;;  %3330 = vmatmul.mubr.bf16.gmra.mrb[76].mxu1 %v9446_v2  ;;  %v9497_v2 = vrot.slane %v9489_v4, %v3352_v22 }
 0x6e4   : > { %v2922_v59 = vpop.f32.mrb[32].mxu0  ;;  %v3035_v33 = vpop.f32.mrb[16].mxu1 }
 0x6e5   : > { %v3382_v14 = vadd.f32 %v9494_v28, %v2922_v59  ;;  %v3384_v60 = vadd.f32 %v9497_v2, %v3035_v33  ;;  %v2924_v41 = vpop.f32.mrb[33].mxu0  ;;  %v3037_v32 = vpop.f32.mrb[17].mxu1 }
 0x6e6   : > { %v3383_v61 = vadd.f32 %v9500_v52, %v2924_v41  ;;  %v3385_v12 = vadd.f32 %v9503_v48, %v3037_v32  ;;  %v2926_v45 = vpop.f32.mrb[34].mxu0  ;;  %v3039_v8 = vpop.f32.mrb[18].mxu1  ;;  %v7543_v32 = vld [vmem:[#allocation13 + $0x100] sm:$0xff]  }
 0x6e7   : > { %v3390_v49 = vadd.f32 %v9494_v28, %v2926_v45  ;;  %v3392_v51 = vadd.f32 %v9497_v2, %v3039_v8  ;;  %v2928_v36 = vpop.f32.mrb[35].mxu0  ;;  %v3041_v0 = vpop.f32.mrb[19].mxu1  ;;  %v3510_v31 = vmax.f32 %v3382_v14, 0.0  ;;  %v3512_v63 = vmax.f32 %v3384_v60, 0.0  ;;  %v7545_v45 = vld [vmem:[#allocation13 + $0x180] sm:$0xff]   ;;  %v7546_v8 = vld [vmem:[#allocation13 + $0x148] sm:$0xff]  }
 0x6e8   : > { %v3391_v20 = vadd.f32 %v9500_v52, %v2928_v36  ;;  %v3393_v6 = vadd.f32 %v9503_v48, %v3041_v0  ;;  %v3511_v35 = vmax.f32 %v3383_v61, 0.0  ;;  %v3513_v24 = vmax.f32 %v3385_v12, 0.0 }
 0x6e9   : > { %v3518_v26 = vmax.f32 %v3390_v49, 0.0  ;;  %v3520_v38 = vmax.f32 %v3392_v51, 0.0  ;;  %v7548_v49 = vld [vmem:[#allocation13 + $0x1c8] sm:$0xff]  }
 0x6ea   : > { %v3519_v43 = vmax.f32 %v3391_v20, 0.0  ;;  %v3521_v16 = vmax.f32 %v3393_v6, 0.0 }
 0x6eb   : > { %v9513_v22 = vpack.c.bf16 %v3518_v26, %v3510_v31  ;;  %v9515_v5 = vpack.c.bf16 %v3520_v38, %v3512_v63 }
 0x6ec   : > { %v9517_v55 = vpack.c.bf16 %v3519_v43, %v3511_v35  ;;  %v9519_v59 = vpack.c.bf16 %v3521_v16, %v3513_v24  ;;  %v2932_v33 = vpop.f32.mrb[36].mxu0  ;;  %v3045_v41 = vpop.f32.mrb[20].mxu1  ;;  %v7547_v24 = vld [vmem:[#allocation13 + $0x108] sm:$0xff]  }
 0x6ed   : > { %v3398_v14 = vadd.f32 %v9494_v28, %v2932_v33  ;;  %v3400_v60 = vadd.f32 %v9497_v2, %v3045_v41  ;;  %v2934_v61 = vpop.f32.mrb[37].mxu0  ;;  %v3047_v12 = vpop.f32.mrb[21].mxu1  ;;  %v7549_v43 = vld [vmem:[#allocation13 + $0x188] sm:$0xff]  }
 0x6ee   : > { %v3399_v51 = vadd.f32 %v9500_v52, %v2934_v61  ;;  %v3401_v36 = vadd.f32 %v9503_v48, %v3047_v12  ;;  %v2936_v0 = vpop.f32.mrb[38].mxu0  ;;  %v3049_v20 = vpop.f32.mrb[22].mxu1  ;;  %4253 = vmatprep.mubr.bf16.mxu0 %v9517_v55  ;;  %4350 = vmatprep.mubr.bf16.mxu1 %v9519_v59  ;;  %v7550_v12 = vld [vmem:[#allocation13 + $0x150] sm:$0xff]  }
 0x6ef   : > { %v3406_v6 = vadd.f32 %v9494_v28, %v2936_v0  ;;  %v3408_v31 = vadd.f32 %v9497_v2, %v3049_v20  ;;  %v2938_v63 = vpop.f32.mrb[39].mxu0  ;;  %v3051_v26 = vpop.f32.mrb[23].mxu1  ;;  %4254 = vmatmul.mubr.bf16.vlgmr.msra.gmra.mrb[96].mxu0 %v9513_v22  ;;  %4351 = vmatmul.mubr.bf16.vlgmr.msra.gmra.mrb[80].mxu1 %v9515_v5  ;;  %v3526_v16 = vmax.f32 %v3398_v14, 0.0  ;;  %v3528_v33 = vmax.f32 %v3400_v60, 0.0  ;;  %v7552_v0 = vld [vmem:[#allocation13 + $0x1d0] sm:$0xff]  }
 0x6f0   : > { %v3407_v38 = vadd.f32 %v9500_v52, %v2938_v63  ;;  %v3409_v35 = vadd.f32 %v9503_v48, %v3051_v26  ;;  %6756 = vmatpush3.bf16.msra.mxu0 %v7543_v32  ;;  %6820 = vmatpush3.bf16.msra.mxu1 %v7545_v45  ;;  %v3527_v20 = vmax.f32 %v3399_v51, 0.0  ;;  %v3529_v29 = vmax.f32 %v3401_v36, 0.0  ;;  %v7554_v26 = vld [vmem:[#allocation13 + $0x158] sm:$0xff]  }
 0x6f1   : > { %v3534_v41 = vmax.f32 %v3406_v6, 0.0  ;;  %v3536_v61 = vmax.f32 %v3408_v31, 0.0  ;;  %6757 = vmatprep.subr.bf16.mxu0 %v7546_v8  ;;  %6821 = vmatprep.subr.bf16.mxu1 %v7548_v49  ;;  %v7551_v8 = vld [vmem:[#allocation13 + $0x110] sm:$0xff]  }
 0x6f2   : > { %v3535_v39 = vmax.f32 %v3407_v38, 0.0  ;;  %v3537_v57 = vmax.f32 %v3409_v35, 0.0  ;;  %v7553_v49 = vld [vmem:[#allocation13 + $0x190] sm:$0xff]   ;;  %v7556_v38 = vld [vmem:[#allocation13 + $0x1d8] sm:$0xff]  }
 0x6f3   : > { %v9533_v42 = vpack.c.bf16 %v3534_v41, %v3526_v16  ;;  %v9535_v63 = vpack.c.bf16 %v3536_v61, %v3528_v33 }
 0x6f4   : > { %v9537_v32 = vpack.c.bf16 %v3535_v39, %v3527_v20  ;;  %v9539_v45 = vpack.c.bf16 %v3537_v57, %v3529_v29  ;;  %v2942_v14 = vpop.f32.mrb[40].mxu0  ;;  %v3055_v60 = vpop.f32.mrb[24].mxu1  ;;  %6758 = vmatpush3.bf16.msra.mxu0 %v7547_v24  ;;  %6822 = vmatpush3.bf16.msra.mxu1 %v7549_v43 }
 0x6f5   : > { %v3414_v6 = vadd.f32 %v9494_v28, %v2942_v14  ;;  %v3416_v51 = vadd.f32 %v9497_v2, %v3055_v60  ;;  %v2944_v36 = vpop.f32.mrb[41].mxu0  ;;  %v3057_v31 = vpop.f32.mrb[25].mxu1  ;;  %6759 = vmatprep.subr.bf16.mxu0 %v7550_v12  ;;  %6823 = vmatprep.subr.bf16.mxu1 %v7552_v0  ;;  %v7555_v12 = vld [vmem:[#allocation13 + $0x118] sm:$0xff]  }
 0x6f6   : > { %v3415_v39 = vadd.f32 %v9500_v52, %v2944_v36  ;;  %v3417_v57 = vadd.f32 %v9503_v48, %v3057_v31  ;;  %v2946_v29 = vpop.f32.mrb[42].mxu0  ;;  %v3059_v35 = vpop.f32.mrb[26].mxu1  ;;  %4261 = vmatprep.mubr.bf16.mxu0 %v9537_v32  ;;  %4358 = vmatprep.mubr.bf16.mxu1 %v9539_v45  ;;  %v7557_v0 = vld [vmem:[#allocation13 + $0x198] sm:$0xff]   ;;  %v7558_v31 = vld [vmem:[#allocation13 + $0x160] sm:$0xff]  }
 0x6f7   : > { %v3422_v24 = vadd.f32 %v9494_v28, %v2946_v29  ;;  %v3424_v43 = vadd.f32 %v9497_v2, %v3059_v35  ;;  %v2948_v16 = vpop.f32.mrb[43].mxu0  ;;  %v3061_v33 = vpop.f32.mrb[27].mxu1  ;;  %4262 = vmatmul.mubr.bf16.gmra.mrb[100].mxu0 %v9533_v42  ;;  %4359 = vmatmul.mubr.bf16.gmra.mrb[84].mxu1 %v9535_v63  ;;  %v3542_v20 = vmax.f32 %v3414_v6, 0.0  ;;  %v3544_v14 = vmax.f32 %v3416_v51, 0.0  ;;  %v7560_v29 = vld [vmem:[#allocation13 + $0x1e0] sm:$0xff]  }
 0x6f8   : > { %v3423_v41 = vadd.f32 %v9500_v52, %v2948_v16  ;;  %v3425_v61 = vadd.f32 %v9503_v48, %v3061_v33  ;;  %6760 = vmatpush3.bf16.msra.mxu0 %v7551_v8  ;;  %6824 = vmatpush3.bf16.msra.mxu1 %v7553_v49  ;;  %v3543_v35 = vmax.f32 %v3415_v39, 0.0  ;;  %v3545_v10 = vmax.f32 %v3417_v57, 0.0  ;;  %v7562_v33 = vld [vmem:[#allocation13 + $0x168] sm:$0xff]  }
 0x6f9   : > { %v3550_v60 = vmax.f32 %v3422_v24, 0.0  ;;  %v3552_v36 = vmax.f32 %v3424_v43, 0.0  ;;  %6761 = vmatprep.subr.bf16.mxu0 %v7554_v26  ;;  %6825 = vmatprep.subr.bf16.mxu1 %v7556_v38  ;;  %v7559_v26 = vld [vmem:[#allocation13 + $0x120] sm:$0xff]  }
 0x6fa   : > { %v3551_v30 = vmax.f32 %v3423_v41, 0.0  ;;  %v3553_v37 = vmax.f32 %v3425_v61, 0.0  ;;  %v7561_v38 = vld [vmem:[#allocation13 + $0x1a0] sm:$0xff]   ;;  %v7564_v41 = vld [vmem:[#allocation13 + $0x1e8] sm:$0xff]  }
 0x6fb   : > { %v9553_v34 = vpack.c.bf16 %v3550_v60, %v3542_v20  ;;  %v9555_v16 = vpack.c.bf16 %v3552_v36, %v3544_v14 }
 0x6fc   : > { %v9557_v8 = vpack.c.bf16 %v3551_v30, %v3543_v35  ;;  %v9559_v49 = vpack.c.bf16 %v3553_v37, %v3545_v10  ;;  %v2952_v6 = vpop.f32.mrb[44].mxu0  ;;  %v3065_v51 = vpop.f32.mrb[28].mxu1  ;;  %6762 = vmatpush3.bf16.msra.mxu0 %v7555_v12  ;;  %6826 = vmatpush3.bf16.msra.mxu1 %v7557_v0 }
 0x6fd   : > { %v3430_v24 = vadd.f32 %v9494_v28, %v2952_v6  ;;  %v3432_v39 = vadd.f32 %v9497_v2, %v3065_v51  ;;  %v2954_v57 = vpop.f32.mrb[45].mxu0  ;;  %v3067_v43 = vpop.f32.mrb[29].mxu1  ;;  %6763 = vmatprep.subr.bf16.mxu0 %v7558_v31  ;;  %6827 = vmatprep.subr.bf16.mxu1 %v7560_v29  ;;  %v7563_v31 = vld [vmem:[#allocation13 + $0x128] sm:$0xff]  }
 0x6fe   : > { %v3431_v30 = vadd.f32 %v9500_v52, %v2954_v57  ;;  %v3433_v37 = vadd.f32 %v9503_v48, %v3067_v43  ;;  %v2956_v10 = vpop.f32.mrb[46].mxu0  ;;  %v3069_v61 = vpop.f32.mrb[30].mxu1  ;;  %4269 = vmatprep.mubr.bf16.mxu0 %v9557_v8  ;;  %4366 = vmatprep.mubr.bf16.mxu1 %v9559_v49  ;;  %v7565_v29 = vld [vmem:[#allocation13 + $0x1a8] sm:$0xff]   ;;  %v7566_v43 = vld [vmem:[#allocation13 + $0x170] sm:$0xff]  }
 0x6ff   : > { %v3438_v12 = vadd.f32 %v9494_v28, %v2956_v10  ;;  %v3440_v0 = vadd.f32 %v9497_v2, %v3069_v61  ;;  %v2958_v20 = vpop.f32.mrb[47].mxu0  ;;  %v3071_v14 = vpop.f32.mrb[31].mxu1  ;;  %4270 = vmatmul.mubr.bf16.gmra.mrb[104].mxu0 %v9553_v34  ;;  %4367 = vmatmul.mubr.bf16.gmra.mrb[88].mxu1 %v9555_v16  ;;  %v3558_v35 = vmax.f32 %v3430_v24, 0.0  ;;  %v3560_v6 = vmax.f32 %v3432_v39, 0.0  ;;  %v7568_v10 = vld [vmem:[#allocation13 + $0x1f0] sm:$0xff]  }
 0x700   : > { %v3439_v60 = vadd.f32 %v9500_v52, %v2958_v20  ;;  %v3441_v36 = vadd.f32 %v9503_v48, %v3071_v14  ;;  %6764 = vmatpush3.bf16.msra.mxu0 %v7559_v26  ;;  %6828 = vmatpush3.bf16.msra.mxu1 %v7561_v38  ;;  %v3559_v61 = vmax.f32 %v3431_v30, 0.0  ;;  %v3561_v50 = vmax.f32 %v3433_v37, 0.0  ;;  %v7570_v14 = vld [vmem:[#allocation13 + $0x178] sm:$0xff]  }
 0x701   : > { %v3566_v51 = vmax.f32 %v3438_v12, 0.0  ;;  %v3568_v57 = vmax.f32 %v3440_v0, 0.0  ;;  %6765 = vmatprep.subr.bf16.mxu0 %v7562_v33  ;;  %6829 = vmatprep.subr.bf16.mxu1 %v7564_v41  ;;  %v7567_v33 = vld [vmem:[#allocation13 + $0x130] sm:$0xff]  }
 0x702   : > { %v3567_v9 = vmax.f32 %v3439_v60, 0.0  ;;  %v3569_v7 = vmax.f32 %v3441_v36, 0.0  ;;  %v7569_v41 = vld [vmem:[#allocation13 + $0x1b0] sm:$0xff]   ;;  %v7572_v60 = vld [vmem:[#allocation13 + $0x1f8] sm:$0xff]  }
 0x703   : > { %v9573_v40 = vpack.c.bf16 %v3566_v51, %v3558_v35  ;;  %v9575_v20 = vpack.c.bf16 %v3568_v57, %v3560_v6 }
 0x704   : > { %v9577_v26 = vpack.c.bf16 %v3567_v9, %v3559_v61  ;;  %v9579_v38 = vpack.c.bf16 %v3569_v7, %v3561_v50  ;;  %v2962_v24 = vpop.f32.mrb[48].mxu0  ;;  %v3075_v39 = vpop.f32.mrb[32].mxu1  ;;  %6766 = vmatpush3.bf16.msra.mxu0 %v7563_v31  ;;  %6830 = vmatpush3.bf16.msra.mxu1 %v7565_v29 }
 0x705   : > { %v3446_v12 = vadd.f32 %v9494_v28, %v2962_v24  ;;  %v3448_v30 = vadd.f32 %v9497_v2, %v3075_v39  ;;  %v2964_v37 = vpop.f32.mrb[49].mxu0  ;;  %v3077_v0 = vpop.f32.mrb[33].mxu1  ;;  %6767 = vmatprep.subr.bf16.mxu0 %v7566_v43  ;;  %6831 = vmatprep.subr.bf16.mxu1 %v7568_v10  ;;  %v7571_v43 = vld [vmem:[#allocation13 + $0x138] sm:$0xff]  }
 0x706   : > { %v3447_v9 = vadd.f32 %v9500_v52, %v2964_v37  ;;  %v3449_v7 = vadd.f32 %v9503_v48, %v3077_v0  ;;  %v2966_v50 = vpop.f32.mrb[50].mxu0  ;;  %v3079_v36 = vpop.f32.mrb[34].mxu1  ;;  %4277 = vmatprep.mubr.bf16.mxu0 %v9577_v26  ;;  %4374 = vmatprep.mubr.bf16.mxu1 %v9579_v38  ;;  %v7573_v10 = vld [vmem:[#allocation13 + $0x1b8] sm:$0xff]   ;;  %v7574_v0 = vld [vmem:[#allocation14 + $0x40] sm:$0xff]  }
 0x707   : > { %v3454_v31 = vadd.f32 %v9494_v28, %v2966_v50  ;;  %v3456_v29 = vadd.f32 %v9497_v2, %v3079_v36  ;;  %v2968_v35 = vpop.f32.mrb[51].mxu0  ;;  %v3081_v6 = vpop.f32.mrb[35].mxu1  ;;  %4278 = vmatmul.mubr.bf16.gmra.mrb[108].mxu0 %v9573_v40  ;;  %4375 = vmatmul.mubr.bf16.gmra.mrb[92].mxu1 %v9575_v20  ;;  %v3574_v61 = vmax.f32 %v3446_v12, 0.0  ;;  %v3576_v24 = vmax.f32 %v3448_v30, 0.0  ;;  %v7576_v50 = vld [vmem:[#allocation14 + $0xc0] sm:$0xff]  }
 0x708   : > { %v3455_v51 = vadd.f32 %v9500_v52, %v2968_v35  ;;  %v3457_v57 = vadd.f32 %v9503_v48, %v3081_v6  ;;  %6768 = vmatpush3.bf16.msra.mxu0 %v7567_v33  ;;  %6832 = vmatpush3.bf16.msra.mxu1 %v7569_v41  ;;  %v3575_v36 = vmax.f32 %v3447_v9, 0.0  ;;  %v3577_v54 = vmax.f32 %v3449_v7, 0.0 }
 0x709   : > { %v3582_v39 = vmax.f32 %v3454_v31, 0.0  ;;  %v3584_v37 = vmax.f32 %v3456_v29, 0.0  ;;  %6769 = vmatprep.subr.bf16.mxu0 %v7570_v14  ;;  %6833 = vmatprep.subr.bf16.mxu1 %v7572_v60 }
 0x70a   : > { %v3583_v19 = vmax.f32 %v3455_v51, 0.0  ;;  %v3585_v3 = vmax.f32 %v3457_v57, 0.0 }
 0x70b   : > { %v9593_v62 = vpack.c.bf16 %v3582_v39, %v3574_v61  ;;  %v9595_v35 = vpack.c.bf16 %v3584_v37, %v3576_v24 }
 0x70c   : > { %v9597_v33 = vpack.c.bf16 %v3583_v19, %v3575_v36  ;;  %v9599_v41 = vpack.c.bf16 %v3585_v3, %v3577_v54  ;;  %v2972_v12 = vpop.f32.mrb[52].mxu0  ;;  %v3085_v30 = vpop.f32.mrb[36].mxu1  ;;  %6770 = vmatpush3.bf16.msra.mxu0 %v7571_v43  ;;  %6834 = vmatpush3.bf16.msra.mxu1 %v7573_v10 }
 0x70d   : > { %v3462_v14 = vadd.f32 %v9494_v28, %v2972_v12  ;;  %v3464_v60 = vadd.f32 %v9497_v2, %v3085_v30  ;;  %v2974_v9 = vpop.f32.mrb[53].mxu0  ;;  %v3087_v7 = vpop.f32.mrb[37].mxu1  ;;  %6883 = vmatprep.subr.bf16.mxu0 %v7574_v0  ;;  %6947 = vmatprep.subr.bf16.mxu1 %v7576_v50 }
 0x70e   : > { %v3463_v31 = vadd.f32 %v9500_v52, %v2974_v9  ;;  %v3465_v29 = vadd.f32 %v9503_v48, %v3087_v7  ;;  %v2976_v19 = vpop.f32.mrb[54].mxu0  ;;  %v3089_v6 = vpop.f32.mrb[38].mxu1  ;;  %4285 = vmatprep.mubr.bf16.mxu0 %v9597_v33  ;;  %4382 = vmatprep.mubr.bf16.mxu1 %v9599_v41 }
 0x70f   : > { %v3470_v3 = vadd.f32 %v9494_v28, %v2976_v19  ;;  %v3472_v54 = vadd.f32 %v9497_v2, %v3089_v6  ;;  %v2978_v51 = vpop.f32.mrb[55].mxu0  ;;  %v3091_v57 = vpop.f32.mrb[39].mxu1  ;;  %4286 = vmatmul.mubr.bf16.gmra.mrb[112].mxu0 %v9593_v62  ;;  %4383 = vmatmul.mubr.bf16.gmra.mrb[96].mxu1 %v9595_v35  ;;  %v3590_v61 = vmax.f32 %v3462_v14, 0.0  ;;  %v3592_v24 = vmax.f32 %v3464_v60, 0.0 }
 0x710   : > { %v3471_v43 = vadd.f32 %v9500_v52, %v2978_v51  ;;  %v3473_v10 = vadd.f32 %v9503_v48, %v3091_v57  ;;  %v3591_v0 = vmax.f32 %v3463_v31, 0.0  ;;  %v3593_v50 = vmax.f32 %v3465_v29, 0.0 }
 0x711   : > { %v3598_v39 = vmax.f32 %v3470_v3, 0.0  ;;  %v3600_v37 = vmax.f32 %v3472_v54, 0.0 }
 0x712   : > { %v3599_v36 = vmax.f32 %v3471_v43, 0.0  ;;  %v3601_v12 = vmax.f32 %v3473_v10, 0.0 }
 0x713   : > { %v9613_v30 = vpack.c.bf16 %v3598_v39, %v3590_v61  ;;  %v9615_v9 = vpack.c.bf16 %v3600_v37, %v3592_v24 }
 0x714   : > { %v9617_v7 = vpack.c.bf16 %v3599_v36, %v3591_v0  ;;  %v9619_v19 = vpack.c.bf16 %v3601_v12, %v3593_v50  ;;  %v2982_v6 = vpop.f32.mrb[56].mxu0  ;;  %v3095_v51 = vpop.f32.mrb[40].mxu1  ;;  %v3360_v50 = vsub.s32 4, %v9482_v47 }
 0x715   : > { %v3478_v57 = vadd.f32 %v9494_v28, %v2982_v6  ;;  %v3480_v14 = vadd.f32 %v9497_v2, %v3095_v51  ;;  %v2984_v60 = vpop.f32.mrb[57].mxu0  ;;  %v3097_v3 = vpop.f32.mrb[41].mxu1 }
 0x716   : > { %v3479_v31 = vadd.f32 %v9500_v52, %v2984_v60  ;;  %v3481_v29 = vadd.f32 %v9503_v48, %v3097_v3  ;;  %v2986_v54 = vpop.f32.mrb[58].mxu0  ;;  %v3099_v43 = vpop.f32.mrb[42].mxu1  ;;  %4293 = vmatprep.mubr.bf16.mxu0 %v9617_v7  ;;  %4390 = vmatprep.mubr.bf16.mxu1 %v9619_v19 }
 0x717   : > { %v3486_v10 = vadd.f32 %v9494_v28, %v2986_v54  ;;  %v3488_v61 = vadd.f32 %v9497_v2, %v3099_v43  ;;  %v2988_v24 = vpop.f32.mrb[59].mxu0  ;;  %v3101_v39 = vpop.f32.mrb[43].mxu1  ;;  %4294 = vmatmul.mubr.bf16.gmra.mrb[116].mxu0 %v9613_v30  ;;  %4391 = vmatmul.mubr.bf16.gmra.mrb[100].mxu1 %v9615_v9  ;;  %v3606_v36 = vmax.f32 %v3478_v57, 0.0  ;;  %v3608_v12 = vmax.f32 %v3480_v14, 0.0 }
 0x718   : > { %v3487_v37 = vadd.f32 %v9500_v52, %v2988_v24  ;;  %v3489_v0 = vadd.f32 %v9503_v48, %v3101_v39  ;;  %v3607_v60 = vmax.f32 %v3479_v31, 0.0  ;;  %v3609_v3 = vmax.f32 %v3481_v29, 0.0 }
 0x719   : > { %v3614_v6 = vmax.f32 %v3486_v10, 0.0  ;;  %v3616_v51 = vmax.f32 %v3488_v61, 0.0  ;;  %v3364_v57 = vsub.s32 5, %v9482_v47  ;;  %v3372_v14 = vsub.s32 7, %v9482_v47 }
 0x71a   : > { %v3615_v54 = vmax.f32 %v3487_v37, 0.0  ;;  %v3617_v43 = vmax.f32 %v3489_v0, 0.0 }
 0x71b   : > { %v9634_v18 = vpack.c.bf16 %v3614_v6, %v3606_v36  ;;  %v9636_v58 = vpack.c.bf16 %v3616_v51, %v3608_v12  ;;  %v9652_v6 = vrot.slane %v9489_v4, %v3360_v50  ;;  %v9664_v50 = vrot.slane %v9489_v4, %v3364_v57 }
 0x71c   : > { %v9639_v11 = vpack.c.bf16 %v3615_v54, %v3607_v60  ;;  %v9641_v24 = vpack.c.bf16 %v3617_v43, %v3609_v3  ;;  %v2992_v39 = vpop.f32.mrb[60].mxu0  ;;  %v3105_v15 = vpop.f32.mrb[44].mxu1  ;;  %v9659_v3 = vrot.slane %v9489_v4, %v3368_v23 }
 0x71d   : > { %v3494_v31 = vadd.f32 %v9494_v28, %v2992_v39  ;;  %v3496_v29 = vadd.f32 %v9497_v2, %v3105_v15  ;;  %v2994_v10 = vpop.f32.mrb[61].mxu0  ;;  %v3107_v61 = vpop.f32.mrb[45].mxu1 }
 0x71e   : > { %v3495_v37 = vadd.f32 %v9500_v52, %v2994_v10  ;;  %v3497_v0 = vadd.f32 %v9503_v48, %v3107_v61  ;;  %v2996_v36 = vpop.f32.mrb[62].mxu0  ;;  %v3109_v12 = vpop.f32.mrb[46].mxu1  ;;  %4301 = vmatprep.mubr.bf16.mxu0 %v9639_v11  ;;  %4398 = vmatprep.mubr.bf16.mxu1 %v9641_v24 }
 0x71f   : > { %v3502_v47 = vadd.f32 %v9494_v28, %v2996_v36  ;;  %v3504_v51 = vadd.f32 %v9497_v2, %v3109_v12  ;;  %v2998_v15 = vpop.f32.mrb[63].mxu0  ;;  %v3111_v60 = vpop.f32.mrb[47].mxu1  ;;  %4302 = vmatmul.mubr.bf16.gmra.mrb[120].mxu0 %v9634_v18  ;;  %4399 = vmatmul.mubr.bf16.gmra.mrb[104].mxu1 %v9636_v58  ;;  %v9667_v28 = vrot.slane %v9489_v4, %v3372_v14  ;;  %v3622_v2 = vmax.f32 %v3494_v31, 0.0 }
 0x720   : > { %v3503_v54 = vadd.f32 %v9500_v52, %v2998_v15  ;;  %v3505_v43 = vadd.f32 %v9503_v48, %v3111_v60  ;;  %v3624_v39 = vmax.f32 %v3496_v29, 0.0  ;;  %v3623_v36 = vmax.f32 %v3495_v37, 0.0 }
 0x721   : > { %v3630_v10 = vmax.f32 %v3502_v47, 0.0  ;;  %v3632_v61 = vmax.f32 %v3504_v51, 0.0  ;;  %v3625_v12 = vmax.f32 %v3497_v0, 0.0 }
 0x722   : > { %v3631_v25 = vmax.f32 %v3503_v54, 0.0  ;;  %v3633_v21 = vmax.f32 %v3505_v43, 0.0 }
 0x723   : > { %v9669_v23 = vpack.c.bf16 %v3630_v10, %v3622_v2  ;;  %v9671_v17 = vpack.c.bf16 %v3632_v61, %v3624_v39 }
 0x724   : > { %v9673_v52 = vpack.c.bf16 %v3631_v25, %v3623_v36  ;;  %v9675_v48 = vpack.c.bf16 %v3633_v21, %v3625_v12  ;;  %v3148_v57 = vpop.f32.mrb[64].mxu0  ;;  %v3261_v15 = vpop.f32.mrb[48].mxu1 }
 0x725   : > { %v3386_v4 = vadd.f32 %v9652_v6, %v3148_v57  ;;  %v3388_v14 = vadd.f32 %v9659_v3, %v3261_v15  ;;  %v3150_v31 = vpop.f32.mrb[65].mxu0  ;;  %v3263_v29 = vpop.f32.mrb[49].mxu1 }
 0x726   : > { %v3387_v37 = vadd.f32 %v9664_v50, %v3150_v31  ;;  %v3389_v0 = vadd.f32 %v9667_v28, %v3263_v29  ;;  %v3152_v47 = vpop.f32.mrb[66].mxu0  ;;  %v3265_v51 = vpop.f32.mrb[50].mxu1  ;;  %4309 = vmatprep.mubr.bf16.mxu0 %v9673_v52  ;;  %4406 = vmatprep.mubr.bf16.mxu1 %v9675_v48 }
 0x727   : > { %v3394_v21 = vadd.f32 %v9652_v6, %v3152_v47  ;;  %v3396_v25 = vadd.f32 %v9659_v3, %v3265_v51  ;;  %v3154_v60 = vpop.f32.mrb[67].mxu0  ;;  %v3267_v54 = vpop.f32.mrb[51].mxu1  ;;  %4310 = vmatmul.mubr.bf16.gmra.mrb[124].mxu0 %v9669_v23  ;;  %4407 = vmatmul.mubr.bf16.gmra.mrb[108].mxu1 %v9671_v17  ;;  %v3514_v39 = vmax.f32 %v3386_v4, 0.0  ;;  %v3516_v10 = vmax.f32 %v3388_v14, 0.0 }
 0x728   : > { %v3395_v43 = vadd.f32 %v9664_v50, %v3154_v60  ;;  %v3397_v2 = vadd.f32 %v9667_v28, %v3267_v54  ;;  %v3515_v12 = vmax.f32 %v3387_v37, 0.0  ;;  %v3517_v57 = vmax.f32 %v3389_v0, 0.0  ;;  %v7577_v54 = vld [vmem:[#allocation14 + $0x80] sm:$0xff]  }
 0x729   : > { %v3522_v61 = vmax.f32 %v3394_v21, 0.0  ;;  %v3524_v36 = vmax.f32 %v3396_v25, 0.0  ;;  %v7578_v21 = vld [vmem:[#allocation14 + $0x48] sm:$0xff]  }
 0x72a   : > { %v3523_v15 = vmax.f32 %v3395_v43, 0.0  ;;  %v3525_v31 = vmax.f32 %v3397_v2, 0.0  ;;  %v7580_v25 = vld [vmem:[#allocation14 + $0xc8] sm:$0xff]  }
 0x72b   : > { %v9689_v29 = vpack.c.bf16 %v3522_v61, %v3514_v39  ;;  %v9691_v47 = vpack.c.bf16 %v3524_v36, %v3516_v10 }
 0x72c   : > { %v9693_v51 = vpack.c.bf16 %v3523_v15, %v3515_v12  ;;  %v9695_v53 = vpack.c.bf16 %v3525_v31, %v3517_v57  ;;  %v3158_v13 = vpop.f32.mrb[68].mxu0  ;;  %v3271_v60 = vpop.f32.mrb[52].mxu1  ;;  %v7579_v31 = vld [vmem:[#allocation14 + $0x8] sm:$0xff]  }
 0x72d   : > { %10800 = vst [vmem:[#allocation66_spill] sm:$0xff] %v9689_v29  ;;  %10801 = vst [vmem:[#allocation67_spill] sm:$0xff] %v9691_v47  ;;  %v3402_v4 = vadd.f32 %v9652_v6, %v3158_v13  ;;  %v3404_v14 = vadd.f32 %v9659_v3, %v3271_v60  ;;  %v3160_v37 = vpop.f32.mrb[69].mxu0  ;;  %v3273_v0 = vpop.f32.mrb[53].mxu1  ;;  %v7581_v60 = vld [vmem:[#allocation14 + $0x88] sm:$0xff]  }
 0x72e   : > { %10802 = vst [vmem:[#allocation68_spill] sm:$0xff] %v9695_v53  ;;  %v3403_v43 = vadd.f32 %v9664_v50, %v3160_v37  ;;  %v3405_v2 = vadd.f32 %v9667_v28, %v3273_v0  ;;  %v3162_v39 = vpop.f32.mrb[70].mxu0  ;;  %v3275_v10 = vpop.f32.mrb[54].mxu1  ;;  %4447 = vmatprep.mubr.bf16.mxu0 %v9693_v51  ;;  %4544 = vmatprep.mubr.bf16.mxu1 %v9695_v53 }
 0x72f   : > { %v3410_v61 = vadd.f32 %v9652_v6, %v3162_v39  ;;  %v3412_v13 = vadd.f32 %v9659_v3, %v3275_v10  ;;  %v3164_v36 = vpop.f32.mrb[71].mxu0  ;;  %v3277_v12 = vpop.f32.mrb[55].mxu1  ;;  %4448 = vmatmul.mubr.bf16.vlgmr.msra.gmra.mrb[128].mxu0 %v9689_v29  ;;  %4545 = vmatmul.mubr.bf16.vlgmr.msra.gmra.mrb[112].mxu1 %v9691_v47  ;;  %v3530_v37 = vmax.f32 %v3402_v4, 0.0  ;;  %v3532_v0 = vmax.f32 %v3404_v14, 0.0  ;;  %v7582_v10 = vld [vmem:[#allocation14 + $0x50] sm:$0xff]  }
 0x730   : > { %v3411_v57 = vadd.f32 %v9664_v50, %v3164_v36  ;;  %v3413_v15 = vadd.f32 %v9667_v28, %v3277_v12  ;;  %6884 = vmatpush3.bf16.msra.mxu0 %v7575_v27  ;;  %6948 = vmatpush3.bf16.msra.mxu1 %v7577_v54  ;;  %v3531_v46 = vmax.f32 %v3403_v43, 0.0  ;;  %v3533_v44 = vmax.f32 %v3405_v2, 0.0  ;;  %v7588_v12 = vld [vmem:[#allocation14 + $0xd8] sm:$0xff]  }
 0x731   : > { %v3538_v56 = vmax.f32 %v3410_v61, 0.0  ;;  %v3540_v39 = vmax.f32 %v3412_v13, 0.0  ;;  %6885 = vmatprep.subr.bf16.mxu0 %v7578_v21  ;;  %6949 = vmatprep.subr.bf16.mxu1 %v7580_v25  ;;  %v7583_v21 = vld [vmem:[#allocation14 + $0x10] sm:$0xff]  }
 0x732   : > { %v3539_v29 = vmax.f32 %v3411_v57, 0.0  ;;  %v3541_v47 = vmax.f32 %v3413_v15, 0.0  ;;  %v7585_v25 = vld [vmem:[#allocation14 + $0x90] sm:$0xff]  }
 0x733   : > { %v9709_v53 = vpack.c.bf16 %v3538_v56, %v3530_v37  ;;  %v9711_v36 = vpack.c.bf16 %v3540_v39, %v3532_v0  ;;  %v7586_v56 = vld [vmem:[#allocation14 + $0x58] sm:$0xff]  }
 0x734   : > { %v9713_v27 = vpack.c.bf16 %v3539_v29, %v3531_v46  ;;  %v9715_v54 = vpack.c.bf16 %v3541_v47, %v3533_v44  ;;  %v3168_v4 = vpop.f32.mrb[72].mxu0  ;;  %v3281_v14 = vpop.f32.mrb[56].mxu1  ;;  %6886 = vmatpush3.bf16.msra.mxu0 %v7579_v31  ;;  %6950 = vmatpush3.bf16.msra.mxu1 %v7581_v60  ;;  %v7587_v0 = vld [vmem:[#allocation14 + $0x18] sm:$0xff]  }
 0x735   : > { %10803 = vst [vmem:[#allocation69_spill] sm:$0xff] %v9709_v53  ;;  %10804 = vst [vmem:[#allocation70_spill] sm:$0xff] %v9711_v36  ;;  %v3418_v61 = vadd.f32 %v9652_v6, %v3168_v4  ;;  %v3420_v43 = vadd.f32 %v9659_v3, %v3281_v14  ;;  %v3170_v2 = vpop.f32.mrb[73].mxu0  ;;  %v3283_v13 = vpop.f32.mrb[57].mxu1  ;;  %6887 = vmatprep.subr.bf16.mxu0 %v7582_v10  ;;  %6951 = vmatprep.subr.bf16.mxu1 %v7584_v1  ;;  %v7589_v39 = vld [vmem:[#allocation14 + $0x98] sm:$0xff]  }
 0x736   : > { %10805 = vst [vmem:[#allocation71_spill] sm:$0xff] %v9713_v27  ;;  %10806 = vst [vmem:[#allocation72_spill] sm:$0xff] %v9715_v54  ;;  %v3419_v46 = vadd.f32 %v9664_v50, %v3170_v2  ;;  %v3421_v44 = vadd.f32 %v9667_v28, %v3283_v13  ;;  %v3172_v29 = vpop.f32.mrb[74].mxu0  ;;  %v3285_v47 = vpop.f32.mrb[58].mxu1  ;;  %4455 = vmatprep.mubr.bf16.mxu0 %v9713_v27  ;;  %4552 = vmatprep.mubr.bf16.mxu1 %v9715_v54  ;;  %v7590_v13 = vld [vmem:[#allocation14 + $0x60] sm:$0xff]  }
 0x737   : > { %v3426_v57 = vadd.f32 %v9652_v6, %v3172_v29  ;;  %v3428_v15 = vadd.f32 %v9659_v3, %v3285_v47  ;;  %v3174_v31 = vpop.f32.mrb[75].mxu0  ;;  %v3287_v60 = vpop.f32.mrb[59].mxu1  ;;  %4456 = vmatmul.mubr.bf16.gmra.mrb[132].mxu0 %v9709_v53  ;;  %4553 = vmatmul.mubr.bf16.gmra.mrb[116].mxu1 %v9711_v36  ;;  %v3546_v10 = vmax.f32 %v3418_v61, 0.0  ;;  %v3548_v4 = vmax.f32 %v3420_v43, 0.0  ;;  %v7592_v29 = vld [vmem:[#allocation14 + $0xe0] sm:$0xff]  }
 0x738   : > { %v3427_v1 = vadd.f32 %v9664_v50, %v3174_v31  ;;  %v3429_v37 = vadd.f32 %v9667_v28, %v3287_v60  ;;  %6888 = vmatpush3.bf16.msra.mxu0 %v7583_v21  ;;  %6952 = vmatpush3.bf16.msra.mxu1 %v7585_v25  ;;  %v3547_v47 = vmax.f32 %v3419_v46, 0.0  ;;  %v3549_v53 = vmax.f32 %v3421_v44, 0.0  ;;  %v7594_v60 = vld [vmem:[#allocation14 + $0x68] sm:$0xff]  }
 0x739   : > { %v3554_v14 = vmax.f32 %v3426_v57, 0.0  ;;  %v3556_v2 = vmax.f32 %v3428_v15, 0.0  ;;  %6889 = vmatprep.subr.bf16.mxu0 %v7586_v56  ;;  %6953 = vmatprep.subr.bf16.mxu1 %v7588_v12  ;;  %v7591_v56 = vld [vmem:[#allocation14 + $0x20] sm:$0xff]  }
 0x73a   : > { %v3555_v54 = vmax.f32 %v3427_v1, 0.0  ;;  %v3557_v36 = vmax.f32 %v3429_v37, 0.0  ;;  %v7593_v12 = vld [vmem:[#allocation14 + $0xa0] sm:$0xff]   ;;  %v7596_v1 = vld [vmem:[#allocation14 + $0xe8] sm:$0xff]  }
 0x73b   : > { %v9729_v27 = vpack.c.bf16 %v3554_v14, %v3546_v10  ;;  %v9731_v31 = vpack.c.bf16 %v3556_v2, %v3548_v4 }
 0x73c   : > { %v9733_v21 = vpack.c.bf16 %v3555_v54, %v3547_v47  ;;  %v9735_v25 = vpack.c.bf16 %v3557_v36, %v3549_v53  ;;  %v3178_v61 = vpop.f32.mrb[76].mxu0  ;;  %v3291_v43 = vpop.f32.mrb[60].mxu1  ;;  %6890 = vmatpush3.bf16.msra.mxu0 %v7587_v0  ;;  %6954 = vmatpush3.bf16.msra.mxu1 %v7589_v39 }
 0x73d   : > { %10807 = vst [vmem:[#allocation73_spill] sm:$0xff] %v9729_v27  ;;  %10808 = vst [vmem:[#allocation74_spill] sm:$0xff] %v9731_v31  ;;  %v3434_v57 = vadd.f32 %v9652_v6, %v3178_v61  ;;  %v3436_v46 = vadd.f32 %v9659_v3, %v3291_v43  ;;  %v3180_v44 = vpop.f32.mrb[77].mxu0  ;;  %v3293_v15 = vpop.f32.mrb[61].mxu1  ;;  %6891 = vmatprep.subr.bf16.mxu0 %v7590_v13  ;;  %6955 = vmatprep.subr.bf16.mxu1 %v7592_v29  ;;  %v7595_v13 = vld [vmem:[#allocation14 + $0x28] sm:$0xff]  }
 0x73e   : > { %10809 = vst [vmem:[#allocation75_spill] sm:$0xff] %v9733_v21  ;;  %10810 = vst [vmem:[#allocation76_spill] sm:$0xff] %v9735_v25  ;;  %v3435_v54 = vadd.f32 %v9664_v50, %v3180_v44  ;;  %v3437_v53 = vadd.f32 %v9667_v28, %v3293_v15  ;;  %v3182_v36 = vpop.f32.mrb[78].mxu0  ;;  %v3295_v37 = vpop.f32.mrb[62].mxu1  ;;  %4463 = vmatprep.mubr.bf16.mxu0 %v9733_v21  ;;  %4560 = vmatprep.mubr.bf16.mxu1 %v9735_v25  ;;  %v7597_v29 = vld [vmem:[#allocation14 + $0xa8] sm:$0xff]   ;;  %v7598_v15 = vld [vmem:[#allocation14 + $0x70] sm:$0xff]  }
 0x73f   : > { %v3442_v0 = vadd.f32 %v9652_v6, %v3182_v36  ;;  %v3444_v39 = vadd.f32 %v9659_v3, %v3295_v37  ;;  %v3184_v10 = vpop.f32.mrb[79].mxu0  ;;  %v3297_v4 = vpop.f32.mrb[63].mxu1  ;;  %4464 = vmatmul.mubr.bf16.gmra.mrb[136].mxu0 %v9729_v27  ;;  %4561 = vmatmul.mubr.bf16.gmra.mrb[120].mxu1 %v9731_v31  ;;  %v3562_v47 = vmax.f32 %v3434_v57, 0.0  ;;  %v3564_v61 = vmax.f32 %v3436_v46, 0.0  ;;  %v7600_v36 = vld [vmem:[#allocation14 + $0xf0] sm:$0xff]  }
 0x740   : > { %v3443_v14 = vadd.f32 %v9664_v50, %v3184_v10  ;;  %v3445_v2 = vadd.f32 %v9667_v28, %v3297_v4  ;;  %6892 = vmatpush3.bf16.msra.mxu0 %v7591_v56  ;;  %6956 = vmatpush3.bf16.msra.mxu1 %v7593_v12  ;;  %v3563_v37 = vmax.f32 %v3435_v54, 0.0  ;;  %v3565_v27 = vmax.f32 %v3437_v53, 0.0  ;;  %v7602_v4 = vld [vmem:[#allocation14 + $0x78] sm:$0xff]  }
 0x741   : > { %v3570_v43 = vmax.f32 %v3442_v0, 0.0  ;;  %v3572_v44 = vmax.f32 %v3444_v39, 0.0  ;;  %6893 = vmatprep.subr.bf16.mxu0 %v7594_v60  ;;  %6957 = vmatprep.subr.bf16.mxu1 %v7596_v1  ;;  %v7599_v60 = vld [vmem:[#allocation14 + $0x30] sm:$0xff]  }
 0x742   : > { %v3571_v25 = vmax.f32 %v3443_v14, 0.0  ;;  %v3573_v31 = vmax.f32 %v3445_v2, 0.0  ;;  %v7601_v1 = vld [vmem:[#allocation14 + $0xb0] sm:$0xff]   ;;  %v7604_v14 = vld [vmem:[#allocation14 + $0xf8] sm:$0xff]  }
 0x743   : > { %v9749_v21 = vpack.c.bf16 %v3570_v43, %v3562_v47  ;;  %v9751_v10 = vpack.c.bf16 %v3572_v44, %v3564_v61 }
 0x744   : > { %v9753_v56 = vpack.c.bf16 %v3571_v25, %v3563_v37  ;;  %v9755_v12 = vpack.c.bf16 %v3573_v31, %v3565_v27  ;;  %v3188_v57 = vpop.f32.mrb[80].mxu0  ;;  %v3301_v46 = vpop.f32.mrb[64].mxu1  ;;  %6894 = vmatpush3.bf16.msra.mxu0 %v7595_v13  ;;  %6958 = vmatpush3.bf16.msra.mxu1 %v7597_v29 }
 0x745   : > { %10811 = vst [vmem:[#allocation77_spill] sm:$0xff] %v9749_v21  ;;  %10812 = vst [vmem:[#allocation78_spill] sm:$0xff] %v9751_v10  ;;  %v3450_v0 = vadd.f32 %v9652_v6, %v3188_v57  ;;  %v3452_v54 = vadd.f32 %v9659_v3, %v3301_v46  ;;  %v3190_v53 = vpop.f32.mrb[81].mxu0  ;;  %v3303_v39 = vpop.f32.mrb[65].mxu1  ;;  %6895 = vmatprep.subr.bf16.mxu0 %v7598_v15  ;;  %6959 = vmatprep.subr.bf16.mxu1 %v7600_v36  ;;  %v7603_v15 = vld [vmem:[#allocation14 + $0x38] sm:$0xff]  }
 0x746   : > { %10813 = vst [vmem:[#allocation79_spill] sm:$0xff] %v9753_v56  ;;  %10814 = vst [vmem:[#allocation80_spill] sm:$0xff] %v9755_v12  ;;  %v3451_v25 = vadd.f32 %v9664_v50, %v3190_v53  ;;  %v3453_v27 = vadd.f32 %v9667_v28, %v3303_v39  ;;  %v3192_v31 = vpop.f32.mrb[82].mxu0  ;;  %v3305_v2 = vpop.f32.mrb[66].mxu1  ;;  %4471 = vmatprep.mubr.bf16.mxu0 %v9753_v56  ;;  %4568 = vmatprep.mubr.bf16.mxu1 %v9755_v12  ;;  %v7605_v36 = vld [vmem:[#allocation14 + $0xb8] sm:$0xff]   ;;  %v7606_v39 = vld [vmem:[#allocation14 + $0x140] sm:$0xff]  }
 0x747   : > { %v3458_v13 = vadd.f32 %v9652_v6, %v3192_v31  ;;  %v3460_v29 = vadd.f32 %v9659_v3, %v3305_v2  ;;  %v3194_v47 = vpop.f32.mrb[83].mxu0  ;;  %v3307_v61 = vpop.f32.mrb[67].mxu1  ;;  %4472 = vmatmul.mubr.bf16.gmra.mrb[140].mxu0 %v9749_v21  ;;  %4569 = vmatmul.mubr.bf16.gmra.mrb[124].mxu1 %v9751_v10  ;;  %v3578_v37 = vmax.f32 %v3450_v0, 0.0  ;;  %v3580_v57 = vmax.f32 %v3452_v54, 0.0  ;;  %v7608_v31 = vld [vmem:[#allocation14 + $0x1c0] sm:$0xff]  }
 0x748   : > { %v3459_v43 = vadd.f32 %v9664_v50, %v3194_v47  ;;  %v3461_v44 = vadd.f32 %v9667_v28, %v3307_v61  ;;  %6896 = vmatpush3.bf16.msra.mxu0 %v7599_v60  ;;  %6960 = vmatpush3.bf16.msra.mxu1 %v7601_v1  ;;  %v3579_v2 = vmax.f32 %v3451_v25, 0.0  ;;  %v3581_v21 = vmax.f32 %v3453_v27, 0.0 }
 0x749   : > { %v3586_v46 = vmax.f32 %v3458_v13, 0.0  ;;  %v3588_v53 = vmax.f32 %v3460_v29, 0.0  ;;  %6897 = vmatprep.subr.bf16.mxu0 %v7602_v4  ;;  %6961 = vmatprep.subr.bf16.mxu1 %v7604_v14 }
 0x74a   : > { %v3587_v12 = vmax.f32 %v3459_v43, 0.0  ;;  %v3589_v10 = vmax.f32 %v3461_v44, 0.0 }
 0x74b   : > { %v9769_v56 = vpack.c.bf16 %v3586_v46, %v3578_v37  ;;  %v9771_v47 = vpack.c.bf16 %v3588_v53, %v3580_v57 }
 0x74c   : > { %v9773_v60 = vpack.c.bf16 %v3587_v12, %v3579_v2  ;;  %v9775_v1 = vpack.c.bf16 %v3589_v10, %v3581_v21  ;;  %v3198_v0 = vpop.f32.mrb[84].mxu0  ;;  %v3311_v54 = vpop.f32.mrb[68].mxu1  ;;  %6898 = vmatpush3.bf16.msra.mxu0 %v7603_v15  ;;  %6962 = vmatpush3.bf16.msra.mxu1 %v7605_v36 }
 0x74d   : > { %v3466_v4 = vadd.f32 %v9652_v6, %v3198_v0  ;;  %v3468_v14 = vadd.f32 %v9659_v3, %v3311_v54  ;;  %v3200_v25 = vpop.f32.mrb[85].mxu0  ;;  %v3313_v27 = vpop.f32.mrb[69].mxu1  ;;  %7011 = vmatprep.subr.bf16.mxu0 %v7606_v39  ;;  %7075 = vmatprep.subr.bf16.mxu1 %v7608_v31 }
 0x74e   : > { %v3467_v13 = vadd.f32 %v9664_v50, %v3200_v25  ;;  %v3469_v29 = vadd.f32 %v9667_v28, %v3313_v27  ;;  %v3202_v12 = vpop.f32.mrb[86].mxu0  ;;  %v3315_v61 = vpop.f32.mrb[70].mxu1  ;;  %4479 = vmatprep.mubr.bf16.mxu0 %v9773_v60  ;;  %4576 = vmatprep.mubr.bf16.mxu1 %v9775_v1 }
 0x74f   : > { %v3474_v21 = vadd.f32 %v9652_v6, %v3202_v12  ;;  %v3476_v10 = vadd.f32 %v9659_v3, %v3315_v61  ;;  %v3204_v43 = vpop.f32.mrb[87].mxu0  ;;  %v3317_v44 = vpop.f32.mrb[71].mxu1  ;;  %4480 = vmatmul.mubr.bf16.gmra.mrb[144].mxu0 %v9769_v56  ;;  %4577 = vmatmul.mubr.bf16.gmra.mrb[128].mxu1 %v9771_v47  ;;  %v3594_v37 = vmax.f32 %v3466_v4, 0.0  ;;  %v3596_v57 = vmax.f32 %v3468_v14, 0.0 }
 0x750   : > { %v3475_v15 = vadd.f32 %v9664_v50, %v3204_v43  ;;  %v3477_v36 = vadd.f32 %v9667_v28, %v3317_v44  ;;  %v3595_v39 = vmax.f32 %v3467_v13, 0.0  ;;  %v3597_v31 = vmax.f32 %v3469_v29, 0.0 }
 0x751   : > { %v3602_v46 = vmax.f32 %v3474_v21, 0.0  ;;  %v3604_v53 = vmax.f32 %v3476_v10, 0.0 }
 0x752   : > { %v3603_v2 = vmax.f32 %v3475_v15, 0.0  ;;  %v3605_v0 = vmax.f32 %v3477_v36, 0.0 }
 0x753   : > { %v9789_v54 = vpack.c.bf16 %v3602_v46, %v3594_v37  ;;  %v9791_v25 = vpack.c.bf16 %v3604_v53, %v3596_v57 }
 0x754   : > { %v9793_v27 = vpack.c.bf16 %v3603_v2, %v3595_v39  ;;  %v9795_v12 = vpack.c.bf16 %v3605_v0, %v3597_v31  ;;  %v3208_v61 = vpop.f32.mrb[88].mxu0  ;;  %v3321_v43 = vpop.f32.mrb[72].mxu1 }
 0x755   : > { %10815 = vst [vmem:[#allocation81_spill] sm:$0xff] %v9789_v54  ;;  %10816 = vst [vmem:[#allocation82_spill] sm:$0xff] %v9791_v25  ;;  %v3482_v44 = vadd.f32 %v9652_v6, %v3208_v61  ;;  %v3484_v4 = vadd.f32 %v9659_v3, %v3321_v43  ;;  %v3210_v14 = vpop.f32.mrb[89].mxu0  ;;  %v3323_v21 = vpop.f32.mrb[73].mxu1 }
 0x756   : > { %10817 = vst [vmem:[#allocation83_spill] sm:$0xff] %v9793_v27  ;;  %10818 = vst [vmem:[#allocation84_spill] sm:$0xff] %v9795_v12  ;;  %v3483_v13 = vadd.f32 %v9664_v50, %v3210_v14  ;;  %v3485_v29 = vadd.f32 %v9667_v28, %v3323_v21  ;;  %v3212_v10 = vpop.f32.mrb[90].mxu0  ;;  %v3325_v15 = vpop.f32.mrb[74].mxu1  ;;  %4487 = vmatprep.mubr.bf16.mxu0 %v9793_v27  ;;  %4584 = vmatprep.mubr.bf16.mxu1 %v9795_v12 }
 0x757   : > { %v3490_v36 = vadd.f32 %v9652_v6, %v3212_v10  ;;  %v3492_v37 = vadd.f32 %v9659_v3, %v3325_v15  ;;  %v3214_v57 = vpop.f32.mrb[91].mxu0  ;;  %v3327_v46 = vpop.f32.mrb[75].mxu1  ;;  %4488 = vmatmul.mubr.bf16.gmra.mrb[148].mxu0 %v9789_v54  ;;  %4585 = vmatmul.mubr.bf16.gmra.mrb[132].mxu1 %v9791_v25  ;;  %v3610_v31 = vmax.f32 %v3482_v44, 0.0  ;;  %v3612_v2 = vmax.f32 %v3484_v4, 0.0 }
 0x758   : > { %v3491_v53 = vadd.f32 %v9664_v50, %v3214_v57  ;;  %v3493_v39 = vadd.f32 %v9667_v28, %v3327_v46  ;;  %v3611_v43 = vmax.f32 %v3483_v13, 0.0  ;;  %v3613_v14 = vmax.f32 %v3485_v29, 0.0 }
 0x759   : > { %v3618_v0 = vmax.f32 %v3490_v36, 0.0  ;;  %v3620_v61 = vmax.f32 %v3492_v37, 0.0 }
 0x75a   : > { %v3619_v21 = vmax.f32 %v3491_v53, 0.0  ;;  %v3621_v10 = vmax.f32 %v3493_v39, 0.0 }
 0x75b   : > { %v9809_v12 = vpack.c.bf16 %v3618_v0, %v3610_v31  ;;  %v9811_v15 = vpack.c.bf16 %v3620_v61, %v3612_v2 }
 0x75c   : > { %v9813_v27 = vpack.c.bf16 %v3619_v21, %v3611_v43  ;;  %v9815_v54 = vpack.c.bf16 %v3621_v10, %v3613_v14  ;;  %v3218_v25 = vpop.f32.mrb[92].mxu0  ;;  %v3331_v57 = vpop.f32.mrb[76].mxu1 }
 0x75d   : > { %10819 = vst [vmem:[#allocation85_spill] sm:$0xff] %v9809_v12  ;;  %v3498_v46 = vadd.f32 %v9652_v6, %v3218_v25  ;;  %v3500_v44 = vadd.f32 %v9659_v3, %v3331_v57  ;;  %v3220_v4 = vpop.f32.mrb[93].mxu0  ;;  %v3333_v36 = vpop.f32.mrb[77].mxu1 }
 0x75e   : > { %v3499_v13 = vadd.f32 %v9664_v50, %v3220_v4  ;;  %v3501_v29 = vadd.f32 %v9667_v28, %v3333_v36  ;;  %v3222_v37 = vpop.f32.mrb[94].mxu0  ;;  %v3335_v53 = vpop.f32.mrb[78].mxu1  ;;  %4495 = vmatprep.mubr.bf16.mxu0 %v9813_v27  ;;  %4592 = vmatprep.mubr.bf16.mxu1 %v9815_v54 }
 0x75f   : > { %v3506_v39 = vadd.f32 %v9652_v6, %v3222_v37  ;;  %v3508_v31 = vadd.f32 %v9659_v3, %v3335_v53  ;;  %v3224_v2 = vpop.f32.mrb[95].mxu0  ;;  %v3337_v25 = vpop.f32.mrb[79].mxu1  ;;  %4496 = vmatmul.mubr.bf16.gmra.mrb[152].mxu0 %v9809_v12  ;;  %4593 = vmatmul.mubr.bf16.gmra.mrb[136].mxu1 %v9811_v15  ;;  %v3626_v43 = vmax.f32 %v3498_v46, 0.0  ;;  %v3628_v14 = vmax.f32 %v3500_v44, 0.0  ;;  %v7610_v46 = vld [vmem:[#allocation14 + $0x148] sm:$0xff]  }
 0x760   : > { %v3507_v0 = vadd.f32 %v9664_v50, %v3224_v2  ;;  %v3509_v61 = vadd.f32 %v9667_v28, %v3337_v25  ;;  %v3627_v57 = vmax.f32 %v3499_v13, 0.0  ;;  %v3629_v4 = vmax.f32 %v3501_v29, 0.0  ;;  %v7607_v50 = vld [vmem:[#allocation14 + $0x100] sm:$0xff]   ;;  %v7612_v44 = vld [vmem:[#allocation14 + $0x1c8] sm:$0xff]  }
 0x761   : > { %v3634_v21 = vmax.f32 %v3506_v39, 0.0  ;;  %v3636_v10 = vmax.f32 %v3508_v31, 0.0  ;;  %v7609_v28 = vld [vmem:[#allocation14 + $0x180] sm:$0xff]   ;;  %v7611_v13 = vld [vmem:[#allocation14 + $0x108] sm:$0xff]   ;;  %v7614_v39 = vld [vmem:[#allocation14 + $0x150] sm:$0xff]  }
 0x762   : > { %v3635_v36 = vmax.f32 %v3507_v0, 0.0  ;;  %v3637_v6 = vmax.f32 %v3509_v61, 0.0  ;;  %v7613_v29 = vld [vmem:[#allocation14 + $0x188] sm:$0xff]   ;;  %v7617_v31 = vld [vmem:[#allocation14 + $0x190] sm:$0xff]   ;;  %v7622_v2 = vld [vmem:[#allocation14 + $0x160] sm:$0xff]  }
 0x763   : > { %v9829_v37 = vpack.c.bf16 %v3634_v21, %v3626_v43  ;;  %v9831_v3 = vpack.c.bf16 %v3636_v10, %v3628_v14  ;;  %v7624_v25 = vld [vmem:[#allocation14 + $0x1e0] sm:$0xff]   ;;  %v7630_v43 = vld [vmem:[#allocation14 + $0x170] sm:$0xff]  }
 0x764   : > { %v9833_v53 = vpack.c.bf16 %v3635_v36, %v3627_v57  ;;  %v9835_v12 = vpack.c.bf16 %v3637_v6, %v3629_v4  ;;  %v7623_v0 = vld [vmem:[#allocation14 + $0x120] sm:$0xff]   ;;  %v7632_v14 = vld [vmem:[#allocation14 + $0x1f0] sm:$0xff]  }
 0x765   : > { %v7625_v61 = vld [vmem:[#allocation14 + $0x1a0] sm:$0xff]   ;;  %v7631_v21 = vld [vmem:[#allocation14 + $0x130] sm:$0xff]  }
 0x766   : > { %4503 = vmatprep.mubr.bf16.mxu0 %v9833_v53  ;;  %4600 = vmatprep.mubr.bf16.mxu1 %v9835_v12  ;;  %v7633_v10 = vld [vmem:[#allocation14 + $0x1b0] sm:$0xff]  }
 0x767   : > { %4504 = vmatmul.mubr.bf16.gmra.mrb[156].mxu0 %v9829_v37  ;;  %4601 = vmatmul.mubr.bf16.gmra.mrb[140].mxu1 %v9831_v3 }
 0x768   : > { %5160 = vmatprep.mubr.bf16.mxu0 %v9517_v55  ;;  %5257 = vmatprep.mubr.bf16.mxu1 %v9519_v59  ;;  %v7616_v55 = vld [vmem:[#allocation14 + $0x1d0] sm:$0xff]  }
 0x769   : > { %v7615_v59 = vld [vmem:[#allocation14 + $0x110] sm:$0xff]  }
 0x76f   : > { %5161 = vmatmul.mubr.bf16.vlgmr.msra.gmra.mrb[160].mxu0 %v9513_v22  ;;  %5258 = vmatmul.mubr.bf16.vlgmr.msra.gmra.mrb[144].mxu1 %v9515_v5  ;;  %v7618_v22 = vld [vmem:[#allocation14 + $0x158] sm:$0xff]  }
 0x770   : > { %7012 = vmatpush3.bf16.msra.mxu0 %v7607_v50  ;;  %5168 = vmatprep.mubr.bf16.mxu0 %v9537_v32  ;;  %v7620_v5 = vld [vmem:[#allocation14 + $0x1d8] sm:$0xff]  }
 0x771   : > { %5265 = vmatprep.mubr.bf16.mxu1 %v9539_v45  ;;  %7076 = vmatpush3.bf16.msra.mxu1 %v7609_v28  ;;  %v7619_v32 = vld [vmem:[#allocation14 + $0x118] sm:$0xff]  }
 0x772   : > { %7013 = vmatprep.subr.bf16.mxu0 %v7610_v46  ;;  %7077 = vmatprep.subr.bf16.mxu1 %v7612_v44  ;;  %v7621_v45 = vld [vmem:[#allocation14 + $0x198] sm:$0xff]  }
 0x774   : > { %7014 = vmatpush3.bf16.msra.mxu0 %v7611_v13  ;;  %v10834_v13 = vld [vmem:[#allocation77_spill] sm:$0xff] }
 0x775   : > { %7078 = vmatpush3.bf16.msra.mxu1 %v7613_v29  ;;  %7015 = vmatprep.subr.bf16.mxu0 %v7614_v39  ;;  %v10835_v29 = vld [vmem:[#allocation78_spill] sm:$0xff] }
 0x776   : > { %7079 = vmatprep.subr.bf16.mxu1 %v7616_v55 }
 0x777   : > { %5169 = vmatmul.mubr.bf16.gmra.mrb[164].mxu0 %v9533_v42  ;;  %5266 = vmatmul.mubr.bf16.gmra.mrb[148].mxu1 %v9535_v63  ;;  %v7626_v42 = vld [vmem:[#allocation14 + $0x168] sm:$0xff]  }
 0x778   : > { %5176 = vmatprep.mubr.bf16.mxu0 %v9557_v8  ;;  %5273 = vmatprep.mubr.bf16.mxu1 %v9559_v49  ;;  %v7628_v63 = vld [vmem:[#allocation14 + $0x1e8] sm:$0xff]  }
 0x779   : > { %7016 = vmatpush3.bf16.msra.mxu0 %v7615_v59  ;;  %7080 = vmatpush3.bf16.msra.mxu1 %v7617_v31  ;;  %v7627_v8 = vld [vmem:[#allocation14 + $0x128] sm:$0xff]  }
 0x77a   : > { %7017 = vmatprep.subr.bf16.mxu0 %v7618_v22  ;;  %7081 = vmatprep.subr.bf16.mxu1 %v7620_v5  ;;  %v7629_v49 = vld [vmem:[#allocation14 + $0x1a8] sm:$0xff]  }
 0x77d   : > { %7018 = vmatpush3.bf16.msra.mxu0 %v7619_v32  ;;  %7082 = vmatpush3.bf16.msra.mxu1 %v7621_v45 }
 0x77e   : > { %7019 = vmatprep.subr.bf16.mxu0 %v7622_v2  ;;  %7083 = vmatprep.subr.bf16.mxu1 %v7624_v25 }
 0x77f   : > { %5177 = vmatmul.mubr.bf16.gmra.mrb[168].mxu0 %v9553_v34  ;;  %5274 = vmatmul.mubr.bf16.gmra.mrb[152].mxu1 %v9555_v16  ;;  %v7634_v34 = vld [vmem:[#allocation14 + $0x178] sm:$0xff]  }
 0x780   : > { %5184 = vmatprep.mubr.bf16.mxu0 %v9577_v26  ;;  %5281 = vmatprep.mubr.bf16.mxu1 %v9579_v38  ;;  %v7636_v16 = vld [vmem:[#allocation14 + $0x1f8] sm:$0xff]  }
 0x781   : > { %7020 = vmatpush3.bf16.msra.mxu0 %v7623_v0  ;;  %7084 = vmatpush3.bf16.msra.mxu1 %v7625_v61  ;;  %v7635_v26 = vld [vmem:[#allocation14 + $0x138] sm:$0xff]  }
 0x782   : > { %7021 = vmatprep.subr.bf16.mxu0 %v7626_v42  ;;  %7085 = vmatprep.subr.bf16.mxu1 %v7628_v63  ;;  %v7637_v38 = vld [vmem:[#allocation14 + $0x1b8] sm:$0xff]  }
 0x785   : > { %7022 = vmatpush3.bf16.msra.mxu0 %v7627_v8  ;;  %7086 = vmatpush3.bf16.msra.mxu1 %v7629_v49 }
 0x786   : > { %7023 = vmatprep.subr.bf16.mxu0 %v7630_v43  ;;  %7087 = vmatprep.subr.bf16.mxu1 %v7632_v14  ;;  %v10836_v43 = vld [vmem:[#allocation83_spill] sm:$0xff]  ;;  %v10837_v14 = vld [vmem:[#allocation84_spill] sm:$0xff] }
 0x787   : > { %5185 = vmatmul.mubr.bf16.gmra.mrb[172].mxu0 %v9573_v40  ;;  %5282 = vmatmul.mubr.bf16.gmra.mrb[156].mxu1 %v9575_v20  ;;  %v10820_v40 = vld [vmem:[#allocation68_spill] sm:$0xff]  ;;  %v10823_v20 = vld [vmem:[#allocation71_spill] sm:$0xff] }
 0x788   : > { %5192 = vmatprep.mubr.bf16.mxu0 %v9597_v33  ;;  %5289 = vmatprep.mubr.bf16.mxu1 %v9599_v41  ;;  %v10827_v33 = vld [vmem:[#allocation75_spill] sm:$0xff]  ;;  %v10828_v41 = vld [vmem:[#allocation76_spill] sm:$0xff] }
 0x789   : > { %7024 = vmatpush3.bf16.msra.mxu0 %v7631_v21  ;;  %7088 = vmatpush3.bf16.msra.mxu1 %v7633_v10 }
 0x78a   : > { %7025 = vmatprep.subr.bf16.mxu0 %v7634_v34  ;;  %7089 = vmatprep.subr.bf16.mxu1 %v7636_v16 }
 0x78d   : > { %7026 = vmatpush3.bf16.msra.mxu0 %v7635_v26  ;;  %7090 = vmatpush3.bf16.msra.mxu1 %v7637_v38 }
 0x78f   : > { %5193 = vmatmul.mubr.bf16.gmra.mrb[176].mxu0 %v9593_v62  ;;  %5290 = vmatmul.mubr.bf16.gmra.mrb[160].mxu1 %v9595_v35  ;;  %v10821_v62 = vld [vmem:[#allocation66_spill] sm:$0xff] }
 0x790   : > { %5200 = vmatprep.mubr.bf16.mxu0 %v9617_v7  ;;  %5297 = vmatprep.mubr.bf16.mxu1 %v9619_v19  ;;  %v10826_v35 = vld [vmem:[#allocation70_spill] sm:$0xff]  ;;  %v10832_v7 = vld [vmem:[#allocation80_spill] sm:$0xff] }
 0x797   : > { %5201 = vmatmul.mubr.bf16.gmra.mrb[180].mxu0 %v9613_v30  ;;  %5298 = vmatmul.mubr.bf16.gmra.mrb[164].mxu1 %v9615_v9  ;;  %v10830_v30 = vld [vmem:[#allocation74_spill] sm:$0xff]  ;;  %v10831_v9 = vld [vmem:[#allocation79_spill] sm:$0xff] }
 0x798   : > { %5208 = vmatprep.mubr.bf16.mxu0 %v9639_v11  ;;  %5305 = vmatprep.mubr.bf16.mxu1 %v9641_v24  ;;  %v10822_v11 = vld [vmem:[#allocation67_spill] sm:$0xff] }
 0x79f   : > { %5209 = vmatmul.mubr.bf16.gmra.mrb[184].mxu0 %v9634_v18  ;;  %5306 = vmatmul.mubr.bf16.gmra.mrb[168].mxu1 %v9636_v58  ;;  %v10824_v18 = vld [vmem:[#allocation72_spill] sm:$0xff]  ;;  %v10825_v58 = vld [vmem:[#allocation69_spill] sm:$0xff] }
 0x7a0   : > { %5216 = vmatprep.mubr.bf16.mxu0 %v9673_v52  ;;  %5313 = vmatprep.mubr.bf16.mxu1 %v9675_v48 }
 0x7a7   : > { %5217 = vmatmul.mubr.bf16.gmra.mrb[188].mxu0 %v9669_v23  ;;  %5314 = vmatmul.mubr.bf16.gmra.mrb[172].mxu1 %v9671_v17  ;;  %v10829_v17 = vld [vmem:[#allocation73_spill] sm:$0xff]  ;;  %v9890_v23 = vld [vmem:[%s10833_s0] ss:$0 sm:$0xff] }
 0x7a8   : > { %5354 = vmatprep.mubr.bf16.mxu0 %v9693_v51  ;;  %5451 = vmatprep.mubr.bf16.mxu1 %v10820_v40 }
 0x7af   : > { %5355 = vmatmul.mubr.bf16.vlgmr.msra.gmra.mrb[192].mxu0 %v10821_v62  ;;  %5452 = vmatmul.mubr.bf16.vlgmr.msra.gmra.mrb[176].mxu1 %v10822_v11 }
 0x7b0   : > { %5362 = vmatprep.mubr.bf16.mxu0 %v10823_v20  ;;  %5459 = vmatprep.mubr.bf16.mxu1 %v10824_v18 }
 0x7b7   : > { %5363 = vmatmul.mubr.bf16.gmra.mrb[196].mxu0 %v10825_v58  ;;  %5460 = vmatmul.mubr.bf16.gmra.mrb[180].mxu1 %v10826_v35  ;;  %v10838_v35 = vld [vmem:[#allocation81_spill] sm:$0xff] }
 0x7b8   : > { %5370 = vmatprep.mubr.bf16.mxu0 %v10827_v33  ;;  %5467 = vmatprep.mubr.bf16.mxu1 %v10828_v41  ;;  %v10839_v33 = vld [vmem:[#allocation82_spill] sm:$0xff] }
 0x7bf   : > { %5371 = vmatmul.mubr.bf16.gmra.mrb[200].mxu0 %v10829_v17  ;;  %5468 = vmatmul.mubr.bf16.gmra.mrb[184].mxu1 %v10830_v30 }
 0x7c0   : > { %5378 = vmatprep.mubr.bf16.mxu0 %v10831_v9  ;;  %5475 = vmatprep.mubr.bf16.mxu1 %v10832_v7 }
 0x7c2   : > { %v6643_v19 = vpop.f32.mrb[96].mxu0  ;;  %v6707_v24 = vpop.f32.mrb[80].mxu1 }
 0x7c3   : > { %v6644_v52 = vpop.f32.mrb[97].mxu0  ;;  %v6708_v48 = vpop.f32.mrb[81].mxu1 }
 0x7c4   : > { %v6645_v51 = vadd.f32 %v6644_v52, %v6643_v19  ;;  %v6709_v57 = vadd.f32 %v6708_v48, %v6707_v24  ;;  %v6646_v4 = vpop.f32.mrb[98].mxu0  ;;  %v6710_v36 = vpop.f32.mrb[82].mxu1 }
 0x7c5   : > { %v6647_v6 = vpop.f32.mrb[99].mxu0  ;;  %v6711_v50 = vpop.f32.mrb[83].mxu1 }
 0x7c6   : > { %v4256_v28 = vadd.f32 %v6645_v51, %v9890_v23  ;;  %v6648_v46 = vadd.f32 %v6647_v6, %v6646_v4  ;;  %v6712_v44 = vadd.f32 %v6711_v50, %v6710_v36 }
 0x7c7   : > { %5379 = vmatmul.mubr.bf16.gmra.mrb[204].mxu0 %v10834_v13  ;;  %5476 = vmatmul.mubr.bf16.gmra.mrb[188].mxu1 %v10835_v29 }
 0x7c8   : > { %v9895_v39 = vadd.f32 %v6709_v57, %v4256_v28  ;;  %v4259_v55 = vadd.f32 %v6648_v46, %v9890_v23  ;;  %5386 = vmatprep.mubr.bf16.mxu0 %v9773_v60  ;;  %5483 = vmatprep.mubr.bf16.mxu1 %v9775_v1  ;;  %v10840_v46 = vld [vmem:[#allocation85_spill] sm:$0xff] }
 0x7ca   : > { %v9900_v59 = vadd.f32 %v6712_v44, %v4259_v55  ;;  %v6649_v31 = vpop.f32.mrb[100].mxu0  ;;  %v6713_v22 = vpop.f32.mrb[84].mxu1 }
 0x7cb   : > { %v6650_v5 = vpop.f32.mrb[101].mxu0  ;;  %v6714_v32 = vpop.f32.mrb[85].mxu1 }
 0x7cc   : > { %v6651_v45 = vadd.f32 %v6650_v5, %v6649_v31  ;;  %v6715_v2 = vadd.f32 %v6714_v32, %v6713_v22  ;;  %v6652_v25 = vpop.f32.mrb[102].mxu0  ;;  %v6716_v0 = vpop.f32.mrb[86].mxu1 }
 0x7cd   : > { %v6653_v61 = vpop.f32.mrb[103].mxu0  ;;  %v6717_v42 = vpop.f32.mrb[87].mxu1 }
 0x7ce   : > { %v4264_v63 = vadd.f32 %v6651_v45, %v9890_v23  ;;  %v6654_v8 = vadd.f32 %v6653_v61, %v6652_v25  ;;  %v6718_v49 = vadd.f32 %v6717_v42, %v6716_v0 }
 0x7cf   : > { %5387 = vmatmul.mubr.bf16.gmra.mrb[208].mxu0 %v9769_v56  ;;  %5484 = vmatmul.mubr.bf16.gmra.mrb[192].mxu1 %v9771_v47 }
 0x7d0   : > { %v9905_v60 = vadd.f32 %v6715_v2, %v4264_v63  ;;  %v4267_v1 = vadd.f32 %v6654_v8, %v9890_v23  ;;  %5394 = vmatprep.mubr.bf16.mxu0 %v10836_v43  ;;  %5491 = vmatprep.mubr.bf16.mxu1 %v10837_v14 }
 0x7d2   : > { %v9910_v21 = vadd.f32 %v6718_v49, %v4267_v1  ;;  %v6655_v10 = vpop.f32.mrb[104].mxu0  ;;  %v6719_v34 = vpop.f32.mrb[88].mxu1 }
 0x7d3   : > { %v6656_v16 = vpop.f32.mrb[105].mxu0  ;;  %v6720_v26 = vpop.f32.mrb[89].mxu1 }
 0x7d4   : > { %v6657_v38 = vadd.f32 %v6656_v16, %v6655_v10  ;;  %v6721_v40 = vadd.f32 %v6720_v26, %v6719_v34  ;;  %v6658_v62 = vpop.f32.mrb[106].mxu0  ;;  %v6722_v56 = vpop.f32.mrb[90].mxu1 }
 0x7d5   : > { %v6659_v11 = vpop.f32.mrb[107].mxu0  ;;  %v6723_v47 = vpop.f32.mrb[91].mxu1 }
 0x7d6   : > { %v4272_v20 = vadd.f32 %v6657_v38, %v9890_v23  ;;  %v6660_v18 = vadd.f32 %v6659_v11, %v6658_v62  ;;  %v6724_v58 = vadd.f32 %v6723_v47, %v6722_v56 }
 0x7d7   : > { %5395 = vmatmul.mubr.bf16.gmra.mrb[212].mxu0 %v10838_v35  ;;  %5492 = vmatmul.mubr.bf16.gmra.mrb[196].mxu1 %v10839_v33 }
 0x7d8   : > { %v9915_v41 = vadd.f32 %v6721_v40, %v4272_v20  ;;  %v4275_v17 = vadd.f32 %v6660_v18, %v9890_v23  ;;  %5402 = vmatprep.mubr.bf16.mxu0 %v9813_v27  ;;  %5499 = vmatprep.mubr.bf16.mxu1 %v9815_v54 }
 0x7da   : > { %v9920_v30 = vadd.f32 %v6724_v58, %v4275_v17  ;;  %v6661_v9 = vpop.f32.mrb[108].mxu0  ;;  %v6725_v7 = vpop.f32.mrb[92].mxu1 }
 0x7db   : > { %v6662_v19 = vpop.f32.mrb[109].mxu0  ;;  %v6726_v24 = vpop.f32.mrb[93].mxu1 }
 0x7dc   : > { %v6663_v52 = vadd.f32 %v6662_v19, %v6661_v9  ;;  %v6727_v48 = vadd.f32 %v6726_v24, %v6725_v7  ;;  %v6664_v51 = vpop.f32.mrb[110].mxu0  ;;  %v6728_v57 = vpop.f32.mrb[94].mxu1 }
 0x7dd   : > { %v6665_v4 = vpop.f32.mrb[111].mxu0  ;;  %v6729_v36 = vpop.f32.mrb[95].mxu1 }
 0x7de   : > { %v4280_v6 = vadd.f32 %v6663_v52, %v9890_v23  ;;  %v6666_v50 = vadd.f32 %v6665_v4, %v6664_v51  ;;  %v6730_v28 = vadd.f32 %v6729_v36, %v6728_v57 }
 0x7df   : > { %5403 = vmatmul.mubr.bf16.gmra.mrb[216].mxu0 %v10840_v46  ;;  %5500 = vmatmul.mubr.bf16.gmra.mrb[200].mxu1 %v9811_v15 }
 0x7e0   : > { %v9925_v54 = vadd.f32 %v6727_v48, %v4280_v6  ;;  %v4283_v27 = vadd.f32 %v6666_v50, %v9890_v23  ;;  %5410 = vmatprep.mubr.bf16.mxu0 %v9833_v53  ;;  %5507 = vmatprep.mubr.bf16.mxu1 %v9835_v12 }
 0x7e2   : > { %v9930_v44 = vadd.f32 %v6730_v28, %v4283_v27  ;;  %v6667_v13 = vpop.f32.mrb[112].mxu0  ;;  %v6731_v29 = vpop.f32.mrb[96].mxu1 }
 0x7e3   : > { %v6668_v55 = vpop.f32.mrb[113].mxu0  ;;  %v6732_v31 = vpop.f32.mrb[97].mxu1 }
 0x7e4   : > { %v6669_v22 = vadd.f32 %v6668_v55, %v6667_v13  ;;  %v6733_v5 = vadd.f32 %v6732_v31, %v6731_v29  ;;  %v6670_v32 = vpop.f32.mrb[114].mxu0  ;;  %v6734_v45 = vpop.f32.mrb[98].mxu1 }
 0x7e5   : > { %v6671_v2 = vpop.f32.mrb[115].mxu0  ;;  %v6735_v15 = vpop.f32.mrb[99].mxu1 }
 0x7e6   : > { %v4288_v25 = vadd.f32 %v6669_v22, %v9890_v23  ;;  %v6672_v0 = vadd.f32 %v6671_v2, %v6670_v32  ;;  %v6736_v61 = vadd.f32 %v6735_v15, %v6734_v45 }
 0x7e7   : > { %5411 = vmatmul.mubr.bf16.gmra.mrb[220].mxu0 %v9829_v37  ;;  %5508 = vmatmul.mubr.bf16.gmra.mrb[204].mxu1 %v9831_v3 }
 0x7e8   : > { %v9935_v12 = vadd.f32 %v6733_v5, %v4288_v25  ;;  %v4291_v53 = vadd.f32 %v6672_v0, %v9890_v23 }
 0x7ea   : > { %v9938_v42 = vadd.f32 %v6736_v61, %v4291_v53  ;;  %v6673_v63 = vpop.f32.mrb[116].mxu0  ;;  %v6737_v8 = vpop.f32.mrb[100].mxu1 }
 0x7eb   : > { %v6674_v49 = vpop.f32.mrb[117].mxu0  ;;  %v6738_v1 = vpop.f32.mrb[101].mxu1 }
 0x7ec   : > { %v6675_v43 = vadd.f32 %v6674_v49, %v6673_v63  ;;  %v6739_v14 = vadd.f32 %v6738_v1, %v6737_v8  ;;  %v6676_v10 = vpop.f32.mrb[118].mxu0  ;;  %v6740_v34 = vpop.f32.mrb[102].mxu1 }
 0x7ed   : > { %v6677_v16 = vpop.f32.mrb[119].mxu0  ;;  %v6741_v26 = vpop.f32.mrb[103].mxu1 }
 0x7ee   : > { %v4296_v37 = vadd.f32 %v6675_v43, %v9890_v23  ;;  %v6678_v38 = vadd.f32 %v6677_v16, %v6676_v10  ;;  %v6742_v3 = vadd.f32 %v6741_v26, %v6740_v34 }
 0x7f0   : > { %v9941_v40 = vadd.f32 %v6739_v14, %v4296_v37  ;;  %v4299_v62 = vadd.f32 %v6678_v38, %v9890_v23 }
 0x7f2   : > { %v9944_v56 = vadd.f32 %v6742_v3, %v4299_v62  ;;  %v6679_v11 = vpop.f32.mrb[120].mxu0  ;;  %v6743_v47 = vpop.f32.mrb[104].mxu1  ;;  %v10841_v3 = vld [vmem:[#allocation50_spill] sm:$0xff] }
 0x7f3   : > { %v6680_v20 = vpop.f32.mrb[121].mxu0  ;;  %v6744_v18 = vpop.f32.mrb[105].mxu1 }
 0x7f4   : > { %v6681_v58 = vadd.f32 %v6680_v20, %v6679_v11  ;;  %v6745_v35 = vadd.f32 %v6744_v18, %v6743_v47  ;;  %v6682_v33 = vpop.f32.mrb[122].mxu0  ;;  %v6746_v17 = vpop.f32.mrb[106].mxu1 }
 0x7f5   : > { %v6683_v9 = vpop.f32.mrb[123].mxu0  ;;  %v6747_v7 = vpop.f32.mrb[107].mxu1 }
 0x7f6   : > { %v4304_v19 = vadd.f32 %v6681_v58, %v9890_v23  ;;  %v6684_v24 = vadd.f32 %v6683_v9, %v6682_v33  ;;  %v6748_v52 = vadd.f32 %v6747_v7, %v6746_v17 }
 0x7f8   : > { %v9947_v48 = vadd.f32 %v6745_v35, %v4304_v19  ;;  %v4307_v51 = vadd.f32 %v6684_v24, %v9890_v23 }
 0x7fa   : > { %v9950_v57 = vadd.f32 %v6748_v52, %v4307_v51  ;;  %v6685_v4 = vpop.f32.mrb[124].mxu0  ;;  %v6749_v36 = vpop.f32.mrb[108].mxu1 }
 0x7fb   : > { %v6686_v6 = vpop.f32.mrb[125].mxu0  ;;  %v6750_v50 = vpop.f32.mrb[109].mxu1 }
 0x7fc   : > { %v6687_v28 = vadd.f32 %v6686_v6, %v6685_v4  ;;  %v6751_v46 = vadd.f32 %v6750_v50, %v6749_v36  ;;  %v6688_v27 = vpop.f32.mrb[126].mxu0  ;;  %v6752_v13 = vpop.f32.mrb[110].mxu1  ;;  %v10843_v6 = vld [vmem:[#allocation52_spill] sm:$0xff] }
 0x7fd   : > { %v6689_v29 = vpop.f32.mrb[127].mxu0  ;;  %v6753_v55 = vpop.f32.mrb[111].mxu1 }
 0x7fe   : > { %v4312_v31 = vadd.f32 %v6687_v28, %v9890_v23  ;;  %v6690_v22 = vadd.f32 %v6689_v29, %v6688_v27  ;;  %v6754_v5 = vadd.f32 %v6753_v55, %v6752_v13 }
 0x800   : > { %v9953_v32 = vadd.f32 %v6751_v46, %v4312_v31  ;;  %v4315_v45 = vadd.f32 %v6690_v22, %v9890_v23 }
 0x802   : > { %v9956_v2 = vadd.f32 %v6754_v5, %v4315_v45  ;;  %v6771_v15 = vpop.f32.mrb[128].mxu0  ;;  %v6835_v25 = vpop.f32.mrb[112].mxu1 }
 0x803   : > { %v6772_v0 = vpop.f32.mrb[129].mxu0  ;;  %v6836_v61 = vpop.f32.mrb[113].mxu1 }
 0x804   : > { %v6773_v53 = vadd.f32 %v6772_v0, %v6771_v15  ;;  %v6837_v63 = vadd.f32 %v6836_v61, %v6835_v25  ;;  %v6774_v8 = vpop.f32.mrb[130].mxu0  ;;  %v6838_v49 = vpop.f32.mrb[114].mxu1 }
 0x805   : > { %v6775_v1 = vpop.f32.mrb[131].mxu0  ;;  %v6839_v43 = vpop.f32.mrb[115].mxu1 }
 0x806   : > { %v4450_v14 = vadd.f32 %v6773_v53, %v9895_v39  ;;  %v6776_v10 = vadd.f32 %v6775_v1, %v6774_v8  ;;  %v6840_v34 = vadd.f32 %v6839_v43, %v6838_v49  ;;  %v10842_v39 = vld [vmem:[#allocation51_spill] sm:$0xff]  ;;  %v10845_v8 = vld [vmem:[#allocation54_spill] sm:$0xff] }
 0x808   : > { %v4547_v16 = vadd.f32 %v6837_v63, %v4450_v14  ;;  %v4453_v26 = vadd.f32 %v6776_v10, %v9900_v59 }
 0x80a   : > { %v4550_v23 = vadd.f32 %v6840_v34, %v4453_v26  ;;  %v6777_v37 = vpop.f32.mrb[132].mxu0  ;;  %v6841_v38 = vpop.f32.mrb[116].mxu1  ;;  %v9961_v62 = vadd.f32 %v4547_v16, %v10841_v3 }
 0x80b   : > { %v6778_v11 = vpop.f32.mrb[133].mxu0  ;;  %v6842_v47 = vpop.f32.mrb[117].mxu1 }
 0x80c   : > { %v6779_v20 = vadd.f32 %v6778_v11, %v6777_v37  ;;  %v6843_v18 = vadd.f32 %v6842_v47, %v6841_v38  ;;  %v6780_v58 = vpop.f32.mrb[134].mxu0  ;;  %v6844_v35 = vpop.f32.mrb[118].mxu1  ;;  %5548 = vadd.xlane.f32.xlu0 %v9961_v62  ;;  %v9965_v33 = vadd.f32 %v4550_v23, %v10842_v39 }
 0x80d   : > { %v6781_v17 = vpop.f32.mrb[135].mxu0  ;;  %v6845_v9 = vpop.f32.mrb[119].mxu1 }
 0x80e   : > { %v4458_v59 = vadd.f32 %v6779_v20, %v9905_v60  ;;  %v6782_v7 = vadd.f32 %v6781_v17, %v6780_v58  ;;  %v6846_v19 = vadd.f32 %v6845_v9, %v6844_v35  ;;  %5550 = vadd.xlane.f32.xlu1 %v9965_v33  ;;  %v10844_v60 = vld [vmem:[#allocation53_spill] sm:$0xff]  ;;  %v10847_v35 = vld [vmem:[#allocation56_spill] sm:$0xff] }
 0x810   : > { %v4555_v24 = vadd.f32 %v6843_v18, %v4458_v59  ;;  %v4461_v52 = vadd.f32 %v6782_v7, %v9910_v21 }
 0x812   : > { %v4558_v51 = vadd.f32 %v6846_v19, %v4461_v52  ;;  %v6783_v4 = vpop.f32.mrb[136].mxu0  ;;  %v6847_v36 = vpop.f32.mrb[120].mxu1  ;;  %v9971_v50 = vadd.f32 %v4555_v24, %v10843_v6 }
 0x813   : > { %v6784_v28 = vpop.f32.mrb[137].mxu0  ;;  %v6848_v46 = vpop.f32.mrb[121].mxu1 }
 0x814   : > { %v6785_v27 = vadd.f32 %v6784_v28, %v6783_v4  ;;  %v6849_v13 = vadd.f32 %v6848_v46, %v6847_v36  ;;  %v6786_v29 = vpop.f32.mrb[138].mxu0  ;;  %v6850_v55 = vpop.f32.mrb[122].mxu1  ;;  %5552 = vadd.xlane.f32.xlu0 %v9971_v50  ;;  %v9975_v31 = vadd.f32 %v4558_v51, %v10844_v60 }
 0x815   : > { %v6787_v22 = vpop.f32.mrb[139].mxu0  ;;  %v6851_v5 = vpop.f32.mrb[123].mxu1 }
 0x816   : > { %v4466_v21 = vadd.f32 %v6785_v27, %v9915_v41  ;;  %v6788_v45 = vadd.f32 %v6787_v22, %v6786_v29  ;;  %v6852_v15 = vadd.f32 %v6851_v5, %v6850_v55  ;;  %5554 = vadd.xlane.f32.xlu1 %v9975_v31  ;;  %v10846_v41 = vld [vmem:[#allocation55_spill] sm:$0xff]  ;;  %v10849_v55 = vld [vmem:[#allocation58_spill] sm:$0xff] }
 0x818   : > { %v4563_v25 = vadd.f32 %v6849_v13, %v4466_v21  ;;  %v4469_v0 = vadd.f32 %v6788_v45, %v9920_v30 }
 0x81a   : > { %v4566_v61 = vadd.f32 %v6852_v15, %v4469_v0  ;;  %v6789_v53 = vpop.f32.mrb[140].mxu0  ;;  %v6853_v63 = vpop.f32.mrb[124].mxu1  ;;  %v9981_v49 = vadd.f32 %v4563_v25, %v10845_v8 }
 0x81b   : > { %v6790_v1 = vpop.f32.mrb[141].mxu0  ;;  %v6854_v43 = vpop.f32.mrb[125].mxu1 }
 0x81c   : > { %v6791_v14 = vadd.f32 %v6790_v1, %v6789_v53  ;;  %v6855_v10 = vadd.f32 %v6854_v43, %v6853_v63  ;;  %v6792_v34 = vpop.f32.mrb[142].mxu0  ;;  %v6856_v16 = vpop.f32.mrb[126].mxu1  ;;  %5556 = vadd.xlane.f32.xlu0 %v9981_v49  ;;  %v9985_v26 = vadd.f32 %v4566_v61, %v10846_v41 }
 0x81d   : > { %v6793_v23 = vpop.f32.mrb[143].mxu0  ;;  %v6857_v37 = vpop.f32.mrb[127].mxu1 }
 0x81e   : > { %v4474_v30 = vadd.f32 %v6791_v14, %v9925_v54  ;;  %v6794_v38 = vadd.f32 %v6793_v23, %v6792_v34  ;;  %v6858_v3 = vadd.f32 %v6857_v37, %v6856_v16  ;;  %5558 = vadd.xlane.f32.xlu1 %v9985_v26  ;;  %v10848_v54 = vld [vmem:[#allocation57_spill] sm:$0xff]  ;;  %v10851_v16 = vld [vmem:[#allocation60_spill] sm:$0xff] }
 0x820   : > { %v4571_v11 = vadd.f32 %v6855_v10, %v4474_v30  ;;  %v4477_v47 = vadd.f32 %v6794_v38, %v9930_v44 }
 0x822   : > { %v4574_v20 = vadd.f32 %v6858_v3, %v4477_v47  ;;  %v6795_v18 = vpop.f32.mrb[144].mxu0  ;;  %v6859_v58 = vpop.f32.mrb[128].mxu1  ;;  %v9991_v39 = vadd.f32 %v4571_v11, %v10847_v35 }
 0x823   : > { %v6796_v17 = vpop.f32.mrb[145].mxu0  ;;  %v6860_v9 = vpop.f32.mrb[129].mxu1 }
 0x824   : > { %v6797_v59 = vadd.f32 %v6796_v17, %v6795_v18  ;;  %v6861_v7 = vadd.f32 %v6860_v9, %v6859_v58  ;;  %v6798_v19 = vpop.f32.mrb[146].mxu0  ;;  %v6862_v24 = vpop.f32.mrb[130].mxu1  ;;  %5560 = vadd.xlane.f32.xlu0 %v9991_v39  ;;  %v9995_v52 = vadd.f32 %v4574_v20, %v10848_v54 }
 0x825   : > { %v6799_v51 = vpop.f32.mrb[147].mxu0  ;;  %v6863_v4 = vpop.f32.mrb[131].mxu1 }
 0x826   : > { %v4482_v44 = vadd.f32 %v6797_v59, %v9935_v12  ;;  %v6800_v36 = vadd.f32 %v6799_v51, %v6798_v19  ;;  %v6864_v6 = vadd.f32 %v6863_v4, %v6862_v24  ;;  %5562 = vadd.xlane.f32.xlu1 %v9995_v52  ;;  %v10850_v12 = vld [vmem:[#allocation59_spill] sm:$0xff]  ;;  %v10853_v24 = vld [vmem:[#allocation62_spill] sm:$0xff] }
 0x828   : > { %v4579_v28 = vadd.f32 %v6861_v7, %v4482_v44  ;;  %v4485_v46 = vadd.f32 %v6800_v36, %v9938_v42 }
 0x82a   : > { %v4582_v27 = vadd.f32 %v6864_v6, %v4485_v46  ;;  %v6801_v13 = vpop.f32.mrb[148].mxu0  ;;  %v6865_v29 = vpop.f32.mrb[132].mxu1  ;;  %v10001_v60 = vadd.f32 %v4579_v28, %v10849_v55  ;;  %v10854_v28 = vld [vmem:[#allocation63_spill] sm:$0xff] }
 0x82b   : > { %v6802_v22 = vpop.f32.mrb[149].mxu0  ;;  %v6866_v5 = vpop.f32.mrb[133].mxu1 }
 0x82c   : > { %v6803_v21 = vadd.f32 %v6802_v22, %v6801_v13  ;;  %v6867_v45 = vadd.f32 %v6866_v5, %v6865_v29  ;;  %v6804_v15 = vpop.f32.mrb[150].mxu0  ;;  %v6868_v25 = vpop.f32.mrb[134].mxu1  ;;  %5564 = vadd.xlane.f32.xlu0 %v10001_v60  ;;  %v10005_v0 = vadd.f32 %v4582_v27, %v10850_v12 }
 0x82d   : > { %v6805_v61 = vpop.f32.mrb[151].mxu0  ;;  %v6869_v53 = vpop.f32.mrb[135].mxu1 }
 0x82e   : > { %v4490_v42 = vadd.f32 %v6803_v21, %v9941_v40  ;;  %v6806_v63 = vadd.f32 %v6805_v61, %v6804_v15  ;;  %v6870_v8 = vadd.f32 %v6869_v53, %v6868_v25  ;;  %5566 = vadd.xlane.f32.xlu1 %v10005_v0  ;;  %v10852_v40 = vld [vmem:[#allocation61_spill] sm:$0xff]  ;;  %v10855_v25 = vld [vmem:[#allocation64_spill] sm:$0xff]  ;;  %v10036_v61 = vld [vmem:[%s10856_s4] ss:$0 sm:$0xff] }
 0x830   : > { %v4587_v1 = vadd.f32 %v6867_v45, %v4490_v42  ;;  %v4493_v43 = vadd.f32 %v6806_v63, %v9944_v56 }
 0x832   : > { %v4590_v14 = vadd.f32 %v6870_v8, %v4493_v43  ;;  %v6807_v10 = vpop.f32.mrb[152].mxu0  ;;  %v6871_v34 = vpop.f32.mrb[136].mxu1  ;;  %v10011_v41 = vadd.f32 %v4587_v1, %v10851_v16 }
 0x833   : > { %v6808_v23 = vpop.f32.mrb[153].mxu0  ;;  %v6872_v37 = vpop.f32.mrb[137].mxu1 }
 0x834   : > { %v6809_v30 = vadd.f32 %v6808_v23, %v6807_v10  ;;  %v6873_v38 = vadd.f32 %v6872_v37, %v6871_v34  ;;  %v6810_v3 = vpop.f32.mrb[154].mxu0  ;;  %v6874_v11 = vpop.f32.mrb[138].mxu1  ;;  %5568 = vadd.xlane.f32.xlu0 %v10011_v41  ;;  %v10015_v47 = vadd.f32 %v4590_v14, %v10852_v40 }
 0x835   : > { %v6811_v20 = vpop.f32.mrb[155].mxu0  ;;  %v6875_v18 = vpop.f32.mrb[139].mxu1 }
 0x836   : > { %v4498_v56 = vadd.f32 %v6809_v30, %v9947_v48  ;;  %v6812_v58 = vadd.f32 %v6811_v20, %v6810_v3  ;;  %v6876_v35 = vadd.f32 %v6875_v18, %v6874_v11  ;;  %5570 = vadd.xlane.f32.xlu1 %v10015_v47 }
 0x838   : > { %v4595_v17 = vadd.f32 %v6873_v38, %v4498_v56  ;;  %v4501_v9 = vadd.f32 %v6812_v58, %v9950_v57 }
 0x83a   : > { %v4598_v59 = vadd.f32 %v6876_v35, %v4501_v9  ;;  %v6813_v7 = vpop.f32.mrb[156].mxu0  ;;  %v6877_v19 = vpop.f32.mrb[140].mxu1  ;;  %v10021_v54 = vadd.f32 %v4595_v17, %v10853_v24 }
 0x83b   : > { %v6814_v51 = vpop.f32.mrb[157].mxu0  ;;  %v6878_v4 = vpop.f32.mrb[141].mxu1 }
 0x83c   : > { %v6815_v44 = vadd.f32 %v6814_v51, %v6813_v7  ;;  %v6879_v36 = vadd.f32 %v6878_v4, %v6877_v19  ;;  %v6880_v6 = vpop.f32.mrb[142].mxu1  ;;  %5572 = vadd.xlane.f32.xlu0 %v10021_v54  ;;  %v6816_v48 = vpop.f32.mrb[158].mxu0  ;;  %v10025_v46 = vadd.f32 %v4598_v59, %v10854_v28 }
 0x83d   : > { %v6817_v27 = vpop.f32.mrb[159].mxu0  ;;  %v6881_v13 = vpop.f32.mrb[143].mxu1 }
 0x83e   : > { %v4506_v57 = vadd.f32 %v6815_v44, %v9953_v32  ;;  %v6818_v29 = vadd.f32 %v6817_v27, %v6816_v48  ;;  %v6882_v55 = vadd.f32 %v6881_v13, %v6880_v6  ;;  %5574 = vadd.xlane.f32.xlu1 %v10025_v46 }
 0x840   : > { %v4603_v22 = vadd.f32 %v6879_v36, %v4506_v57  ;;  %v4509_v5 = vadd.f32 %v6818_v29, %v9956_v2  ;;  %v10857_v2 = vld [vmem:[#allocation65_spill] sm:$0xff] }
 0x842   : > { %v4606_v21 = vadd.f32 %v6882_v55, %v4509_v5  ;;  %v6899_v45 = vpop.f32.mrb[160].mxu0  ;;  %v6963_v15 = vpop.f32.mrb[144].mxu1  ;;  %v10031_v12 = vadd.f32 %v4603_v22, %v10855_v25 }
 0x843   : > { %v6900_v53 = vpop.f32.mrb[161].mxu0  ;;  %v6964_v32 = vpop.f32.mrb[145].mxu1 }
 0x844   : > { %v6901_v42 = vadd.f32 %v6900_v53, %v6899_v45  ;;  %v6965_v63 = vadd.f32 %v6964_v32, %v6963_v15  ;;  %v6902_v8 = vpop.f32.mrb[162].mxu0  ;;  %v6966_v1 = vpop.f32.mrb[146].mxu1  ;;  %5576 = vadd.xlane.f32.xlu0 %v10031_v12  ;;  %v10040_v43 = vadd.f32 %v4606_v21, %v10857_v2 }
 0x845   : > { %v6903_v14 = vpop.f32.mrb[163].mxu0  ;;  %v6967_v10 = vpop.f32.mrb[147].mxu1 }
 0x846   : > { %v5163_v34 = vadd.f32 %v6901_v42, %v10036_v61  ;;  %v6904_v16 = vadd.f32 %v6903_v14, %v6902_v8  ;;  %v6968_v23 = vadd.f32 %v6967_v10, %v6966_v1  ;;  %5578 = vadd.xlane.f32.xlu1 %v10040_v43 }
 0x848   : > { %v10044_v37 = vadd.f32 %v6965_v63, %v5163_v34  ;;  %v5166_v30 = vadd.f32 %v6904_v16, %v10036_v61 }
 0x84a   : > { %v10047_v38 = vadd.f32 %v6968_v23, %v5166_v30  ;;  %v6905_v3 = vpop.f32.mrb[164].mxu0  ;;  %v6969_v11 = vpop.f32.mrb[148].mxu1 }
 0x84b   : > { %v6906_v40 = vpop.f32.mrb[165].mxu0  ;;  %v6970_v20 = vpop.f32.mrb[149].mxu1 }
 0x84c   : > { %v6907_v18 = vadd.f32 %v6906_v40, %v6905_v3  ;;  %v6971_v56 = vadd.f32 %v6970_v20, %v6969_v11  ;;  %v6908_v58 = vpop.f32.mrb[166].mxu0  ;;  %v6972_v35 = vpop.f32.mrb[150].mxu1 }
 0x84d   : > { %v6909_v17 = vpop.f32.mrb[167].mxu0  ;;  %v6973_v9 = vpop.f32.mrb[151].mxu1 }
 0x84e   : > { %v5171_v59 = vadd.f32 %v6907_v18, %v10036_v61  ;;  %v6910_v7 = vadd.f32 %v6909_v17, %v6908_v58  ;;  %v6974_v19 = vadd.f32 %v6973_v9, %v6972_v35 }
 0x850   : > { %v10050_v24 = vadd.f32 %v6971_v56, %v5171_v59  ;;  %v5174_v51 = vadd.f32 %v6910_v7, %v10036_v61 }
 0x852   : > { %v10053_v4 = vadd.f32 %v6974_v19, %v5174_v51  ;;  %v6911_v44 = vpop.f32.mrb[168].mxu0  ;;  %v6975_v36 = vpop.f32.mrb[152].mxu1 }
 0x853   : > { %v6912_v6 = vpop.f32.mrb[169].mxu0  ;;  %v6976_v48 = vpop.f32.mrb[153].mxu1 }
 0x854   : > { %v6913_v28 = vadd.f32 %v6912_v6, %v6911_v44  ;;  %v6977_v27 = vadd.f32 %v6976_v48, %v6975_v36  ;;  %v6914_v13 = vpop.f32.mrb[170].mxu0  ;;  %v6978_v57 = vpop.f32.mrb[154].mxu1 }
 0x855   : > { %v6915_v29 = vpop.f32.mrb[171].mxu0  ;;  %v6979_v55 = vpop.f32.mrb[155].mxu1 }
 0x856   : > { %v5179_v22 = vadd.f32 %v6913_v28, %v10036_v61  ;;  %v6916_v5 = vadd.f32 %v6915_v29, %v6914_v13  ;;  %v6980_v21 = vadd.f32 %v6979_v55, %v6978_v57 }
 0x858   : > { %v10056_v45 = vadd.f32 %v6977_v27, %v5179_v22  ;;  %v5182_v15 = vadd.f32 %v6916_v5, %v10036_v61 }
 0x85a   : > { %v10059_v25 = vadd.f32 %v6980_v21, %v5182_v15  ;;  %v6917_v53 = vpop.f32.mrb[172].mxu0  ;;  %v6981_v32 = vpop.f32.mrb[156].mxu1 }
 0x85b   : > { %v6918_v42 = vpop.f32.mrb[173].mxu0  ;;  %v6982_v63 = vpop.f32.mrb[157].mxu1 }
 0x85c   : > { %v6919_v8 = vadd.f32 %v6918_v42, %v6917_v53  ;;  %v6983_v1 = vadd.f32 %v6982_v63, %v6981_v32  ;;  %v6920_v2 = vpop.f32.mrb[174].mxu0  ;;  %v6984_v14 = vpop.f32.mrb[158].mxu1 }
 0x85d   : > { %v6921_v10 = vpop.f32.mrb[175].mxu0  ;;  %v6985_v34 = vpop.f32.mrb[159].mxu1 }
 0x85e   : > { %v5187_v16 = vadd.f32 %v6919_v8, %v10036_v61  ;;  %v6922_v23 = vadd.f32 %v6921_v10, %v6920_v2  ;;  %v6986_v30 = vadd.f32 %v6985_v34, %v6984_v14 }
 0x860   : > { %v10062_v3 = vadd.f32 %v6983_v1, %v5187_v16  ;;  %v5190_v11 = vadd.f32 %v6922_v23, %v10036_v61 }
 0x862   : > { %v10065_v40 = vadd.f32 %v6986_v30, %v5190_v11  ;;  %v6923_v20 = vpop.f32.mrb[176].mxu0  ;;  %v6987_v18 = vpop.f32.mrb[160].mxu1 }
 0x863   : > { %v6924_v56 = vpop.f32.mrb[177].mxu0  ;;  %v6988_v58 = vpop.f32.mrb[161].mxu1 }
 0x864   : > { %v6925_v35 = vadd.f32 %v6924_v56, %v6923_v20  ;;  %v6989_v17 = vadd.f32 %v6988_v58, %v6987_v18  ;;  %v6926_v9 = vpop.f32.mrb[178].mxu0  ;;  %v6990_v59 = vpop.f32.mrb[162].mxu1 }
 0x865   : > { %v6927_v7 = vpop.f32.mrb[179].mxu0  ;;  %v6991_v19 = vpop.f32.mrb[163].mxu1 }
 0x866   : > { %v5195_v51 = vadd.f32 %v6925_v35, %v10036_v61  ;;  %v6928_v44 = vadd.f32 %v6927_v7, %v6926_v9  ;;  %v6992_v36 = vadd.f32 %v6991_v19, %v6990_v59 }
 0x868   : > { %v10068_v6 = vadd.f32 %v6989_v17, %v5195_v51  ;;  %v5198_v48 = vadd.f32 %v6928_v44, %v10036_v61 }
 0x86a   : > { %v10071_v28 = vadd.f32 %v6992_v36, %v5198_v48  ;;  %v6929_v27 = vpop.f32.mrb[180].mxu0  ;;  %v6993_v13 = vpop.f32.mrb[164].mxu1 }
 0x86b   : > { %v6930_v57 = vpop.f32.mrb[181].mxu0  ;;  %v6994_v29 = vpop.f32.mrb[165].mxu1 }
 0x86c   : > { %v6931_v55 = vadd.f32 %v6930_v57, %v6929_v27  ;;  %v6995_v22 = vadd.f32 %v6994_v29, %v6993_v13  ;;  %v6932_v5 = vpop.f32.mrb[182].mxu0  ;;  %v6996_v21 = vpop.f32.mrb[166].mxu1 }
 0x86d   : > { %v6933_v15 = vpop.f32.mrb[183].mxu0  ;;  %v6997_v53 = vpop.f32.mrb[167].mxu1 }
 0x86e   : > { %v5203_v32 = vadd.f32 %v6931_v55, %v10036_v61  ;;  %v6934_v42 = vadd.f32 %v6933_v15, %v6932_v5  ;;  %v6998_v63 = vadd.f32 %v6997_v53, %v6996_v21 }
 0x870   : > { %v10074_v8 = vadd.f32 %v6995_v22, %v5203_v32  ;;  %v5206_v1 = vadd.f32 %v6934_v42, %v10036_v61 }
 0x872   : > { %v10077_v2 = vadd.f32 %v6998_v63, %v5206_v1  ;;  %v6935_v14 = vpop.f32.mrb[184].mxu0  ;;  %v6999_v10 = vpop.f32.mrb[168].mxu1 }
 0x873   : > { %v6936_v34 = vpop.f32.mrb[185].mxu0  ;;  %v7000_v16 = vpop.f32.mrb[169].mxu1 }
 0x874   : > { %v6937_v23 = vadd.f32 %v6936_v34, %v6935_v14  ;;  %v7001_v30 = vadd.f32 %v7000_v16, %v6999_v10  ;;  %v6938_v11 = vpop.f32.mrb[186].mxu0  ;;  %v7002_v20 = vpop.f32.mrb[170].mxu1 }
 0x875   : > { %v6939_v18 = vpop.f32.mrb[187].mxu0  ;;  %v7003_v56 = vpop.f32.mrb[171].mxu1 }
 0x876   : > { %v5211_v58 = vadd.f32 %v6937_v23, %v10036_v61  ;;  %v6940_v35 = vadd.f32 %v6939_v18, %v6938_v11  ;;  %v7004_v17 = vadd.f32 %v7003_v56, %v7002_v20 }
 0x878   : > { %v10080_v9 = vadd.f32 %v7001_v30, %v5211_v58  ;;  %v5214_v59 = vadd.f32 %v6940_v35, %v10036_v61 }
 0x87a   : > { %v10083_v7 = vadd.f32 %v7004_v17, %v5214_v59  ;;  %v6941_v19 = vpop.f32.mrb[188].mxu0  ;;  %v7005_v51 = vpop.f32.mrb[172].mxu1 }
 0x87b   : > { %v6942_v44 = vpop.f32.mrb[189].mxu0  ;;  %v7006_v36 = vpop.f32.mrb[173].mxu1 }
 0x87c   : > { %v6943_v48 = vadd.f32 %v6942_v44, %v6941_v19  ;;  %v7007_v27 = vadd.f32 %v7006_v36, %v7005_v51  ;;  %v6944_v13 = vpop.f32.mrb[190].mxu0  ;;  %v7008_v57 = vpop.f32.mrb[174].mxu1  ;;  %v10858_v19 = vld [vmem:[#allocation34_spill] sm:$0xff] }
 0x87d   : > { %v6945_v29 = vpop.f32.mrb[191].mxu0  ;;  %v7009_v55 = vpop.f32.mrb[175].mxu1 }
 0x87e   : > { %v5219_v22 = vadd.f32 %v6943_v48, %v10036_v61  ;;  %v6946_v5 = vadd.f32 %v6945_v29, %v6944_v13  ;;  %v7010_v21 = vadd.f32 %v7009_v55, %v7008_v57 }
 0x880   : > { %v10086_v15 = vadd.f32 %v7007_v27, %v5219_v22  ;;  %v5222_v53 = vadd.f32 %v6946_v5, %v10036_v61 }
 0x882   : > { %v10089_v32 = vadd.f32 %v7010_v21, %v5222_v53  ;;  %v7027_v42 = vpop.f32.mrb[192].mxu0  ;;  %v7091_v63 = vpop.f32.mrb[176].mxu1 }
 0x883   : > { %v7028_v1 = vpop.f32.mrb[193].mxu0  ;;  %v7092_v14 = vpop.f32.mrb[177].mxu1 }
 0x884   : > { %v7029_v10 = vadd.f32 %v7028_v1, %v7027_v42  ;;  %v7093_v34 = vadd.f32 %v7092_v14, %v7091_v63  ;;  %v7030_v16 = vpop.f32.mrb[194].mxu0  ;;  %v7094_v23 = vpop.f32.mrb[178].mxu1 }
 0x885   : > { %v7031_v30 = vpop.f32.mrb[195].mxu0  ;;  %v7095_v11 = vpop.f32.mrb[179].mxu1 }
 0x886   : > { %v5357_v20 = vadd.f32 %v7029_v10, %v10044_v37  ;;  %v7032_v18 = vadd.f32 %v7031_v30, %v7030_v16  ;;  %v7096_v56 = vadd.f32 %v7095_v11, %v7094_v23  ;;  %v10859_v37 = vld [vmem:[#allocation35_spill] sm:$0xff]  ;;  %v10860_v10 = vld [vmem:[#allocation37_spill] sm:$0xff] }
 0x888   : > { %v5454_v58 = vadd.f32 %v7093_v34, %v5357_v20  ;;  %v5360_v35 = vadd.f32 %v7032_v18, %v10047_v38 }
 0x88a   : > { %v5457_v61 = vadd.f32 %v7096_v56, %v5360_v35  ;;  %v7033_v17 = vpop.f32.mrb[196].mxu0  ;;  %v7097_v59 = vpop.f32.mrb[180].mxu1  ;;  %v10094_v51 = vadd.f32 %v5454_v58, %v10858_v19 }
 0x88b   : > { %v7034_v44 = vpop.f32.mrb[197].mxu0  ;;  %v7098_v36 = vpop.f32.mrb[181].mxu1 }
 0x88c   : > { %v7035_v48 = vadd.f32 %v7034_v44, %v7033_v17  ;;  %v7099_v27 = vadd.f32 %v7098_v36, %v7097_v59  ;;  %v7036_v13 = vpop.f32.mrb[198].mxu0  ;;  %v7100_v57 = vpop.f32.mrb[182].mxu1  ;;  %5580 = vadd.xlane.f32.xlu0 %v10094_v51  ;;  %v10098_v29 = vadd.f32 %v5457_v61, %v10859_v37 }
 0x88d   : > { %v7037_v55 = vpop.f32.mrb[199].mxu0  ;;  %v7101_v22 = vpop.f32.mrb[183].mxu1 }
 0x88e   : > { %v5365_v38 = vadd.f32 %v7035_v48, %v10050_v24  ;;  %v7038_v5 = vadd.f32 %v7037_v55, %v7036_v13  ;;  %v7102_v21 = vadd.f32 %v7101_v22, %v7100_v57  ;;  %5582 = vadd.xlane.f32.xlu1 %v10098_v29  ;;  %v10861_v24 = vld [vmem:[#allocation36_spill] sm:$0xff] }
 0x890   : > { %v5462_v53 = vadd.f32 %v7099_v27, %v5365_v38  ;;  %v5368_v42 = vadd.f32 %v7038_v5, %v10053_v4  ;;  %v10862_v27 = vld [vmem:[#allocation39_spill] sm:$0xff] }
 0x892   : > { %v5465_v63 = vadd.f32 %v7102_v21, %v5368_v42  ;;  %v7039_v1 = vpop.f32.mrb[200].mxu0  ;;  %v7103_v14 = vpop.f32.mrb[184].mxu1  ;;  %v10104_v34 = vadd.f32 %v5462_v53, %v10860_v10 }
 0x893   : > { %v7040_v16 = vpop.f32.mrb[201].mxu0  ;;  %v7104_v23 = vpop.f32.mrb[185].mxu1 }
 0x894   : > { %v7041_v30 = vadd.f32 %v7040_v16, %v7039_v1  ;;  %v7105_v11 = vadd.f32 %v7104_v23, %v7103_v14  ;;  %v7042_v20 = vpop.f32.mrb[202].mxu0  ;;  %v7106_v18 = vpop.f32.mrb[186].mxu1  ;;  %5584 = vadd.xlane.f32.xlu0 %v10104_v34  ;;  %v10108_v56 = vadd.f32 %v5465_v63, %v10861_v24 }
 0x895   : > { %v7043_v58 = vpop.f32.mrb[203].mxu0  ;;  %v7107_v35 = vpop.f32.mrb[187].mxu1 }
 0x896   : > { %v5373_v4 = vadd.f32 %v7041_v30, %v10056_v45  ;;  %v7044_v61 = vadd.f32 %v7043_v58, %v7042_v20  ;;  %v7108_v17 = vadd.f32 %v7107_v35, %v7106_v18  ;;  %5586 = vadd.xlane.f32.xlu1 %v10108_v56  ;;  %v10863_v45 = vld [vmem:[#allocation38_spill] sm:$0xff]  ;;  %v10864_v20 = vld [vmem:[#allocation41_spill] sm:$0xff] }
 0x898   : > { %v5470_v59 = vadd.f32 %v7105_v11, %v5373_v4  ;;  %v5376_v19 = vadd.f32 %v7044_v61, %v10059_v25 }
 0x89a   : > { %v5473_v44 = vadd.f32 %v7108_v17, %v5376_v19  ;;  %v7045_v36 = vpop.f32.mrb[204].mxu0  ;;  %v7109_v48 = vpop.f32.mrb[188].mxu1  ;;  %v10114_v13 = vadd.f32 %v5470_v59, %v10862_v27 }
 0x89b   : > { %v7110_v57 = vpop.f32.mrb[189].mxu1  ;;  %v7046_v55 = vpop.f32.mrb[205].mxu0 }
 0x89c   : > { %v7111_v37 = vadd.f32 %v7110_v57, %v7109_v48  ;;  %v7112_v22 = vpop.f32.mrb[190].mxu1  ;;  %5588 = vadd.xlane.f32.xlu0 %v10114_v13  ;;  %v10118_v38 = vadd.f32 %v5473_v44, %v10863_v45  ;;  %v7047_v5 = vadd.f32 %v7046_v55, %v7045_v36  ;;  %v7048_v21 = vpop.f32.mrb[206].mxu0  ;;  %v10866_v45 = vld [vmem:[#allocation43_spill] sm:$0xff] }
 0x89d   : > { %v7113_v53 = vpop.f32.mrb[191].mxu1  ;;  %v7049_v42 = vpop.f32.mrb[207].mxu0 }
 0x89e   : > { %v7114_v25 = vadd.f32 %v7113_v53, %v7112_v22  ;;  %5590 = vadd.xlane.f32.xlu1 %v10118_v38  ;;  %v5381_v63 = vadd.f32 %v7047_v5, %v10062_v3  ;;  %v7050_v1 = vadd.f32 %v7049_v42, %v7048_v21  ;;  %v10865_v3 = vld [vmem:[#allocation40_spill] sm:$0xff] }
 0x8a0   : > { %v5384_v14 = vadd.f32 %v7050_v1, %v10065_v40  ;;  %v5478_v10 = vadd.f32 %v7111_v37, %v5381_v63  ;;  %v10867_v1 = vld [vmem:[#allocation42_spill] sm:$0xff] }
 0x8a2   : > { %v7051_v16 = vpop.f32.mrb[208].mxu0  ;;  %v7115_v23 = vpop.f32.mrb[192].mxu1  ;;  %v5481_v30 = vadd.f32 %v7114_v25, %v5384_v14  ;;  %v10124_v18 = vadd.f32 %v5478_v10, %v10864_v20 }
 0x8a3   : > { %v7116_v11 = vpop.f32.mrb[193].mxu1  ;;  %v7052_v58 = vpop.f32.mrb[209].mxu0 }
 0x8a4   : > { %v7117_v24 = vadd.f32 %v7116_v11, %v7115_v23  ;;  %v7118_v35 = vpop.f32.mrb[194].mxu1  ;;  %v7053_v4 = vadd.f32 %v7052_v58, %v7051_v16  ;;  %v7054_v61 = vpop.f32.mrb[210].mxu0  ;;  %5592 = vadd.xlane.f32.xlu0 %v10124_v18  ;;  %v10128_v59 = vadd.f32 %v5481_v30, %v10865_v3 }
 0x8a5   : > { %v7119_v17 = vpop.f32.mrb[195].mxu1  ;;  %v7055_v40 = vpop.f32.mrb[211].mxu0 }
 0x8a6   : > { %v7120_v19 = vadd.f32 %v7119_v17, %v7118_v35  ;;  %v5389_v44 = vadd.f32 %v7053_v4, %v10068_v6  ;;  %v7056_v36 = vadd.f32 %v7055_v40, %v7054_v61  ;;  %5594 = vadd.xlane.f32.xlu1 %v10128_v59  ;;  %v10868_v4 = vld [vmem:[#allocation45_spill] sm:$0xff] }
 0x8a8   : > { %v5392_v48 = vadd.f32 %v7056_v36, %v10071_v28  ;;  %v5486_v27 = vadd.f32 %v7117_v24, %v5389_v44  ;;  %v10869_v36 = vld [vmem:[#allocation44_spill] sm:$0xff] }
 0x8aa   : > { %v7057_v57 = vpop.f32.mrb[212].mxu0  ;;  %v7121_v37 = vpop.f32.mrb[196].mxu1  ;;  %v5489_v55 = vadd.f32 %v7120_v19, %v5392_v48  ;;  %v10134_v5 = vadd.f32 %v5486_v27, %v10866_v45 }
 0x8ab   : > { %v7122_v22 = vpop.f32.mrb[197].mxu1  ;;  %v7058_v53 = vpop.f32.mrb[213].mxu0 }
 0x8ac   : > { %v7123_v21 = vadd.f32 %v7122_v22, %v7121_v37  ;;  %v7124_v42 = vpop.f32.mrb[198].mxu1  ;;  %v7059_v25 = vadd.f32 %v7058_v53, %v7057_v57  ;;  %v7060_v63 = vpop.f32.mrb[214].mxu0  ;;  %5596 = vadd.xlane.f32.xlu0 %v10134_v5  ;;  %v10138_v14 = vadd.f32 %v5489_v55, %v10867_v1 }
 0x8ad   : > { %v7125_v6 = vpop.f32.mrb[199].mxu1  ;;  %v7061_v28 = vpop.f32.mrb[215].mxu0 }
 0x8ae   : > { %v7126_v10 = vadd.f32 %v7125_v6, %v7124_v42  ;;  %v5397_v16 = vadd.f32 %v7059_v25, %v10074_v8  ;;  %v7062_v23 = vadd.f32 %v7061_v28, %v7060_v63  ;;  %5598 = vadd.xlane.f32.xlu1 %v10138_v14  ;;  %v10870_v25 = vld [vmem:[#allocation47_spill] sm:$0xff] }
 0x8b0   : > { %v5400_v30 = vadd.f32 %v7062_v23, %v10077_v2  ;;  %v5494_v11 = vadd.f32 %v7123_v21, %v5397_v16  ;;  %v10871_v23 = vld [vmem:[#allocation46_spill] sm:$0xff] }
 0x8b2   : > { %v7063_v20 = vpop.f32.mrb[216].mxu0  ;;  %v7127_v24 = vpop.f32.mrb[200].mxu1  ;;  %v5497_v58 = vadd.f32 %v7126_v10, %v5400_v30  ;;  %v10144_v61 = vadd.f32 %v5494_v11, %v10868_v4 }
 0x8b3   : > { %v7128_v35 = vpop.f32.mrb[201].mxu1  ;;  %v7064_v3 = vpop.f32.mrb[217].mxu0 }
 0x8b4   : > { %v7129_v17 = vadd.f32 %v7128_v35, %v7127_v24  ;;  %v7130_v40 = vpop.f32.mrb[202].mxu1  ;;  %v7065_v19 = vadd.f32 %v7064_v3, %v7063_v20  ;;  %v7066_v44 = vpop.f32.mrb[218].mxu0  ;;  %5600 = vadd.xlane.f32.xlu0 %v10144_v61  ;;  %v10148_v48 = vadd.f32 %v5497_v58, %v10869_v36 }
 0x8b5   : > { %v7131_v8 = vpop.f32.mrb[203].mxu1  ;;  %v7067_v2 = vpop.f32.mrb[219].mxu0 }
 0x8b6   : > { %v7132_v27 = vadd.f32 %v7131_v8, %v7130_v40  ;;  %v5405_v57 = vadd.f32 %v7065_v19, %v10080_v9  ;;  %v7068_v37 = vadd.f32 %v7067_v2, %v7066_v44  ;;  %5602 = vadd.xlane.f32.xlu1 %v10148_v48  ;;  %v10873_v40 = vld [vmem:[#allocation48_spill] sm:$0xff]  ;;  %v5549_v44 = vpop.xlane.xlu0 %5548  ;;  %v5551_v8 = vpop.xlane.xlu1 %5550 }
 0x8b8   : > { %v5408_v55 = vadd.f32 %v7068_v37, %v10083_v7  ;;  %v5502_v22 = vadd.f32 %v7129_v17, %v5405_v57  ;;  %v10872_v17 = vld [vmem:[#allocation49_spill] sm:$0xff] }
 0x8ba   : > { %v7069_v45 = vpop.f32.mrb[220].mxu0  ;;  %v7133_v21 = vpop.f32.mrb[204].mxu1  ;;  %v5505_v53 = vadd.f32 %v7132_v27, %v5408_v55  ;;  %v10154_v63 = vadd.f32 %v5502_v22, %v10870_v25 }
 0x8bb   : > { %v7134_v42 = vpop.f32.mrb[205].mxu1  ;;  %v7070_v1 = vpop.f32.mrb[221].mxu0 }
 0x8bc   : > { %v7135_v6 = vadd.f32 %v7134_v42, %v7133_v21  ;;  %v7136_v28 = vpop.f32.mrb[206].mxu1  ;;  %v7071_v10 = vadd.f32 %v7070_v1, %v7069_v45  ;;  %v7072_v16 = vpop.f32.mrb[222].mxu0  ;;  %5604 = vadd.xlane.f32.xlu0 %v10154_v63  ;;  %v10158_v30 = vadd.f32 %v5505_v53, %v10871_v23 }
 0x8bd   : > { %v7137_v9 = vpop.f32.mrb[207].mxu1  ;;  %v7073_v7 = vpop.f32.mrb[223].mxu0 }
 0x8be   : > { %v7138_v11 = vadd.f32 %v7137_v9, %v7136_v28  ;;  %v5413_v20 = vadd.f32 %v7071_v10, %v10086_v15  ;;  %v7074_v24 = vadd.f32 %v7073_v7, %v7072_v16  ;;  %5606 = vadd.xlane.f32.xlu1 %v10158_v30  ;;  %v5553_v15 = vpop.xlane.xlu0 %5552  ;;  %v5555_v36 = vpop.xlane.xlu1 %5554 }
 0x8c0   : > { %v5416_v58 = vadd.f32 %v7074_v24, %v10089_v32  ;;  %v5510_v35 = vadd.f32 %v7135_v6, %v5413_v20 }
 0x8c2   : > { %v5513_v4 = vadd.f32 %v7138_v11, %v5416_v58  ;;  %v10164_v3 = vadd.f32 %v5510_v35, %v10872_v17  ;;  %v5557_v2 = vpop.xlane.xlu0 %5556  ;;  %v5559_v27 = vpop.xlane.xlu1 %5558 }
 0x8c4   : > { %5608 = vadd.xlane.f32.xlu0 %v10164_v3  ;;  %v10168_v19 = vadd.f32 %v5513_v4, %v10873_v40 }
 0x8c6   : > { %5610 = vadd.xlane.f32.xlu1 %v10168_v19  ;;  %v5561_v57 = vpop.xlane.xlu0 %5560  ;;  %v10171_v32 = vpop.xlane.xlu1 %5562 }
 0x8ca   : > { %v10173_v37 = vpop.xlane.xlu0 %5564  ;;  %v10175_v55 = vpop.xlane.xlu1 %5566 }
 0x8ce   : > { %v10177_v22 = vpop.xlane.xlu0 %5568  ;;  %v10179_v45 = vpop.xlane.xlu1 %5570 }
 0x8d2   : > { %v10181_v21 = vpop.xlane.xlu0 %5572  ;;  %v10183_v53 = vpop.xlane.xlu1 %5574 }
 0x8d6   : > { %v10185_v42 = vpop.xlane.xlu0 %5576  ;;  %v10187_v25 = vpop.xlane.xlu1 %5578 }
 0x919   : > { %v5581_v6 = vpop.xlane.xlu0 %5580 }
 0x91a   : > { %v5612_v1 = vadd.f32 %v5581_v6, %v5549_v44 }
 0x91b   : > { %v5583_v28 = vpop.xlane.xlu1 %5582 }
 0x91c   : > { %v5628_v10 = vmul.f32 0.00390625, %v5612_v1  ;;  %v5613_v16 = vadd.f32 %v5583_v28, %v5551_v8 }
 0x91e   : > { %v10190_v9 = vsub.f32 %v9961_v62, %v5628_v10  ;;  %v5629_v23 = vmul.f32 0.00390625, %v5613_v16  ;;  %v10193_v7 = vsub.f32 %v10094_v51, %v5628_v10 }
 0x920   : > { %v10196_v11 = vsub.f32 %v9965_v33, %v5629_v23  ;;  %v5676_v20 = vmul.f32 %v10190_v9, %v10190_v9  ;;  %v10201_v58 = vsub.f32 %v10098_v29, %v5629_v23  ;;  %v5724_v33 = vmul.f32 %v10193_v7, %v10193_v7 }
 0x921   : > { %v5585_v24 = vpop.xlane.xlu0 %5584 }
 0x922   : > { %v5614_v35 = vadd.f32 %v5585_v24, %v5553_v15  ;;  %5692 = vadd.xlane.f32.xlu0 %v5676_v20  ;;  %v5677_v62 = vmul.f32 %v10196_v11, %v10196_v11  ;;  %v5725_v29 = vmul.f32 %v10201_v58, %v10201_v58 }
 0x923   : > { %v5587_v4 = vpop.xlane.xlu1 %5586 }
 0x924   : > { %v5630_v17 = vmul.f32 0.00390625, %v5614_v35  ;;  %v5615_v40 = vadd.f32 %v5587_v4, %v5555_v36  ;;  %5694 = vadd.xlane.f32.xlu1 %v5677_v62 }
 0x926   : > { %v10208_v51 = vsub.f32 %v9971_v50, %v5630_v17  ;;  %v5631_v44 = vmul.f32 0.00390625, %v5615_v40  ;;  %5740 = vadd.xlane.f32.xlu0 %v5724_v33  ;;  %v10213_v8 = vsub.f32 %v10104_v34, %v5630_v17 }
 0x928   : > { %v10216_v15 = vsub.f32 %v9975_v31, %v5631_v44  ;;  %5742 = vadd.xlane.f32.xlu1 %v5725_v29  ;;  %v5678_v36 = vmul.f32 %v10208_v51, %v10208_v51  ;;  %v10221_v1 = vsub.f32 %v10108_v56, %v5631_v44  ;;  %v5726_v31 = vmul.f32 %v10213_v8, %v10213_v8 }
 0x929   : > { %v5589_v6 = vpop.xlane.xlu0 %5588 }
 0x92a   : > { %v5616_v50 = vadd.f32 %v5589_v6, %v5557_v2  ;;  %5696 = vadd.xlane.f32.xlu0 %v5678_v36  ;;  %v5679_v28 = vmul.f32 %v10216_v15, %v10216_v15  ;;  %v5727_v56 = vmul.f32 %v10221_v1, %v10221_v1 }
 0x92b   : > { %v5591_v10 = vpop.xlane.xlu1 %5590 }
 0x92c   : > { %v5632_v16 = vmul.f32 0.00390625, %v5616_v50  ;;  %v5617_v34 = vadd.f32 %v5591_v10, %v5559_v27  ;;  %5698 = vadd.xlane.f32.xlu1 %v5679_v28 }
 0x92e   : > { %v10228_v23 = vsub.f32 %v9981_v49, %v5632_v16  ;;  %v5633_v20 = vmul.f32 0.00390625, %v5617_v34  ;;  %5744 = vadd.xlane.f32.xlu0 %v5726_v31  ;;  %v10233_v2 = vsub.f32 %v10114_v13, %v5632_v16 }
 0x930   : > { %v10236_v24 = vsub.f32 %v9985_v26, %v5633_v20  ;;  %5746 = vadd.xlane.f32.xlu1 %v5727_v56  ;;  %v5680_v27 = vmul.f32 %v10228_v23, %v10228_v23  ;;  %v10241_v35 = vsub.f32 %v10118_v38, %v5633_v20  ;;  %v5728_v13 = vmul.f32 %v10233_v2, %v10233_v2 }
 0x931   : > { %v5593_v49 = vpop.xlane.xlu0 %5592 }
 0x932   : > { %5700 = vadd.xlane.f32.xlu0 %v5680_v27  ;;  %v5681_v62 = vmul.f32 %v10236_v24, %v10236_v24  ;;  %v5618_v4 = vadd.f32 %v5593_v49, %v5561_v57  ;;  %v5729_v33 = vmul.f32 %v10241_v35, %v10241_v35 }
 0x933   : > { %v5595_v17 = vpop.xlane.xlu1 %5594 }
 0x934   : > { %5702 = vadd.xlane.f32.xlu1 %v5681_v62  ;;  %v5634_v26 = vmul.f32 0.00390625, %v5618_v4  ;;  %v5619_v40 = vadd.f32 %v5595_v17, %v10171_v32 }
 0x936   : > { %5748 = vadd.xlane.f32.xlu0 %v5728_v13  ;;  %v10251_v38 = vsub.f32 %v9991_v39, %v5634_v26  ;;  %v5635_v44 = vmul.f32 0.00390625, %v5619_v40  ;;  %v10254_v29 = vsub.f32 %v10124_v18, %v5634_v26 }
 0x938   : > { %5750 = vadd.xlane.f32.xlu1 %v5729_v33  ;;  %v10257_v57 = vsub.f32 %v9995_v52, %v5635_v44  ;;  %v5682_v36 = vmul.f32 %v10251_v38, %v10251_v38  ;;  %v10262_v32 = vsub.f32 %v10128_v59, %v5635_v44  ;;  %v5730_v52 = vmul.f32 %v10254_v29, %v10254_v29 }
 0x939   : > { %v5597_v6 = vpop.xlane.xlu0 %5596 }
 0x93a   : > { %v5620_v50 = vadd.f32 %v5597_v6, %v10173_v37  ;;  %5704 = vadd.xlane.f32.xlu0 %v5682_v36  ;;  %v5683_v39 = vmul.f32 %v10257_v57, %v10257_v57  ;;  %v5731_v59 = vmul.f32 %v10262_v32, %v10262_v32 }
 0x93b   : > { %v5599_v28 = vpop.xlane.xlu1 %5598 }
 0x93c   : > { %v5636_v10 = vmul.f32 0.00390625, %v5620_v50  ;;  %v5621_v18 = vadd.f32 %v5599_v28, %v10175_v55  ;;  %5706 = vadd.xlane.f32.xlu1 %v5683_v39 }
 0x93e   : > { %v10271_v16 = vsub.f32 %v10001_v60, %v5636_v10  ;;  %v5637_v34 = vmul.f32 0.00390625, %v5621_v18  ;;  %5752 = vadd.xlane.f32.xlu0 %v5730_v52  ;;  %v10276_v37 = vsub.f32 %v10134_v5, %v5636_v10 }
 0x940   : > { %v10279_v31 = vsub.f32 %v10005_v0, %v5637_v34  ;;  %5754 = vadd.xlane.f32.xlu1 %v5731_v59  ;;  %v5684_v55 = vmul.f32 %v10271_v16, %v10271_v16  ;;  %v10284_v56 = vsub.f32 %v10138_v14, %v5637_v34  ;;  %v5732_v0 = vmul.f32 %v10276_v37, %v10276_v37 }
 0x941   : > { %v5601_v20 = vpop.xlane.xlu0 %5600 }
 0x942   : > { %v5622_v60 = vadd.f32 %v5601_v20, %v10177_v22  ;;  %5708 = vadd.xlane.f32.xlu0 %v5684_v55  ;;  %v5685_v27 = vmul.f32 %v10279_v31, %v10279_v31  ;;  %v5733_v14 = vmul.f32 %v10284_v56, %v10284_v56 }
 0x943   : > { %v5603_v49 = vpop.xlane.xlu1 %5602 }
 0x944   : > { %v5638_v5 = vmul.f32 0.00390625, %v5622_v60  ;;  %v5623_v62 = vadd.f32 %v5603_v49, %v10179_v45  ;;  %5710 = vadd.xlane.f32.xlu1 %v5685_v27 }
 0x946   : > { %v10293_v4 = vsub.f32 %v10011_v41, %v5638_v5  ;;  %v5639_v17 = vmul.f32 0.00390625, %v5623_v62  ;;  %5756 = vadd.xlane.f32.xlu0 %v5732_v0  ;;  %v10298_v22 = vsub.f32 %v10144_v61, %v5638_v5 }
 0x948   : > { %v10301_v13 = vsub.f32 %v10015_v47, %v5639_v17  ;;  %5758 = vadd.xlane.f32.xlu1 %v5733_v14  ;;  %v5686_v45 = vmul.f32 %v10293_v4, %v10293_v4  ;;  %v10306_v40 = vsub.f32 %v10148_v48, %v5639_v17  ;;  %v5734_v47 = vmul.f32 %v10298_v22, %v10298_v22 }
 0x949   : > { %v5605_v26 = vpop.xlane.xlu0 %5604 }
 0x94a   : > { %v5624_v41 = vadd.f32 %v5605_v26, %v10181_v21  ;;  %5712 = vadd.xlane.f32.xlu0 %v5686_v45  ;;  %v5687_v33 = vmul.f32 %v10301_v13, %v10301_v13  ;;  %v5735_v48 = vmul.f32 %v10306_v40, %v10306_v40 }
 0x94b   : > { %v5607_v44 = vpop.xlane.xlu1 %5606 }
 0x94c   : > { %v5640_v61 = vmul.f32 0.00390625, %v5624_v41  ;;  %v5625_v36 = vadd.f32 %v5607_v44, %v10183_v53  ;;  %5714 = vadd.xlane.f32.xlu1 %v5687_v33 }
 0x94e   : > { %v10315_v6 = vsub.f32 %v10021_v54, %v5640_v61  ;;  %v5641_v50 = vmul.f32 0.00390625, %v5625_v36  ;;  %5760 = vadd.xlane.f32.xlu0 %v5734_v47  ;;  %v10320_v21 = vsub.f32 %v10154_v63, %v5640_v61 }
 0x950   : > { %v10323_v39 = vsub.f32 %v10025_v46, %v5641_v50  ;;  %5762 = vadd.xlane.f32.xlu1 %v5735_v48  ;;  %v5688_v53 = vmul.f32 %v10315_v6, %v10315_v6  ;;  %v10328_v10 = vsub.f32 %v10158_v30, %v5641_v50  ;;  %v5736_v46 = vmul.f32 %v10320_v21, %v10320_v21 }
 0x951   : > { %v5609_v28 = vpop.xlane.xlu0 %5608 }
 0x952   : > { %v5626_v54 = vadd.f32 %v5609_v28, %v10185_v42  ;;  %5716 = vadd.xlane.f32.xlu0 %v5688_v53  ;;  %v5689_v18 = vmul.f32 %v10323_v39, %v10323_v39  ;;  %v5737_v42 = vmul.f32 %v10328_v10, %v10328_v10 }
 0x953   : > { %v5611_v52 = vpop.xlane.xlu1 %5610 }
 0x954   : > { %v5642_v63 = vmul.f32 0.00390625, %v5626_v54  ;;  %v5627_v34 = vadd.f32 %v5611_v52, %v10187_v25  ;;  %5718 = vadd.xlane.f32.xlu1 %v5689_v18 }
 0x956   : > { %v10337_v59 = vsub.f32 %v10031_v12, %v5642_v63  ;;  %v5643_v30 = vmul.f32 0.00390625, %v5627_v34  ;;  %5764 = vadd.xlane.f32.xlu0 %v5736_v46  ;;  %v10342_v55 = vsub.f32 %v10164_v3, %v5642_v63 }
 0x958   : > { %v10345_v25 = vsub.f32 %v10040_v43, %v5643_v30  ;;  %5766 = vadd.xlane.f32.xlu1 %v5737_v42  ;;  %v5690_v20 = vmul.f32 %v10337_v59, %v10337_v59  ;;  %v10350_v12 = vsub.f32 %v10168_v19, %v5643_v30  ;;  %v5738_v3 = vmul.f32 %v10342_v55, %v10342_v55 }
 0x95a   : > { %5720 = vadd.xlane.f32.xlu0 %v5690_v20  ;;  %v5691_v60 = vmul.f32 %v10345_v25, %v10345_v25  ;;  %v5739_v43 = vmul.f32 %v10350_v12, %v10350_v12 }
 0x95c   : > { %5722 = vadd.xlane.f32.xlu1 %v5691_v60 }
 0x95e   : > { %5768 = vadd.xlane.f32.xlu0 %v5738_v3 }
 0x960   : > { %5770 = vadd.xlane.f32.xlu1 %v5739_v43 }
 0x961   : > { %8011 = shalt.err (!%p8008_p11)
}
 0x962   : > { %s8012_s8 = scalar_lea.hbm %s10363_s17, 2048  ;;  %s8016_s15 = scalar_lea.hbm %s10876_s12, 4096 }
 0x963   : > { %p8013_p9 = scmp.ne.s32.totalorder %s10363_s17, %s8012_s8  ;;  %p8017_p8 = scmp.lt.u32.totalorder %s10363_s17, %s10876_s12 }
 0x964   : > { %p8018_p2 = scmp.lt.u32.totalorder %s8016_s15, %s8012_s8  ;;  %p8020_p1 = scmp.lt.u32.totalorder %s8012_s8, %s10363_s17 }
 0x965   : > { %p8014_p4 = pnand %p8013_p9, %p10877_p12 }
 0x966   : > { %p8019_p7 = por %p8018_p2, %p8017_p8 }
 0x967   : > { %p8015_p0 = pneg %p8014_p4 }
 0x968   : > { %p8021_p5 = por %p8020_p1, %p8019_p7 }
 0x96a   : > { %p8022_p10 = pnand %p8021_p5, %p8015_p0 }
 0x96c   : > { %8025 = shalt.err (!%p8022_p10)
}
 0x96d   : > { %s8146_s21 = smov 128   ;;  %s8147_s19 = smov 8  }
 0x96e   : > { %7390 = dma.vmem_to_hbm [thread:$0]  (%p10877_p12), %s10365_s3, 2048, %s10363_s17, %s6014_s1, %s8146_s21, %s8146_s21, %s8147_s19  }
 0x96f   : > { %s10878_s3 = sld [smem:[#allocation96_spill]]  ;;  %s10879_s17 = sld [smem:[#allocation97_spill]] }
 0x970   : > { %s6291_s1 = sshll.u32 %s8588_s13, 8  ;;  %s10880_s24 = sld [smem:[#allocation98_spill]] }
 0x971   : > { %s10881_s14 = sld [smem:[#allocation99_spill]]  ;;  %s10422_s28 = scalar_lea.vmem [#allocation16], %s6291_s1 }
 0x972   : > { %s6577_s15 = sshll.u32 %s10874_s23, 12  ;;  %s6030_s6 = sshll.u32 %s10422_s28, 4  ;;  %s10543_s6 = int_to_ptr.vmem [resolvable:$true] %s6030_s6 }
 0x973   : > { %s10882_s19 = sld [smem:[#allocation100_spill]]  ;;  %s6009_s23 = scalar_lea.sflag [#allocation4], %s8588_s13 }
 0x974   : > { %s8026_s22 = scalar_lea.vmem %s10543_s6, 4096 }
 0x975   : > { %v10394_v34 = vld [vmem:[%s10878_s3] ss:$0 sm:$0xff]  ;;  %p8027_p3 = scmp.ne.s32.totalorder %s10543_s6, %s8026_s22  ;;  %s8148_s3 = smov [#allocation16]  }
 0x976   : > { %v10399_v46 = vld [vmem:[%s10879_s17] ss:$0 sm:$0xff]  ;;  %s8030_s26 = sshll.u32 %s8148_s3, 4  ;;  %s8031_s26 = int_to_ptr.vmem [resolvable:$false] %s8030_s26 }
 0x977   : > { %v10407_v43 = vld [vmem:[%s10880_s24] ss:$0 sm:$0xff]  ;;  %p8028_p6 = pnand %p8027_p3, %p10877_p12  ;;  %s8032_s9 = scalar_lea.vmem %s8031_s26, 8192 }
 0x978   : > { %p8033_p11 = scmp.lt.s32.totalorder %s10543_s6, %s8031_s26  ;;  %p8034_p9 = scmp.lt.s32.totalorder %s8032_s9, %s8026_s22 }
 0x979   : > { %s10541_s4 = scalar_lea.hbm %s10882_s19, %s6577_s15  ;;  %p8029_p13 = pneg %p8028_p6 }
 0x97a   : > { %p8035_p4 = por %p8034_p9, %p8033_p11 }
 0x97c   : > { %p8036_p0 = pnand %p8035_p4, %p8029_p13 }
 0x9af   : > { %v5693_v19 = vpop.xlane.xlu0 %5692 }
 0x9b1   : > { %v5695_v27 = vpop.xlane.xlu1 %5694 }
 0x9b3   : > { %v5741_v49 = vpop.xlane.xlu0 %5740 }
 0x9b4   : > { %v5772_v5 = vadd.f32 %v5741_v49, %v5693_v19  ;;  %v10412_v19 = vld [vmem:[%s10881_s14] ss:$0 sm:$0xff] }
 0x9b5   : > { %v5743_v62 = vpop.xlane.xlu1 %5742 }
 0x9b6   : > { %v5788_v0 = vmul.f32 0.00390625, %v5772_v5  ;;  %v5773_v17 = vadd.f32 %v5743_v62, %v5695_v27 }
 0x9b7   : > { %v5697_v14 = vpop.xlane.xlu0 %5696 }
 0x9b8   : > { %v5804_v45 = vadd.f32 1e-05, %v5788_v0  ;;  %v5789_v26 = vmul.f32 0.00390625, %v5773_v17 }
 0x9b9   : > { %v5699_v41 = vpop.xlane.xlu1 %5698 }
 0x9ba   : > { %7734 = vrsqrt.f32 %v5804_v45  ;;  %v5805_v33 = vadd.f32 1e-05, %v5789_v26 }
 0x9bb   : > { %v5745_v44 = vpop.xlane.xlu0 %5744 }
 0x9bc   : > { %7736 = vrsqrt.f32 %v5805_v33  ;;  %v5774_v61 = vadd.f32 %v5745_v44, %v5697_v14 }
 0x9bd   : > { %v5747_v36 = vpop.xlane.xlu1 %5746 }
 0x9be   : > { %v5790_v47 = vmul.f32 0.00390625, %v5774_v61  ;;  %v5775_v50 = vadd.f32 %v5747_v36, %v5699_v41 }
 0x9bf   : > { %v5701_v48 = vpop.xlane.xlu0 %5700 }
 0x9c0   : > { %v5806_v53 = vadd.f32 1e-05, %v5790_v47  ;;  %v5791_v28 = vmul.f32 0.00390625, %v5775_v50 }
 0x9c1   : > { %v5703_v54 = vpop.xlane.xlu1 %5702 }
 0x9c2   : > { %7738 = vrsqrt.f32 %v5806_v53  ;;  %v5807_v18 = vadd.f32 1e-05, %v5791_v28 }
 0x9c3   : > { %v5749_v52 = vpop.xlane.xlu0 %5748 }
 0x9c4   : > { %v7735_v63 = vpop.eup %7734  ;;  %7740 = vrsqrt.f32 %v5807_v18  ;;  %v5776_v30 = vadd.f32 %v5749_v52, %v5701_v48 }
 0x9c5   : > { %v5836_v42 = vmul.f32 %v7735_v63, %v10190_v9  ;;  %v5914_v20 = vmul.f32 %v7735_v63, %v10193_v7  ;;  %v5751_v60 = vpop.xlane.xlu1 %5750 }
 0x9c6   : > { %v7737_v3 = vpop.eup %7736  ;;  %v5792_v27 = vmul.f32 0.00390625, %v5776_v30  ;;  %v5777_v49 = vadd.f32 %v5751_v60, %v5703_v54 }
 0x9c7   : > { %v5859_v5 = vmul.f32 %v10394_v34, %v5836_v42  ;;  %v5937_v9 = vmul.f32 %v10399_v46, %v5914_v20  ;;  %v5837_v7 = vmul.f32 %v7737_v3, %v10196_v11  ;;  %v5915_v62 = vmul.f32 %v7737_v3, %v10201_v58  ;;  %v5705_v14 = vpop.xlane.xlu0 %5704 }
 0x9c8   : > { %v5808_v0 = vadd.f32 1e-05, %v5792_v27  ;;  %v5793_v17 = vmul.f32 0.00390625, %v5777_v49 }
 0x9c9   : > { %v5882_v45 = vadd.f32 %v10407_v43, %v5859_v5  ;;  %v5960_v26 = vadd.f32 %v10412_v19, %v5937_v9  ;;  %v5860_v41 = vmul.f32 %v10394_v34, %v5837_v7  ;;  %v5938_v33 = vmul.f32 %v10399_v46, %v5915_v62  ;;  %v5707_v61 = vpop.xlane.xlu1 %5706 }
 0x9ca   : > { %7742 = vrsqrt.f32 %v5808_v0  ;;  %v5809_v44 = vadd.f32 1e-05, %v5793_v17 }
 0x9cb   : > { %5898 = vst [vmem:[%s10422_s28] sm:$0xff] %v5882_v45  ;;  %5976 = vst [vmem:[%s10422_s28 + $0x8] sm:$0xff] %v5960_v26  ;;  %v5883_v11 = vadd.f32 %v10407_v43, %v5860_v41  ;;  %v5961_v58 = vadd.f32 %v10412_v19, %v5938_v33  ;;  %v5753_v47 = vpop.xlane.xlu0 %5752 }
 0x9cc   : > { %v7739_v36 = vpop.eup %7738  ;;  %7744 = vrsqrt.f32 %v5809_v44  ;;  %v5778_v53 = vadd.f32 %v5753_v47, %v5705_v14 }
 0x9cd   : > { %5899 = vst [vmem:[%s10422_s28 + $0x10] sm:$0xff] %v5883_v11  ;;  %5977 = vst [vmem:[%s10422_s28 + $0x18] sm:$0xff] %v5961_v58  ;;  %v5838_v50 = vmul.f32 %v7739_v36, %v10208_v51  ;;  %v5916_v48 = vmul.f32 %v7739_v36, %v10213_v8  ;;  %v5755_v54 = vpop.xlane.xlu1 %5754 }
 0x9ce   : > { %v7741_v28 = vpop.eup %7740  ;;  %v5794_v42 = vmul.f32 0.00390625, %v5778_v53  ;;  %v5779_v20 = vadd.f32 %v5755_v54, %v5707_v61 }
 0x9cf   : > { %v5861_v18 = vmul.f32 %v10394_v34, %v5838_v50  ;;  %v5939_v52 = vmul.f32 %v10399_v46, %v5916_v48  ;;  %v5839_v63 = vmul.f32 %v7741_v28, %v10216_v15  ;;  %v5917_v30 = vmul.f32 %v7741_v28, %v10221_v1  ;;  %v5709_v60 = vpop.xlane.xlu0 %5708 }
 0x9d0   : > { %v5810_v49 = vadd.f32 1e-05, %v5794_v42  ;;  %v5795_v5 = vmul.f32 0.00390625, %v5779_v20 }
 0x9d1   : > { %v5884_v51 = vadd.f32 %v10407_v43, %v5861_v18  ;;  %v5962_v8 = vadd.f32 %v10412_v19, %v5939_v52  ;;  %v5862_v3 = vmul.f32 %v10394_v34, %v5839_v63  ;;  %v5940_v27 = vmul.f32 %v10399_v46, %v5917_v30  ;;  %v5711_v9 = vpop.xlane.xlu1 %5710 }
 0x9d2   : > { %7746 = vrsqrt.f32 %v5810_v49  ;;  %v5811_v62 = vadd.f32 1e-05, %v5795_v5 }
 0x9d3   : > { %5900 = vst [vmem:[%s10422_s28 + $0x20] sm:$0xff] %v5884_v51  ;;  %5978 = vst [vmem:[%s10422_s28 + $0x28] sm:$0xff] %v5962_v8  ;;  %v5885_v15 = vadd.f32 %v10407_v43, %v5862_v3  ;;  %v5963_v1 = vadd.f32 %v10412_v19, %v5940_v27  ;;  %v5757_v0 = vpop.xlane.xlu0 %5756 }
 0x9d4   : > { %v7743_v7 = vpop.eup %7742  ;;  %v5780_v45 = vadd.f32 %v5757_v0, %v5709_v60  ;;  %7748 = vrsqrt.f32 %v5811_v62 }
 0x9d5   : > { %5901 = vst [vmem:[%s10422_s28 + $0x30] sm:$0xff] %v5885_v15  ;;  %5979 = vst [vmem:[%s10422_s28 + $0x38] sm:$0xff] %v5963_v1  ;;  %v5840_v17 = vmul.f32 %v7743_v7, %v10228_v23  ;;  %v5918_v14 = vmul.f32 %v7743_v7, %v10233_v2  ;;  %v5759_v41 = vpop.xlane.xlu1 %5758 }
 0x9d6   : > { %v7745_v26 = vpop.eup %7744  ;;  %v5796_v58 = vmul.f32 0.00390625, %v5780_v45  ;;  %v5781_v36 = vadd.f32 %v5759_v41, %v5711_v9 }
 0x9d7   : > { %v5863_v33 = vmul.f32 %v10394_v34, %v5840_v17  ;;  %v5941_v44 = vmul.f32 %v10399_v46, %v5918_v14  ;;  %v5841_v61 = vmul.f32 %v7745_v26, %v10236_v24  ;;  %v5919_v11 = vmul.f32 %v7745_v26, %v10241_v35  ;;  %v5713_v23 = vpop.xlane.xlu0 %5712 }
 0x9d8   : > { %v5812_v53 = vadd.f32 1e-05, %v5796_v58  ;;  %v5797_v28 = vmul.f32 0.00390625, %v5781_v36 }
 0x9d9   : > { %v5886_v2 = vadd.f32 %v10407_v43, %v5863_v33  ;;  %v5964_v47 = vadd.f32 %v10412_v19, %v5941_v44  ;;  %v5864_v50 = vmul.f32 %v10394_v34, %v5841_v61  ;;  %v5942_v48 = vmul.f32 %v10399_v46, %v5919_v11  ;;  %v5715_v54 = vpop.xlane.xlu1 %5714 }
 0x9da   : > { %7750 = vrsqrt.f32 %v5812_v53  ;;  %v5813_v18 = vadd.f32 1e-05, %v5797_v28 }
 0x9db   : > { %5902 = vst [vmem:[%s10422_s28 + $0x40] sm:$0xff] %v5886_v2  ;;  %5980 = vst [vmem:[%s10422_s28 + $0x48] sm:$0xff] %v5964_v47  ;;  %v5887_v24 = vadd.f32 %v10407_v43, %v5864_v50  ;;  %v5965_v35 = vadd.f32 %v10412_v19, %v5942_v48  ;;  %v5761_v52 = vpop.xlane.xlu0 %5760 }
 0x9dc   : > { %v5782_v63 = vadd.f32 %v5761_v52, %v5713_v23  ;;  %v7747_v30 = vpop.eup %7746  ;;  %7752 = vrsqrt.f32 %v5813_v18 }
 0x9dd   : > { %5903 = vst [vmem:[%s10422_s28 + $0x50] sm:$0xff] %v5887_v24  ;;  %5981 = vst [vmem:[%s10422_s28 + $0x58] sm:$0xff] %v5965_v35  ;;  %v5763_v42 = vpop.xlane.xlu1 %5762  ;;  %v5842_v20 = vmul.f32 %v7747_v30, %v10251_v38  ;;  %v5920_v60 = vmul.f32 %v7747_v30, %v10254_v29 }
 0x9de   : > { %v5798_v51 = vmul.f32 0.00390625, %v5782_v63  ;;  %v5783_v8 = vadd.f32 %v5763_v42, %v5715_v54  ;;  %v7749_v3 = vpop.eup %7748 }
 0x9df   : > { %v5717_v27 = vpop.xlane.xlu0 %5716  ;;  %v5865_v49 = vmul.f32 %v10394_v34, %v5842_v20  ;;  %v5943_v5 = vmul.f32 %v10399_v46, %v5920_v60  ;;  %v5843_v9 = vmul.f32 %v7749_v3, %v10257_v57  ;;  %v5921_v15 = vmul.f32 %v7749_v3, %v10262_v32 }
 0x9e0   : > { %v5814_v1 = vadd.f32 1e-05, %v5798_v51  ;;  %v5799_v7 = vmul.f32 0.00390625, %v5783_v8 }
 0x9e1   : > { %v5719_v62 = vpop.xlane.xlu1 %5718  ;;  %v5888_v38 = vadd.f32 %v10407_v43, %v5865_v49  ;;  %v5966_v29 = vadd.f32 %v10412_v19, %v5943_v5  ;;  %v5866_v0 = vmul.f32 %v10394_v34, %v5843_v9  ;;  %v5944_v17 = vmul.f32 %v10399_v46, %v5921_v15 }
 0x9e2   : > { %7754 = vrsqrt.f32 %v5814_v1  ;;  %v5815_v14 = vadd.f32 1e-05, %v5799_v7 }
 0x9e3   : > { %v5765_v45 = vpop.xlane.xlu0 %5764  ;;  %5904 = vst [vmem:[%s10422_s28 + $0x60] sm:$0xff] %v5888_v38  ;;  %5982 = vst [vmem:[%s10422_s28 + $0x68] sm:$0xff] %v5966_v29  ;;  %v5889_v57 = vadd.f32 %v10407_v43, %v5866_v0  ;;  %v5967_v32 = vadd.f32 %v10412_v19, %v5944_v17 }
 0x9e4   : > { %v5784_v26 = vadd.f32 %v5765_v45, %v5717_v27  ;;  %v7751_v41 = vpop.eup %7750  ;;  %7756 = vrsqrt.f32 %v5815_v14 }
 0x9e5   : > { %v5767_v33 = vpop.xlane.xlu1 %5766  ;;  %5905 = vst [vmem:[%s10422_s28 + $0x70] sm:$0xff] %v5889_v57  ;;  %5983 = vst [vmem:[%s10422_s28 + $0x78] sm:$0xff] %v5967_v32  ;;  %v5844_v44 = vmul.f32 %v7751_v41, %v10271_v16  ;;  %v5922_v61 = vmul.f32 %v7751_v41, %v10276_v37 }
 0x9e6   : > { %v5800_v11 = vmul.f32 0.00390625, %v5784_v26  ;;  %v5785_v58 = vadd.f32 %v5767_v33, %v5719_v62  ;;  %v7753_v36 = vpop.eup %7752 }
 0x9e7   : > { %v5721_v23 = vpop.xlane.xlu0 %5720  ;;  %v5867_v2 = vmul.f32 %v10394_v34, %v5844_v44  ;;  %v5945_v47 = vmul.f32 %v10399_v46, %v5922_v61  ;;  %v5845_v50 = vmul.f32 %v7753_v36, %v10279_v31  ;;  %v5923_v48 = vmul.f32 %v7753_v36, %v10284_v56 }
 0x9e8   : > { %v5816_v53 = vadd.f32 1e-05, %v5800_v11  ;;  %v5801_v28 = vmul.f32 0.00390625, %v5785_v58 }
 0x9e9   : > { %v5723_v54 = vpop.xlane.xlu1 %5722  ;;  %v5890_v16 = vadd.f32 %v10407_v43, %v5867_v2  ;;  %v5968_v37 = vadd.f32 %v10412_v19, %v5945_v47  ;;  %v5868_v24 = vmul.f32 %v10394_v34, %v5845_v50  ;;  %v5946_v35 = vmul.f32 %v10399_v46, %v5923_v48 }
 0x9ea   : > { %7758 = vrsqrt.f32 %v5816_v53  ;;  %v5817_v18 = vadd.f32 1e-05, %v5801_v28 }
 0x9eb   : > { %v5769_v52 = vpop.xlane.xlu0 %5768  ;;  %5906 = vst [vmem:[%s10422_s28 + $0x80] sm:$0xff] %v5890_v16  ;;  %5984 = vst [vmem:[%s10422_s28 + $0x88] sm:$0xff] %v5968_v37  ;;  %v5891_v31 = vadd.f32 %v10407_v43, %v5868_v24  ;;  %v5969_v56 = vadd.f32 %v10412_v19, %v5946_v35 }
 0x9ec   : > { %v5786_v63 = vadd.f32 %v5769_v52, %v5721_v23  ;;  %v7755_v30 = vpop.eup %7754  ;;  %7760 = vrsqrt.f32 %v5817_v18 }
 0x9ed   : > { %v5771_v42 = vpop.xlane.xlu1 %5770  ;;  %5907 = vst [vmem:[%s10422_s28 + $0x90] sm:$0xff] %v5891_v31  ;;  %5985 = vst [vmem:[%s10422_s28 + $0x98] sm:$0xff] %v5969_v56  ;;  %v5846_v20 = vmul.f32 %v7755_v30, %v10293_v4  ;;  %v5924_v60 = vmul.f32 %v7755_v30, %v10298_v22 }
 0x9ee   : > { %v5802_v51 = vmul.f32 0.00390625, %v5786_v63  ;;  %v5787_v8 = vadd.f32 %v5771_v42, %v5723_v54  ;;  %v7757_v3 = vpop.eup %7756 }
 0x9ef   : > { %v5869_v27 = vmul.f32 %v10394_v34, %v5846_v20  ;;  %v5947_v49 = vmul.f32 %v10399_v46, %v5924_v60  ;;  %v5847_v5 = vmul.f32 %v7757_v3, %v10301_v13  ;;  %v5925_v9 = vmul.f32 %v7757_v3, %v10306_v40 }
 0x9f0   : > { %v5818_v15 = vadd.f32 1e-05, %v5802_v51  ;;  %v5803_v1 = vmul.f32 0.00390625, %v5787_v8 }
 0x9f1   : > { %v5892_v4 = vadd.f32 %v10407_v43, %v5869_v27  ;;  %v5970_v22 = vadd.f32 %v10412_v19, %v5947_v49  ;;  %v5870_v7 = vmul.f32 %v10394_v34, %v5847_v5  ;;  %v5948_v62 = vmul.f32 %v10399_v46, %v5925_v9 }
 0x9f2   : > { %7762 = vrsqrt.f32 %v5818_v15  ;;  %v5819_v38 = vadd.f32 1e-05, %v5803_v1 }
 0x9f3   : > { %5908 = vst [vmem:[%s10422_s28 + $0xa0] sm:$0xff] %v5892_v4  ;;  %5986 = vst [vmem:[%s10422_s28 + $0xa8] sm:$0xff] %v5970_v22  ;;  %v5893_v13 = vadd.f32 %v10407_v43, %v5870_v7  ;;  %v5971_v29 = vadd.f32 %v10412_v19, %v5948_v62 }
 0x9f4   : > { %v7759_v40 = vpop.eup %7758  ;;  %7764 = vrsqrt.f32 %v5819_v38 }
 0x9f5   : > { %5909 = vst [vmem:[%s10422_s28 + $0xb0] sm:$0xff] %v5893_v13  ;;  %5987 = vst [vmem:[%s10422_s28 + $0xb8] sm:$0xff] %v5971_v29  ;;  %v5848_v0 = vmul.f32 %v7759_v40, %v10315_v6  ;;  %v5926_v17 = vmul.f32 %v7759_v40, %v10320_v21 }
 0x9f6   : > { %v7761_v14 = vpop.eup %7760 }
 0x9f7   : > { %v5871_v45 = vmul.f32 %v10394_v34, %v5848_v0  ;;  %v5949_v57 = vmul.f32 %v10399_v46, %v5926_v17  ;;  %v5849_v32 = vmul.f32 %v7761_v14, %v10323_v39  ;;  %v5927_v26 = vmul.f32 %v7761_v14, %v10328_v10 }
 0x9f9   : > { %v5894_v41 = vadd.f32 %v10407_v43, %v5871_v45  ;;  %v5972_v33 = vadd.f32 %v10412_v19, %v5949_v57  ;;  %v5872_v44 = vmul.f32 %v10394_v34, %v5849_v32  ;;  %v5950_v6 = vmul.f32 %v10399_v46, %v5927_v26 }
 0x9fb   : > { %5910 = vst [vmem:[%s10422_s28 + $0xc0] sm:$0xff] %v5894_v41  ;;  %5988 = vst [vmem:[%s10422_s28 + $0xc8] sm:$0xff] %v5972_v33  ;;  %v5895_v21 = vadd.f32 %v10407_v43, %v5872_v44  ;;  %v5973_v61 = vadd.f32 %v10412_v19, %v5950_v6 }
 0x9fc   : > { %v7763_v11 = vpop.eup %7762 }
 0x9fd   : > { %5911 = vst [vmem:[%s10422_s28 + $0xd0] sm:$0xff] %v5895_v21  ;;  %5989 = vst [vmem:[%s10422_s28 + $0xd8] sm:$0xff] %v5973_v61  ;;  %v5850_v39 = vmul.f32 %v7763_v11, %v10337_v59  ;;  %v5928_v10 = vmul.f32 %v7763_v11, %v10342_v55 }
 0x9fe   : > { %v7765_v58 = vpop.eup %7764 }
 0x9ff   : > { %v5873_v36 = vmul.f32 %v10394_v34, %v5850_v39  ;;  %v5951_v23 = vmul.f32 %v10399_v46, %v5928_v10  ;;  %v5851_v2 = vmul.f32 %v7765_v58, %v10345_v25  ;;  %v5929_v47 = vmul.f32 %v7765_v58, %v10350_v12 }
 0xa01   : > { %v5896_v59 = vadd.f32 %v10407_v43, %v5873_v36  ;;  %v5974_v50 = vadd.f32 %v10412_v19, %v5951_v23  ;;  %v5874_v55 = vmul.f32 %v10394_v34, %v5851_v2  ;;  %v5952_v48 = vmul.f32 %v10399_v46, %v5929_v47 }
 0xa03   : > { %5912 = vst [vmem:[%s10422_s28 + $0xe0] sm:$0xff] %v5896_v59  ;;  %5990 = vst [vmem:[%s10422_s28 + $0xe8] sm:$0xff] %v5974_v50  ;;  %v5897_v25 = vadd.f32 %v10407_v43, %v5874_v55  ;;  %v5975_v12 = vadd.f32 %v10412_v19, %v5952_v48 }
 0xa05   : > { %5913 = vst [vmem:[%s10422_s28 + $0xf0] sm:$0xff] %v5897_v25  ;;  %5991 = vst [vmem:[%s10422_s28 + $0xf8] sm:$0xff] %v5975_v12 }
 0xa06   : > { %8039 = shalt.err (!%p8036_p0)
}
 0xa07   : > { %s8040_s17 = scalar_lea.hbm %s10541_s4, 4096  ;;  %s8044_s25 = scalar_lea.hbm %s10882_s19, 8192 }
 0xa08   : > { %p8041_p8 = scmp.ne.s32.totalorder %s10541_s4, %s8040_s17  ;;  %p8045_p1 = scmp.lt.u32.totalorder %s10541_s4, %s10882_s19 }
 0xa09   : > { %p8046_p5 = scmp.lt.u32.totalorder %s8044_s25, %s8040_s17  ;;  %p8048_p3 = scmp.lt.u32.totalorder %s8040_s17, %s10541_s4 }
 0xa0a   : > { %p8042_p2 = pnand %p8041_p8, %p10877_p12 }
 0xa0b   : > { %p8047_p10 = por %p8046_p5, %p8045_p1 }
 0xa0c   : > { %p8043_p7 = pneg %p8042_p2 }
 0xa0d   : > { %p8049_p6 = por %p8048_p3, %p8047_p10 }
 0xa0f   : > { %p8050_p13 = pnand %p8049_p6, %p8043_p7 }
 0xa11   : > { %8053 = shalt.err (!%p8050_p13)
}
 0xa12   : > { %s8149_s8 = smov 256   ;;  %s8150_s14 = smov 16  }
 0xa13   : > { %7389 = dma.vmem_to_hbm [thread:$0]  (%p10877_p12), %s10543_s6, 4096, %s10541_s4, %s6009_s23, %s8149_s8, %s8149_s8, %s8150_s14  }
 0xa14 PF: > { %s10883_s28 = sld [smem:[#allocation26_spill]]  ;;  %s10884_s15 = sld [smem:[#allocation33_spill]] }
 0xa15   : > { %s10885_s0 = sld [smem:[#allocation29_spill]] }
 0xa1a   : > { %s6063_s21 = sand.u32 1, %s10883_s28   ;;  %p10886_p11 = scmp.ne.s32.totalorder %s10884_s15, 0 }
 0xa1b   : > { %p10887_p9 = scmp.ge.s32.totalorder %s10885_s0, 2  ;;  %s6064_s22 = scalar_lea.sflag [#allocation4], %s6063_s21 }
 0xa1d   : > { %p7420_p4 = pnand %p10887_p9, %p10886_p11 }
 0xa1f   : > { %8099 = dma.done.wait (!%p7420_p4), %s6064_s22, 4096  }
 0xa20   : > { %8101 = vsyncadd (!%p7420_p4), %s6064_s22, 4294963200  ;;  %s6073_s3 = scalar_lea.sflag [#allocation18], %s6063_s21 }
 0xa21   : > { %8103 = dma.done.wait (!%p7420_p4), %s6073_s3, 2048  }
 0xa22   : > { %8105 = vsyncadd (!%p7420_p4), %s6073_s3, 4294965248  ;;  %s45_s22 = sadd.s32 1, %s10885_s0   ;;  %s10888_s13 = sld [smem:[#allocation32_spill]] }
 0xa23   : > { %p42_p0 = scmp.ge.s32.totalorder %s45_s22, 4   ;;  %s10889_s21 = sld [smem:[#allocation28_spill]] }
 0xa24   : > { %s10890_s1 = sld [smem:[#allocation30_spill]]  ;;  %s10891_s0 = smov %s8112_s30 }
 0xa25   : > { %s10892_s30 = smov %s8116_s20  ;;  %44 = sbr.rel (!%p42_p0) target bundleno = 30 (0x1e), region = 198 }
 0xa28   : > { %s10893_s20 = smov %s10888_s13 }
 0xa2c   :  { %6078 = vsyncpa [#allocation3], 1 }
 0xa2d   :  { %6080 = vsyncpa [#allocation3 + $0x1], 1 }
 0xa2e   :  { %6081 = vsyncpa [#allocation6], 1 }
 0xa2f   :  { %6083 = vsyncpa [#allocation6 + $0x1], 1 }
 0xa30   :  { %6084 = vsyncpa [#allocation9], 1 }
 0xa31   :  { %6085 = vsyncpa [#allocation12], 1 }
 0xa32   :  { %6086 = vsyncpa [#allocation15], 1 }
 0xa33   :  { %6087 = vsyncpa [#allocation4], 1 }
 0xa34   :  { %6089 = vsyncpa [#allocation4 + $0x1], 1 }
 0xa35   :  { %6090 = vsyncpa [#allocation18], 1 }
 0xa36   :  { %6092 = vsyncpa [#allocation18 + $0x1], 1 }

</bundles_post_ra>
